<compile_context>
chip_gen: v7x
topology: tpu7x:2x2x1
jax: 0.10.0
libtpu: 0.0.40
codegen_flags: <defaults>
</compile_context>

<pallas_src>
import jax
import jax.numpy as jnp
from jax.experimental import pallas as pl
from jax.experimental.pallas import tpu as pltpu

K = 4          # ConvTranspose kernel size
LRELU = 0.1    # LeakyReLU negative slope
BN_EPS = 1e-5  # PyTorch BatchNorm2d default eps

# Geometry implied by x_dim=(3,32,32), dec_in_dim=(16,)
H1, H2, H3 = 8, 16, 32        # spatial sizes after reshape / convT2 / convT3
C2, C3 = 2, 3                 # channel counts after convT2 / convT3
S2 = H2 * H2                  # 256  flattened per-channel spatial (layer 2)
W2 = C2 * S2                  # 512  lane width of the layer-2 activation
OUTW = C3 * 4 * S2            # 3072 phase-major output lane width

_VMEM = pl.BlockSpec(memory_space=pltpu.MemorySpace.VMEM)
_SMEM = pl.BlockSpec(memory_space=pltpu.MemorySpace.SMEM)


# ---------------------------------------------------------------------------
# One-time parameter folding (setup, outside the hot path)
# ---------------------------------------------------------------------------
def convt2_matrix(wt2):
    """Dense (64, C2*256) matrix equivalent of ConvTranspose2d(1,C2,k=4,s=2,p=1)
    acting on the (1,8,8)-reshaped linear output.  Column index = co*256+oy*16+ox."""
    iy = jnp.arange(H1)[:, None]                    # (8,1)
    oy = jnp.arange(H2)[None, :]                    # (1,16)
    ky = oy + 1 - 2 * iy                            # oy = 2*iy - 1 + ky
    vy = (ky >= 0) & (ky < K)
    kyc = jnp.clip(ky, 0, K - 1)
    w = wt2[0]                                      # (Co, 4, 4); Cin == 1
    sel = w[:, kyc[:, :, None, None], kyc[None, None, :, :]]        # (Co,8,16,8,16)
    mask = (vy[:, :, None, None] & vy[None, None, :, :]).astype(wt2.dtype)
    sel = sel * mask                                # zero out-of-kernel taps
    # (co, iy, oy, ix, ox) -> (iy, ix, co, oy, ox) -> (64, Co*256)
    return jnp.transpose(sel, (1, 3, 0, 2, 4)).reshape(H1 * H1, C2 * S2)


def convt3_phase_weights(wt3):
    """4-phase weights for ConvTranspose2d(k=4,s=2,p=1):
       out[2p+ry, 2q+rx] = sum_{ci,dy,dx} x[ci, p+ry+dy-1, q+rx+dx-1] *
                           Wt[ci, co, 3-ry-2dy, 3-rx-2dx]
       Flat layout: [co, ci, ry, rx, dy, dx]."""
    kidx = jnp.array([[3, 1], [2, 0]], dtype=jnp.int32)   # [r, d] -> 3 - r - 2d
    a = jnp.transpose(wt3, (1, 0, 2, 3))                  # (Co, Ci, 4, 4)
    ky = kidx[:, None, :, None]                           # broadcast over (ry,rx,dy,dx)
    kx = kidx[None, :, None, :]
    wph = a[:, :, ky, kx]                                 # (Co, Ci, 2, 2, 2, 2)
    return wph.reshape(-1)                                # (96,)


def prepare_params(raw):
    """Fold all weight layout transforms once (per-model, not per-call).
    Linear and ConvT2 are merged into a single affine map on the 16-d latent."""
    m2 = convt2_matrix(raw["w_ct2"])                       # (64, 512)
    b2 = jnp.repeat(raw["b_ct2"], S2)                      # (512,)
    return {
        "m_fused": raw["w_fc"] @ m2,                       # (16, 512)
        "b_fused": (raw["b_fc"] @ m2 + b2)[None, :],       # (1, 512)
        "g_bn2": raw["g_bn2"], "be_bn2": raw["be_bn2"],    # (2,), (2,)
        "w3_phase": convt3_phase_weights(raw["w_ct3"]),    # (96,)
        "b_ct3": raw["b_ct3"],                             # (3,)
    }


# ---------------------------------------------------------------------------
# Fused kernel: (Linear∘ConvT2) matmul -> BN+LeakyReLU -> ConvT3 -> Sigmoid
# ---------------------------------------------------------------------------
def decoder_kernel(x_ref, mf_ref, bf_ref, g2_ref, be2_ref, w3_ref, b3_ref, o_ref):
    B = x_ref.shape[0]

    # ---- Linear(16->64) + ConvT2(1->2) folded: ONE MXU matmul ---------------
    # Columns are (co, oy, ox) flattened -> lane-dense (B, 512) activation.
    h2 = jnp.dot(x_ref[...], mf_ref[...],
                 preferred_element_type=jnp.float32) + bf_ref[...]

    lane = jax.lax.broadcasted_iota(jnp.int32, (1, W2), 1)

    # ---- BatchNorm2d(2) (training-mode batch stats) + LeakyReLU -------------
    # Per-channel scalars -> one per-lane scale/shift vector -> single fused
    # normalize + activation pass over the full (B, 512) tensor.
    inv_n = 1.0 / (B * S2)
    h2sq = h2 * h2
    sc_sh = []
    for c in range(C2):
        lo = c * S2
        mean = jnp.sum(h2[:, lo:lo + S2]) * inv_n
        var = jnp.sum(h2sq[:, lo:lo + S2]) * inv_n - mean * mean
        scale = jax.lax.rsqrt(var + BN_EPS) * g2_ref[c]
        sc_sh.append((scale, be2_ref[c] - mean * scale))
    is_c0 = lane < S2
    scale_vec = jnp.where(is_c0, sc_sh[0][0], sc_sh[1][0])
    shift_vec = jnp.where(is_c0, sc_sh[0][1], sc_sh[1][1])
    y = h2 * scale_vec + shift_vec
    act = jnp.where(y > 0.0, y, LRELU * y)        # (B, 512): [c0 | c1] spatial

    # ---- ConvTranspose2d(2->3): 4-phase (sub-pixel) decomposition -----------
    # Tap x[ci, p+sy, q+sx] lives at lane offset d = 16*sy + sx within the
    # channel's 256-lane block.  One XLU roll of the full 512-lane activation
    # serves both channels (cross-channel/row wrap lands only on masked lanes);
    # iota row/column masks zero the out-of-range taps.
    q = lane & (H2 - 1)
    p = (lane >> 4) & (H2 - 1)
    row_ok = {-1: p >= 1, 0: None, 1: p <= H2 - 2}
    col_ok = {-1: q >= 1, 0: None, 1: q <= H2 - 2}

    def phases(s):                      # (r, d) pairs with r + d - 1 == s
        if s == -1:
            return ((0, 0),)
        if s == 1:
            return ((1, 1),)
        return ((0, 1), (1, 0))

    # 12 persistent accumulators (inverted loop nest keeps vreg pressure low);
    # initialize with the output bias.
    acc = {(co, ry, rx): jnp.full((B, S2), b3_ref[co], jnp.float32)
           for co in range(C3) for ry in range(2) for rx in range(2)}

    for sy in (-1, 0, 1):
        for sx in (-1, 0, 1):
            d = H2 * sy + sx
            v = act if d == 0 else pltpu.roll(act, shift=(-d) % W2, axis=1)
            m = row_ok[sy]
            if col_ok[sx] is not None:
                m = col_ok[sx] if m is None else (m & col_ok[sx])
            if m is not None:
                v = jnp.where(m, v, 0.0)
            taps = (v[:, :S2], v[:, S2:])           # lane-aligned channel slices
            for (ry, dy) in phases(sy):
                for (rx, dx) in phases(sx):
                    for co in range(C3):
                        for ci in range(C2):
                            idx = ((((co * C2 + ci) * 2 + ry) * 2 + rx) * 2 + dy) * 2 + dx
                            acc[(co, ry, rx)] = acc[(co, ry, rx)] + taps[ci] * w3_ref[idx]

    # ---- Sigmoid (EUP tanh form) + lane-dense, 1024-aligned per-co stores ---
    for co in range(C3):
        block = jnp.concatenate(
            [0.5 * jnp.tanh(0.5 * acc[(co, ry, rx)]) + 0.5
             for ry in range(2) for rx in range(2)], axis=-1)       # (B, 1024)
        o_ref[:, co * 4 * S2:(co + 1) * 4 * S2] = block


# ---------------------------------------------------------------------------
# Wrapper
# ---------------------------------------------------------------------------
def my_decoder_forward(x, p):
    B = x.shape[0]
    out = pl.pallas_call(
        decoder_kernel,
        out_shape=jax.ShapeDtypeStruct((B, OUTW), jnp.float32),
        in_specs=[_VMEM, _VMEM, _VMEM,          # x, fused matrix, fused bias
                  _SMEM, _SMEM, _SMEM, _SMEM],  # bn gamma/beta, w3 phase, b3
        out_specs=_VMEM,
    )(x.reshape(B, -1), p["m_fused"], p["b_fused"],
      p["g_bn2"], p["be_bn2"], p["w3_phase"], p["b_ct3"])
    # Un-interleave phase-major layout: [b, co, ry, rx, p, q] -> [b, co, 2p+ry, 2q+rx]
    out = out.reshape(B, C3, 2, 2, H2, H2).transpose(0, 1, 4, 2, 5, 3)
    return out.reshape(B, C3, H3, H3)


# ---------------------------------------------------------------------------
# Pure-JAX reference (independent conv via lax.conv_general_dilated)
# ---------------------------------------------------------------------------
def _flip_weight(wt):
    return jnp.flip(jnp.transpose(wt, (1, 0, 2, 3)), axis=(2, 3))


def _ref_convt(x, wt, b):
    wc = _flip_weight(wt)
    y = jax.lax.conv_general_dilated(
        x, wc, window_strides=(1, 1), padding=((2, 2), (2, 2)),
        lhs_dilation=(2, 2), dimension_numbers=("NCHW", "OIHW", "NCHW"))
    return y + b[None, :, None, None]


def reference_forward(x, p):
    B = x.shape[0]
    h = x.reshape(B, -1) @ p["w_fc"] + p["b_fc"]
    h = h.reshape(B, 1, 8, 8)
    h = _ref_convt(h, p["w_ct2"], p["b_ct2"])
    m = h.mean(axis=(0, 2, 3), keepdims=True)
    v = ((h - m) ** 2).mean(axis=(0, 2, 3), keepdims=True)
    h = (h - m) / jnp.sqrt(v + BN_EPS)
    h = h * p["g_bn2"][None, :, None, None] + p["be_bn2"][None, :, None, None]
    h = jnp.where(h > 0, h, LRELU * h)
    h = _ref_convt(h, p["w_ct3"], p["b_ct3"])
    return jax.nn.sigmoid(h)


# ---------------------------------------------------------------------------
# Main
# ---------------------------------------------------------------------------
if __name__ == "__main__":
    # x_dim = (3, 32, 32), dec_in_dim = (16,), batch = 2.
    key = jax.random.PRNGKey(0)
    ks = jax.random.split(key, 9)

    raw = {
        "w_fc":  0.1 * jax.random.normal(ks[0], (16, 64), jnp.float32),
        "b_fc":  0.1 * jax.random.normal(ks[1], (64,), jnp.float32),
        # ConvTranspose2d(1 -> 2), torch weight layout (Cin, Cout, kH, kW)
        "w_ct2": 0.2 * jax.random.normal(ks[2], (1, 2, K, K), jnp.float32),
        "b_ct2": 0.1 * jax.random.normal(ks[3], (2,), jnp.float32),
        "g_bn2": 1.0 + 0.1 * jax.random.normal(ks[4], (2,), jnp.float32),
        "be_bn2": 0.1 * jax.random.normal(ks[5], (2,), jnp.float32),
        # ConvTranspose2d(2 -> 3)
        "w_ct3": 0.2 * jax.random.normal(ks[6], (2, 3, K, K), jnp.float32),
        "b_ct3": 0.1 * jax.random.normal(ks[7], (3,), jnp.float32),
    }
    params = prepare_params(raw)          # one-time weight folding

    x = jax.random.normal(ks[8], (2, 16), jnp.float32)

    fwd = jax.jit(my_decoder_forward)
    out = jax.block_until_ready(fwd(x, params))
    ref = jax.block_until_ready(reference_forward(x, raw))

    assert out.shape == (2, 3, 32, 32), out.shape
    err = float(jnp.max(jnp.abs(out - ref)))
    assert jnp.allclose(out, ref, atol=1e-4, rtol=1e-4), err

    print("KERNEL_OK")
</pallas_src>

<mosaic_0001>
module attributes {stable_mosaic.version = 11 : i64} {
  func.func @decoder_kernel(%arg0: memref<2x16xf32, #tpu.memory_space<vmem>>, %arg1: memref<16x512xf32, #tpu.memory_space<vmem>>, %arg2: memref<1x512xf32, #tpu.memory_space<vmem>>, %arg3: memref<2xf32, #tpu.memory_space<smem>>, %arg4: memref<2xf32, #tpu.memory_space<smem>>, %arg5: memref<96xf32, #tpu.memory_space<smem>>, %arg6: memref<3xf32, #tpu.memory_space<smem>>, %arg7: memref<2x3072xf32, #tpu.memory_space<vmem>>) attributes {dimension_semantics = [], scalar_prefetch = 0 : i64, scratch_operands = 0 : i64, tpu.core_type = #tpu.core_type<tc>} {
    %c0 = arith.constant 0 : index
    %c0_0 = arith.constant 0 : index
    %0 = vector.load %arg0[%c0, %c0_0] : memref<2x16xf32, #tpu.memory_space<vmem>>, vector<2x16xf32>
    %c0_1 = arith.constant 0 : index
    %c0_2 = arith.constant 0 : index
    %1 = vector.load %arg1[%c0_1, %c0_2] : memref<16x512xf32, #tpu.memory_space<vmem>>, vector<16x512xf32>
    %cst = arith.constant dense<0.000000e+00> : vector<2x512xf32>
    %2 = tpu.matmul %0, %1, %cst {dimension_numbers = #tpu.dot_dimension_numbers<[1], [0], [0], [1], [0, 0, 1, 1], [], []>} : vector<2x16xf32>, vector<16x512xf32>, vector<2x512xf32> -> vector<2x512xf32>
    %c0_3 = arith.constant 0 : index
    %c0_4 = arith.constant 0 : index
    %3 = vector.load %arg2[%c0_3, %c0_4] : memref<1x512xf32, #tpu.memory_space<vmem>>, vector<1x512xf32>
    %4 = vector.broadcast %3 : vector<1x512xf32> to vector<2x512xf32>
    %5 = arith.addf %2, %4 : vector<2x512xf32>
    %6 = tpu.iota {dimensions = array<i32: 1>} : vector<1x512xi32>
    %7 = arith.mulf %5, %5 : vector<2x512xf32>
    %8 = vector.extract_strided_slice %5 {offsets = [0, 0], sizes = [2, 256], strides = [1, 1]} : vector<2x512xf32> to vector<2x256xf32>
    %9 = vector.shape_cast %8 : vector<2x256xf32> to vector<1x2x256xf32>
    %cst_5 = arith.constant dense<0.000000e+00> : vector<1xf32>
    %10 = vector.multi_reduction <add>, %9, %cst_5 [1, 2] : vector<1x2x256xf32> to vector<1xf32>
    %11 = vector.shape_cast %10 : vector<1xf32> to vector<1x1x1xf32>
    %12 = vector.extract %11[0, 0, 0] : f32 from vector<1x1x1xf32>
    %cst_6 = arith.constant 0.001953125 : f32
    %13 = arith.mulf %12, %cst_6 : f32
    %14 = vector.extract_strided_slice %7 {offsets = [0, 0], sizes = [2, 256], strides = [1, 1]} : vector<2x512xf32> to vector<2x256xf32>
    %15 = vector.shape_cast %14 : vector<2x256xf32> to vector<1x2x256xf32>
    %cst_7 = arith.constant dense<0.000000e+00> : vector<1xf32>
    %16 = vector.multi_reduction <add>, %15, %cst_7 [1, 2] : vector<1x2x256xf32> to vector<1xf32>
    %17 = vector.shape_cast %16 : vector<1xf32> to vector<1x1x1xf32>
    %18 = vector.extract %17[0, 0, 0] : f32 from vector<1x1x1xf32>
    %cst_8 = arith.constant 0.001953125 : f32
    %19 = arith.mulf %18, %cst_8 : f32
    %20 = arith.mulf %13, %13 : f32
    %21 = arith.subf %19, %20 : f32
    %cst_9 = arith.constant 9.99999974E-6 : f32
    %22 = arith.addf %21, %cst_9 : f32
    %23 = math.rsqrt %22 : f32
    %c0_10 = arith.constant 0 : index
    %24 = memref.load %arg3[%c0_10] : memref<2xf32, #tpu.memory_space<smem>>
    %25 = arith.mulf %23, %24 : f32
    %c0_11 = arith.constant 0 : index
    %26 = memref.load %arg4[%c0_11] : memref<2xf32, #tpu.memory_space<smem>>
    %27 = arith.mulf %13, %25 : f32
    %28 = arith.subf %26, %27 : f32
    %29 = vector.extract_strided_slice %5 {offsets = [0, 256], sizes = [2, 256], strides = [1, 1]} : vector<2x512xf32> to vector<2x256xf32>
    %30 = vector.shape_cast %29 : vector<2x256xf32> to vector<1x2x256xf32>
    %cst_12 = arith.constant dense<0.000000e+00> : vector<1xf32>
    %31 = vector.multi_reduction <add>, %30, %cst_12 [1, 2] : vector<1x2x256xf32> to vector<1xf32>
    %32 = vector.shape_cast %31 : vector<1xf32> to vector<1x1x1xf32>
    %33 = vector.extract %32[0, 0, 0] : f32 from vector<1x1x1xf32>
    %cst_13 = arith.constant 0.001953125 : f32
    %34 = arith.mulf %33, %cst_13 : f32
    %35 = vector.extract_strided_slice %7 {offsets = [0, 256], sizes = [2, 256], strides = [1, 1]} : vector<2x512xf32> to vector<2x256xf32>
    %36 = vector.shape_cast %35 : vector<2x256xf32> to vector<1x2x256xf32>
    %cst_14 = arith.constant dense<0.000000e+00> : vector<1xf32>
    %37 = vector.multi_reduction <add>, %36, %cst_14 [1, 2] : vector<1x2x256xf32> to vector<1xf32>
    %38 = vector.shape_cast %37 : vector<1xf32> to vector<1x1x1xf32>
    %39 = vector.extract %38[0, 0, 0] : f32 from vector<1x1x1xf32>
    %cst_15 = arith.constant 0.001953125 : f32
    %40 = arith.mulf %39, %cst_15 : f32
    %41 = arith.mulf %34, %34 : f32
    %42 = arith.subf %40, %41 : f32
    %cst_16 = arith.constant 9.99999974E-6 : f32
    %43 = arith.addf %42, %cst_16 : f32
    %44 = math.rsqrt %43 : f32
    %c1 = arith.constant 1 : index
    %45 = memref.load %arg3[%c1] : memref<2xf32, #tpu.memory_space<smem>>
    %46 = arith.mulf %44, %45 : f32
    %c1_17 = arith.constant 1 : index
    %47 = memref.load %arg4[%c1_17] : memref<2xf32, #tpu.memory_space<smem>>
    %48 = arith.mulf %34, %46 : f32
    %49 = arith.subf %47, %48 : f32
    %c256_i32 = arith.constant 256 : i32
    %50 = vector.broadcast %c256_i32 : i32 to vector<1x512xi32>
    %51 = arith.cmpi slt, %6, %50 : vector<1x512xi32>
    %52 = vector.broadcast %25 : f32 to vector<1x512xf32>
    %53 = vector.broadcast %46 : f32 to vector<1x512xf32>
    %54 = arith.select %51, %52, %53 : vector<1x512xi1>, vector<1x512xf32>
    %55 = vector.broadcast %28 : f32 to vector<1x512xf32>
    %56 = vector.broadcast %49 : f32 to vector<1x512xf32>
    %57 = arith.select %51, %55, %56 : vector<1x512xi1>, vector<1x512xf32>
    %58 = vector.broadcast %54 : vector<1x512xf32> to vector<2x512xf32>
    %59 = arith.mulf %5, %58 : vector<2x512xf32>
    %60 = vector.broadcast %57 : vector<1x512xf32> to vector<2x512xf32>
    %61 = arith.addf %59, %60 : vector<2x512xf32>
    %cst_18 = arith.constant 0.000000e+00 : f32
    %62 = vector.broadcast %cst_18 : f32 to vector<2x512xf32>
    %63 = arith.cmpf ogt, %61, %62 : vector<2x512xf32>
    %cst_19 = arith.constant 1.000000e-01 : f32
    %64 = vector.broadcast %cst_19 : f32 to vector<2x512xf32>
    %65 = arith.mulf %64, %61 : vector<2x512xf32>
    %66 = arith.select %63, %61, %65 : vector<2x512xi1>, vector<2x512xf32>
    %c15_i32 = arith.constant 15 : i32
    %67 = vector.broadcast %c15_i32 : i32 to vector<1x512xi32>
    %68 = arith.andi %6, %67 : vector<1x512xi32>
    %c4_i32 = arith.constant 4 : i32
    %69 = vector.broadcast %c4_i32 : i32 to vector<1x512xi32>
    %70 = arith.shrsi %6, %69 : vector<1x512xi32>
    %c15_i32_20 = arith.constant 15 : i32
    %71 = vector.broadcast %c15_i32_20 : i32 to vector<1x512xi32>
    %72 = arith.andi %70, %71 : vector<1x512xi32>
    %c1_i32 = arith.constant 1 : i32
    %73 = vector.broadcast %c1_i32 : i32 to vector<1x512xi32>
    %74 = arith.cmpi sge, %72, %73 : vector<1x512xi32>
    %c14_i32 = arith.constant 14 : i32
    %75 = vector.broadcast %c14_i32 : i32 to vector<1x512xi32>
    %76 = arith.cmpi sle, %72, %75 : vector<1x512xi32>
    %c1_i32_21 = arith.constant 1 : i32
    %77 = vector.broadcast %c1_i32_21 : i32 to vector<1x512xi32>
    %78 = arith.cmpi sge, %68, %77 : vector<1x512xi32>
    %c14_i32_22 = arith.constant 14 : i32
    %79 = vector.broadcast %c14_i32_22 : i32 to vector<1x512xi32>
    %80 = arith.cmpi sle, %68, %79 : vector<1x512xi32>
    %c0_23 = arith.constant 0 : index
    %81 = memref.load %arg6[%c0_23] : memref<3xf32, #tpu.memory_space<smem>>
    %82 = vector.broadcast %81 : f32 to vector<2x256xf32>
    %c0_24 = arith.constant 0 : index
    %83 = memref.load %arg6[%c0_24] : memref<3xf32, #tpu.memory_space<smem>>
    %84 = vector.broadcast %83 : f32 to vector<2x256xf32>
    %c0_25 = arith.constant 0 : index
    %85 = memref.load %arg6[%c0_25] : memref<3xf32, #tpu.memory_space<smem>>
    %86 = vector.broadcast %85 : f32 to vector<2x256xf32>
    %c0_26 = arith.constant 0 : index
    %87 = memref.load %arg6[%c0_26] : memref<3xf32, #tpu.memory_space<smem>>
    %88 = vector.broadcast %87 : f32 to vector<2x256xf32>
    %c1_27 = arith.constant 1 : index
    %89 = memref.load %arg6[%c1_27] : memref<3xf32, #tpu.memory_space<smem>>
    %90 = vector.broadcast %89 : f32 to vector<2x256xf32>
    %c1_28 = arith.constant 1 : index
    %91 = memref.load %arg6[%c1_28] : memref<3xf32, #tpu.memory_space<smem>>
    %92 = vector.broadcast %91 : f32 to vector<2x256xf32>
    %c1_29 = arith.constant 1 : index
    %93 = memref.load %arg6[%c1_29] : memref<3xf32, #tpu.memory_space<smem>>
    %94 = vector.broadcast %93 : f32 to vector<2x256xf32>
    %c1_30 = arith.constant 1 : index
    %95 = memref.load %arg6[%c1_30] : memref<3xf32, #tpu.memory_space<smem>>
    %96 = vector.broadcast %95 : f32 to vector<2x256xf32>
    %c2 = arith.constant 2 : index
    %97 = memref.load %arg6[%c2] : memref<3xf32, #tpu.memory_space<smem>>
    %98 = vector.broadcast %97 : f32 to vector<2x256xf32>
    %c2_31 = arith.constant 2 : index
    %99 = memref.load %arg6[%c2_31] : memref<3xf32, #tpu.memory_space<smem>>
    %100 = vector.broadcast %99 : f32 to vector<2x256xf32>
    %c2_32 = arith.constant 2 : index
    %101 = memref.load %arg6[%c2_32] : memref<3xf32, #tpu.memory_space<smem>>
    %102 = vector.broadcast %101 : f32 to vector<2x256xf32>
    %c2_33 = arith.constant 2 : index
    %103 = memref.load %arg6[%c2_33] : memref<3xf32, #tpu.memory_space<smem>>
    %104 = vector.broadcast %103 : f32 to vector<2x256xf32>
    %c17_i32 = arith.constant 17 : i32
    %105 = tpu.dynamic_rotate %66 by %c17_i32 dim 1 : vector<2x512xf32>, i32 -> vector<2x512xf32>
    %106 = arith.andi %74, %78 : vector<1x512xi1>
    %cst_34 = arith.constant 0.000000e+00 : f32
    %107 = vector.shape_cast %106 : vector<1x512xi1> to vector<1x512xi1>
    %108 = vector.broadcast %107 : vector<1x512xi1> to vector<2x512xi1>
    %109 = vector.broadcast %cst_34 : f32 to vector<2x512xf32>
    %110 = arith.select %108, %105, %109 : vector<2x512xi1>, vector<2x512xf32>
    %111 = vector.extract_strided_slice %110 {offsets = [0, 0], sizes = [2, 256], strides = [1, 1]} : vector<2x512xf32> to vector<2x256xf32>
    %112 = vector.extract_strided_slice %110 {offsets = [0, 256], sizes = [2, 256], strides = [1, 1]} : vector<2x512xf32> to vector<2x256xf32>
    %c0_35 = arith.constant 0 : index
    %113 = memref.load %arg5[%c0_35] : memref<96xf32, #tpu.memory_space<smem>>
    %114 = vector.broadcast %113 : f32 to vector<2x256xf32>
    %115 = arith.mulf %111, %114 : vector<2x256xf32>
    %116 = arith.addf %82, %115 : vector<2x256xf32>
    %c16 = arith.constant 16 : index
    %117 = memref.load %arg5[%c16] : memref<96xf32, #tpu.memory_space<smem>>
    %118 = vector.broadcast %117 : f32 to vector<2x256xf32>
    %119 = arith.mulf %112, %118 : vector<2x256xf32>
    %120 = arith.addf %116, %119 : vector<2x256xf32>
    %c32 = arith.constant 32 : index
    %121 = memref.load %arg5[%c32] : memref<96xf32, #tpu.memory_space<smem>>
    %122 = vector.broadcast %121 : f32 to vector<2x256xf32>
    %123 = arith.mulf %111, %122 : vector<2x256xf32>
    %124 = arith.addf %90, %123 : vector<2x256xf32>
    %c48 = arith.constant 48 : index
    %125 = memref.load %arg5[%c48] : memref<96xf32, #tpu.memory_space<smem>>
    %126 = vector.broadcast %125 : f32 to vector<2x256xf32>
    %127 = arith.mulf %112, %126 : vector<2x256xf32>
    %128 = arith.addf %124, %127 : vector<2x256xf32>
    %c64 = arith.constant 64 : index
    %129 = memref.load %arg5[%c64] : memref<96xf32, #tpu.memory_space<smem>>
    %130 = vector.broadcast %129 : f32 to vector<2x256xf32>
    %131 = arith.mulf %111, %130 : vector<2x256xf32>
    %132 = arith.addf %98, %131 : vector<2x256xf32>
    %c80 = arith.constant 80 : index
    %133 = memref.load %arg5[%c80] : memref<96xf32, #tpu.memory_space<smem>>
    %134 = vector.broadcast %133 : f32 to vector<2x256xf32>
    %135 = arith.mulf %112, %134 : vector<2x256xf32>
    %136 = arith.addf %132, %135 : vector<2x256xf32>
    %c16_i32 = arith.constant 16 : i32
    %137 = tpu.dynamic_rotate %66 by %c16_i32 dim 1 : vector<2x512xf32>, i32 -> vector<2x512xf32>
    %cst_36 = arith.constant 0.000000e+00 : f32
    %138 = vector.shape_cast %74 : vector<1x512xi1> to vector<1x512xi1>
    %139 = vector.broadcast %138 : vector<1x512xi1> to vector<2x512xi1>
    %140 = vector.broadcast %cst_36 : f32 to vector<2x512xf32>
    %141 = arith.select %139, %137, %140 : vector<2x512xi1>, vector<2x512xf32>
    %142 = vector.extract_strided_slice %141 {offsets = [0, 0], sizes = [2, 256], strides = [1, 1]} : vector<2x512xf32> to vector<2x256xf32>
    %143 = vector.extract_strided_slice %141 {offsets = [0, 256], sizes = [2, 256], strides = [1, 1]} : vector<2x512xf32> to vector<2x256xf32>
    %c1_37 = arith.constant 1 : index
    %144 = memref.load %arg5[%c1_37] : memref<96xf32, #tpu.memory_space<smem>>
    %145 = vector.broadcast %144 : f32 to vector<2x256xf32>
    %146 = arith.mulf %142, %145 : vector<2x256xf32>
    %147 = arith.addf %120, %146 : vector<2x256xf32>
    %c17 = arith.constant 17 : index
    %148 = memref.load %arg5[%c17] : memref<96xf32, #tpu.memory_space<smem>>
    %149 = vector.broadcast %148 : f32 to vector<2x256xf32>
    %150 = arith.mulf %143, %149 : vector<2x256xf32>
    %151 = arith.addf %147, %150 : vector<2x256xf32>
    %c33 = arith.constant 33 : index
    %152 = memref.load %arg5[%c33] : memref<96xf32, #tpu.memory_space<smem>>
    %153 = vector.broadcast %152 : f32 to vector<2x256xf32>
    %154 = arith.mulf %142, %153 : vector<2x256xf32>
    %155 = arith.addf %128, %154 : vector<2x256xf32>
    %c49 = arith.constant 49 : index
    %156 = memref.load %arg5[%c49] : memref<96xf32, #tpu.memory_space<smem>>
    %157 = vector.broadcast %156 : f32 to vector<2x256xf32>
    %158 = arith.mulf %143, %157 : vector<2x256xf32>
    %159 = arith.addf %155, %158 : vector<2x256xf32>
    %c65 = arith.constant 65 : index
    %160 = memref.load %arg5[%c65] : memref<96xf32, #tpu.memory_space<smem>>
    %161 = vector.broadcast %160 : f32 to vector<2x256xf32>
    %162 = arith.mulf %142, %161 : vector<2x256xf32>
    %163 = arith.addf %136, %162 : vector<2x256xf32>
    %c81 = arith.constant 81 : index
    %164 = memref.load %arg5[%c81] : memref<96xf32, #tpu.memory_space<smem>>
    %165 = vector.broadcast %164 : f32 to vector<2x256xf32>
    %166 = arith.mulf %143, %165 : vector<2x256xf32>
    %167 = arith.addf %163, %166 : vector<2x256xf32>
    %c4 = arith.constant 4 : index
    %168 = memref.load %arg5[%c4] : memref<96xf32, #tpu.memory_space<smem>>
    %169 = vector.broadcast %168 : f32 to vector<2x256xf32>
    %170 = arith.mulf %142, %169 : vector<2x256xf32>
    %171 = arith.addf %84, %170 : vector<2x256xf32>
    %c20 = arith.constant 20 : index
    %172 = memref.load %arg5[%c20] : memref<96xf32, #tpu.memory_space<smem>>
    %173 = vector.broadcast %172 : f32 to vector<2x256xf32>
    %174 = arith.mulf %143, %173 : vector<2x256xf32>
    %175 = arith.addf %171, %174 : vector<2x256xf32>
    %c36 = arith.constant 36 : index
    %176 = memref.load %arg5[%c36] : memref<96xf32, #tpu.memory_space<smem>>
    %177 = vector.broadcast %176 : f32 to vector<2x256xf32>
    %178 = arith.mulf %142, %177 : vector<2x256xf32>
    %179 = arith.addf %92, %178 : vector<2x256xf32>
    %c52 = arith.constant 52 : index
    %180 = memref.load %arg5[%c52] : memref<96xf32, #tpu.memory_space<smem>>
    %181 = vector.broadcast %180 : f32 to vector<2x256xf32>
    %182 = arith.mulf %143, %181 : vector<2x256xf32>
    %183 = arith.addf %179, %182 : vector<2x256xf32>
    %c68 = arith.constant 68 : index
    %184 = memref.load %arg5[%c68] : memref<96xf32, #tpu.memory_space<smem>>
    %185 = vector.broadcast %184 : f32 to vector<2x256xf32>
    %186 = arith.mulf %142, %185 : vector<2x256xf32>
    %187 = arith.addf %100, %186 : vector<2x256xf32>
    %c84 = arith.constant 84 : index
    %188 = memref.load %arg5[%c84] : memref<96xf32, #tpu.memory_space<smem>>
    %189 = vector.broadcast %188 : f32 to vector<2x256xf32>
    %190 = arith.mulf %143, %189 : vector<2x256xf32>
    %191 = arith.addf %187, %190 : vector<2x256xf32>
    %c15_i32_38 = arith.constant 15 : i32
    %192 = tpu.dynamic_rotate %66 by %c15_i32_38 dim 1 : vector<2x512xf32>, i32 -> vector<2x512xf32>
    %193 = arith.andi %74, %80 : vector<1x512xi1>
    %cst_39 = arith.constant 0.000000e+00 : f32
    %194 = vector.shape_cast %193 : vector<1x512xi1> to vector<1x512xi1>
    %195 = vector.broadcast %194 : vector<1x512xi1> to vector<2x512xi1>
    %196 = vector.broadcast %cst_39 : f32 to vector<2x512xf32>
    %197 = arith.select %195, %192, %196 : vector<2x512xi1>, vector<2x512xf32>
    %198 = vector.extract_strided_slice %197 {offsets = [0, 0], sizes = [2, 256], strides = [1, 1]} : vector<2x512xf32> to vector<2x256xf32>
    %199 = vector.extract_strided_slice %197 {offsets = [0, 256], sizes = [2, 256], strides = [1, 1]} : vector<2x512xf32> to vector<2x256xf32>
    %c5 = arith.constant 5 : index
    %200 = memref.load %arg5[%c5] : memref<96xf32, #tpu.memory_space<smem>>
    %201 = vector.broadcast %200 : f32 to vector<2x256xf32>
    %202 = arith.mulf %198, %201 : vector<2x256xf32>
    %203 = arith.addf %175, %202 : vector<2x256xf32>
    %c21 = arith.constant 21 : index
    %204 = memref.load %arg5[%c21] : memref<96xf32, #tpu.memory_space<smem>>
    %205 = vector.broadcast %204 : f32 to vector<2x256xf32>
    %206 = arith.mulf %199, %205 : vector<2x256xf32>
    %207 = arith.addf %203, %206 : vector<2x256xf32>
    %c37 = arith.constant 37 : index
    %208 = memref.load %arg5[%c37] : memref<96xf32, #tpu.memory_space<smem>>
    %209 = vector.broadcast %208 : f32 to vector<2x256xf32>
    %210 = arith.mulf %198, %209 : vector<2x256xf32>
    %211 = arith.addf %183, %210 : vector<2x256xf32>
    %c53 = arith.constant 53 : index
    %212 = memref.load %arg5[%c53] : memref<96xf32, #tpu.memory_space<smem>>
    %213 = vector.broadcast %212 : f32 to vector<2x256xf32>
    %214 = arith.mulf %199, %213 : vector<2x256xf32>
    %215 = arith.addf %211, %214 : vector<2x256xf32>
    %c69 = arith.constant 69 : index
    %216 = memref.load %arg5[%c69] : memref<96xf32, #tpu.memory_space<smem>>
    %217 = vector.broadcast %216 : f32 to vector<2x256xf32>
    %218 = arith.mulf %198, %217 : vector<2x256xf32>
    %219 = arith.addf %191, %218 : vector<2x256xf32>
    %c85 = arith.constant 85 : index
    %220 = memref.load %arg5[%c85] : memref<96xf32, #tpu.memory_space<smem>>
    %221 = vector.broadcast %220 : f32 to vector<2x256xf32>
    %222 = arith.mulf %199, %221 : vector<2x256xf32>
    %223 = arith.addf %219, %222 : vector<2x256xf32>
    %c1_i32_40 = arith.constant 1 : i32
    %224 = tpu.dynamic_rotate %66 by %c1_i32_40 dim 1 : vector<2x512xf32>, i32 -> vector<2x512xf32>
    %cst_41 = arith.constant 0.000000e+00 : f32
    %225 = vector.shape_cast %78 : vector<1x512xi1> to vector<1x512xi1>
    %226 = vector.broadcast %225 : vector<1x512xi1> to vector<2x512xi1>
    %227 = vector.broadcast %cst_41 : f32 to vector<2x512xf32>
    %228 = arith.select %226, %224, %227 : vector<2x512xi1>, vector<2x512xf32>
    %229 = vector.extract_strided_slice %228 {offsets = [0, 0], sizes = [2, 256], strides = [1, 1]} : vector<2x512xf32> to vector<2x256xf32>
    %230 = vector.extract_strided_slice %228 {offsets = [0, 256], sizes = [2, 256], strides = [1, 1]} : vector<2x512xf32> to vector<2x256xf32>
    %c2_42 = arith.constant 2 : index
    %231 = memref.load %arg5[%c2_42] : memref<96xf32, #tpu.memory_space<smem>>
    %232 = vector.broadcast %231 : f32 to vector<2x256xf32>
    %233 = arith.mulf %229, %232 : vector<2x256xf32>
    %234 = arith.addf %151, %233 : vector<2x256xf32>
    %c18 = arith.constant 18 : index
    %235 = memref.load %arg5[%c18] : memref<96xf32, #tpu.memory_space<smem>>
    %236 = vector.broadcast %235 : f32 to vector<2x256xf32>
    %237 = arith.mulf %230, %236 : vector<2x256xf32>
    %238 = arith.addf %234, %237 : vector<2x256xf32>
    %c34 = arith.constant 34 : index
    %239 = memref.load %arg5[%c34] : memref<96xf32, #tpu.memory_space<smem>>
    %240 = vector.broadcast %239 : f32 to vector<2x256xf32>
    %241 = arith.mulf %229, %240 : vector<2x256xf32>
    %242 = arith.addf %159, %241 : vector<2x256xf32>
    %c50 = arith.constant 50 : index
    %243 = memref.load %arg5[%c50] : memref<96xf32, #tpu.memory_space<smem>>
    %244 = vector.broadcast %243 : f32 to vector<2x256xf32>
    %245 = arith.mulf %230, %244 : vector<2x256xf32>
    %246 = arith.addf %242, %245 : vector<2x256xf32>
    %c66 = arith.constant 66 : index
    %247 = memref.load %arg5[%c66] : memref<96xf32, #tpu.memory_space<smem>>
    %248 = vector.broadcast %247 : f32 to vector<2x256xf32>
    %249 = arith.mulf %229, %248 : vector<2x256xf32>
    %250 = arith.addf %167, %249 : vector<2x256xf32>
    %c82 = arith.constant 82 : index
    %251 = memref.load %arg5[%c82] : memref<96xf32, #tpu.memory_space<smem>>
    %252 = vector.broadcast %251 : f32 to vector<2x256xf32>
    %253 = arith.mulf %230, %252 : vector<2x256xf32>
    %254 = arith.addf %250, %253 : vector<2x256xf32>
    %c8 = arith.constant 8 : index
    %255 = memref.load %arg5[%c8] : memref<96xf32, #tpu.memory_space<smem>>
    %256 = vector.broadcast %255 : f32 to vector<2x256xf32>
    %257 = arith.mulf %229, %256 : vector<2x256xf32>
    %258 = arith.addf %86, %257 : vector<2x256xf32>
    %c24 = arith.constant 24 : index
    %259 = memref.load %arg5[%c24] : memref<96xf32, #tpu.memory_space<smem>>
    %260 = vector.broadcast %259 : f32 to vector<2x256xf32>
    %261 = arith.mulf %230, %260 : vector<2x256xf32>
    %262 = arith.addf %258, %261 : vector<2x256xf32>
    %c40 = arith.constant 40 : index
    %263 = memref.load %arg5[%c40] : memref<96xf32, #tpu.memory_space<smem>>
    %264 = vector.broadcast %263 : f32 to vector<2x256xf32>
    %265 = arith.mulf %229, %264 : vector<2x256xf32>
    %266 = arith.addf %94, %265 : vector<2x256xf32>
    %c56 = arith.constant 56 : index
    %267 = memref.load %arg5[%c56] : memref<96xf32, #tpu.memory_space<smem>>
    %268 = vector.broadcast %267 : f32 to vector<2x256xf32>
    %269 = arith.mulf %230, %268 : vector<2x256xf32>
    %270 = arith.addf %266, %269 : vector<2x256xf32>
    %c72 = arith.constant 72 : index
    %271 = memref.load %arg5[%c72] : memref<96xf32, #tpu.memory_space<smem>>
    %272 = vector.broadcast %271 : f32 to vector<2x256xf32>
    %273 = arith.mulf %229, %272 : vector<2x256xf32>
    %274 = arith.addf %102, %273 : vector<2x256xf32>
    %c88 = arith.constant 88 : index
    %275 = memref.load %arg5[%c88] : memref<96xf32, #tpu.memory_space<smem>>
    %276 = vector.broadcast %275 : f32 to vector<2x256xf32>
    %277 = arith.mulf %230, %276 : vector<2x256xf32>
    %278 = arith.addf %274, %277 : vector<2x256xf32>
    %279 = vector.extract_strided_slice %66 {offsets = [0, 0], sizes = [2, 256], strides = [1, 1]} : vector<2x512xf32> to vector<2x256xf32>
    %280 = vector.extract_strided_slice %66 {offsets = [0, 256], sizes = [2, 256], strides = [1, 1]} : vector<2x512xf32> to vector<2x256xf32>
    %c3 = arith.constant 3 : index
    %281 = memref.load %arg5[%c3] : memref<96xf32, #tpu.memory_space<smem>>
    %282 = vector.broadcast %281 : f32 to vector<2x256xf32>
    %283 = arith.mulf %279, %282 : vector<2x256xf32>
    %284 = arith.addf %238, %283 : vector<2x256xf32>
    %c19 = arith.constant 19 : index
    %285 = memref.load %arg5[%c19] : memref<96xf32, #tpu.memory_space<smem>>
    %286 = vector.broadcast %285 : f32 to vector<2x256xf32>
    %287 = arith.mulf %280, %286 : vector<2x256xf32>
    %288 = arith.addf %284, %287 : vector<2x256xf32>
    %c35 = arith.constant 35 : index
    %289 = memref.load %arg5[%c35] : memref<96xf32, #tpu.memory_space<smem>>
    %290 = vector.broadcast %289 : f32 to vector<2x256xf32>
    %291 = arith.mulf %279, %290 : vector<2x256xf32>
    %292 = arith.addf %246, %291 : vector<2x256xf32>
    %c51 = arith.constant 51 : index
    %293 = memref.load %arg5[%c51] : memref<96xf32, #tpu.memory_space<smem>>
    %294 = vector.broadcast %293 : f32 to vector<2x256xf32>
    %295 = arith.mulf %280, %294 : vector<2x256xf32>
    %296 = arith.addf %292, %295 : vector<2x256xf32>
    %c67 = arith.constant 67 : index
    %297 = memref.load %arg5[%c67] : memref<96xf32, #tpu.memory_space<smem>>
    %298 = vector.broadcast %297 : f32 to vector<2x256xf32>
    %299 = arith.mulf %279, %298 : vector<2x256xf32>
    %300 = arith.addf %254, %299 : vector<2x256xf32>
    %c83 = arith.constant 83 : index
    %301 = memref.load %arg5[%c83] : memref<96xf32, #tpu.memory_space<smem>>
    %302 = vector.broadcast %301 : f32 to vector<2x256xf32>
    %303 = arith.mulf %280, %302 : vector<2x256xf32>
    %304 = arith.addf %300, %303 : vector<2x256xf32>
    %c6 = arith.constant 6 : index
    %305 = memref.load %arg5[%c6] : memref<96xf32, #tpu.memory_space<smem>>
    %306 = vector.broadcast %305 : f32 to vector<2x256xf32>
    %307 = arith.mulf %279, %306 : vector<2x256xf32>
    %308 = arith.addf %207, %307 : vector<2x256xf32>
    %c22 = arith.constant 22 : index
    %309 = memref.load %arg5[%c22] : memref<96xf32, #tpu.memory_space<smem>>
    %310 = vector.broadcast %309 : f32 to vector<2x256xf32>
    %311 = arith.mulf %280, %310 : vector<2x256xf32>
    %312 = arith.addf %308, %311 : vector<2x256xf32>
    %c38 = arith.constant 38 : index
    %313 = memref.load %arg5[%c38] : memref<96xf32, #tpu.memory_space<smem>>
    %314 = vector.broadcast %313 : f32 to vector<2x256xf32>
    %315 = arith.mulf %279, %314 : vector<2x256xf32>
    %316 = arith.addf %215, %315 : vector<2x256xf32>
    %c54 = arith.constant 54 : index
    %317 = memref.load %arg5[%c54] : memref<96xf32, #tpu.memory_space<smem>>
    %318 = vector.broadcast %317 : f32 to vector<2x256xf32>
    %319 = arith.mulf %280, %318 : vector<2x256xf32>
    %320 = arith.addf %316, %319 : vector<2x256xf32>
    %c70 = arith.constant 70 : index
    %321 = memref.load %arg5[%c70] : memref<96xf32, #tpu.memory_space<smem>>
    %322 = vector.broadcast %321 : f32 to vector<2x256xf32>
    %323 = arith.mulf %279, %322 : vector<2x256xf32>
    %324 = arith.addf %223, %323 : vector<2x256xf32>
    %c86 = arith.constant 86 : index
    %325 = memref.load %arg5[%c86] : memref<96xf32, #tpu.memory_space<smem>>
    %326 = vector.broadcast %325 : f32 to vector<2x256xf32>
    %327 = arith.mulf %280, %326 : vector<2x256xf32>
    %328 = arith.addf %324, %327 : vector<2x256xf32>
    %c9 = arith.constant 9 : index
    %329 = memref.load %arg5[%c9] : memref<96xf32, #tpu.memory_space<smem>>
    %330 = vector.broadcast %329 : f32 to vector<2x256xf32>
    %331 = arith.mulf %279, %330 : vector<2x256xf32>
    %332 = arith.addf %262, %331 : vector<2x256xf32>
    %c25 = arith.constant 25 : index
    %333 = memref.load %arg5[%c25] : memref<96xf32, #tpu.memory_space<smem>>
    %334 = vector.broadcast %333 : f32 to vector<2x256xf32>
    %335 = arith.mulf %280, %334 : vector<2x256xf32>
    %336 = arith.addf %332, %335 : vector<2x256xf32>
    %c41 = arith.constant 41 : index
    %337 = memref.load %arg5[%c41] : memref<96xf32, #tpu.memory_space<smem>>
    %338 = vector.broadcast %337 : f32 to vector<2x256xf32>
    %339 = arith.mulf %279, %338 : vector<2x256xf32>
    %340 = arith.addf %270, %339 : vector<2x256xf32>
    %c57 = arith.constant 57 : index
    %341 = memref.load %arg5[%c57] : memref<96xf32, #tpu.memory_space<smem>>
    %342 = vector.broadcast %341 : f32 to vector<2x256xf32>
    %343 = arith.mulf %280, %342 : vector<2x256xf32>
    %344 = arith.addf %340, %343 : vector<2x256xf32>
    %c73 = arith.constant 73 : index
    %345 = memref.load %arg5[%c73] : memref<96xf32, #tpu.memory_space<smem>>
    %346 = vector.broadcast %345 : f32 to vector<2x256xf32>
    %347 = arith.mulf %279, %346 : vector<2x256xf32>
    %348 = arith.addf %278, %347 : vector<2x256xf32>
    %c89 = arith.constant 89 : index
    %349 = memref.load %arg5[%c89] : memref<96xf32, #tpu.memory_space<smem>>
    %350 = vector.broadcast %349 : f32 to vector<2x256xf32>
    %351 = arith.mulf %280, %350 : vector<2x256xf32>
    %352 = arith.addf %348, %351 : vector<2x256xf32>
    %c12 = arith.constant 12 : index
    %353 = memref.load %arg5[%c12] : memref<96xf32, #tpu.memory_space<smem>>
    %354 = vector.broadcast %353 : f32 to vector<2x256xf32>
    %355 = arith.mulf %279, %354 : vector<2x256xf32>
    %356 = arith.addf %88, %355 : vector<2x256xf32>
    %c28 = arith.constant 28 : index
    %357 = memref.load %arg5[%c28] : memref<96xf32, #tpu.memory_space<smem>>
    %358 = vector.broadcast %357 : f32 to vector<2x256xf32>
    %359 = arith.mulf %280, %358 : vector<2x256xf32>
    %360 = arith.addf %356, %359 : vector<2x256xf32>
    %c44 = arith.constant 44 : index
    %361 = memref.load %arg5[%c44] : memref<96xf32, #tpu.memory_space<smem>>
    %362 = vector.broadcast %361 : f32 to vector<2x256xf32>
    %363 = arith.mulf %279, %362 : vector<2x256xf32>
    %364 = arith.addf %96, %363 : vector<2x256xf32>
    %c60 = arith.constant 60 : index
    %365 = memref.load %arg5[%c60] : memref<96xf32, #tpu.memory_space<smem>>
    %366 = vector.broadcast %365 : f32 to vector<2x256xf32>
    %367 = arith.mulf %280, %366 : vector<2x256xf32>
    %368 = arith.addf %364, %367 : vector<2x256xf32>
    %c76 = arith.constant 76 : index
    %369 = memref.load %arg5[%c76] : memref<96xf32, #tpu.memory_space<smem>>
    %370 = vector.broadcast %369 : f32 to vector<2x256xf32>
    %371 = arith.mulf %279, %370 : vector<2x256xf32>
    %372 = arith.addf %104, %371 : vector<2x256xf32>
    %c92 = arith.constant 92 : index
    %373 = memref.load %arg5[%c92] : memref<96xf32, #tpu.memory_space<smem>>
    %374 = vector.broadcast %373 : f32 to vector<2x256xf32>
    %375 = arith.mulf %280, %374 : vector<2x256xf32>
    %376 = arith.addf %372, %375 : vector<2x256xf32>
    %c511_i32 = arith.constant 511 : i32
    %377 = tpu.dynamic_rotate %66 by %c511_i32 dim 1 : vector<2x512xf32>, i32 -> vector<2x512xf32>
    %cst_43 = arith.constant 0.000000e+00 : f32
    %378 = vector.shape_cast %80 : vector<1x512xi1> to vector<1x512xi1>
    %379 = vector.broadcast %378 : vector<1x512xi1> to vector<2x512xi1>
    %380 = vector.broadcast %cst_43 : f32 to vector<2x512xf32>
    %381 = arith.select %379, %377, %380 : vector<2x512xi1>, vector<2x512xf32>
    %382 = vector.extract_strided_slice %381 {offsets = [0, 0], sizes = [2, 256], strides = [1, 1]} : vector<2x512xf32> to vector<2x256xf32>
    %383 = vector.extract_strided_slice %381 {offsets = [0, 256], sizes = [2, 256], strides = [1, 1]} : vector<2x512xf32> to vector<2x256xf32>
    %c7 = arith.constant 7 : index
    %384 = memref.load %arg5[%c7] : memref<96xf32, #tpu.memory_space<smem>>
    %385 = vector.broadcast %384 : f32 to vector<2x256xf32>
    %386 = arith.mulf %382, %385 : vector<2x256xf32>
    %387 = arith.addf %312, %386 : vector<2x256xf32>
    %c23 = arith.constant 23 : index
    %388 = memref.load %arg5[%c23] : memref<96xf32, #tpu.memory_space<smem>>
    %389 = vector.broadcast %388 : f32 to vector<2x256xf32>
    %390 = arith.mulf %383, %389 : vector<2x256xf32>
    %391 = arith.addf %387, %390 : vector<2x256xf32>
    %c39 = arith.constant 39 : index
    %392 = memref.load %arg5[%c39] : memref<96xf32, #tpu.memory_space<smem>>
    %393 = vector.broadcast %392 : f32 to vector<2x256xf32>
    %394 = arith.mulf %382, %393 : vector<2x256xf32>
    %395 = arith.addf %320, %394 : vector<2x256xf32>
    %c55 = arith.constant 55 : index
    %396 = memref.load %arg5[%c55] : memref<96xf32, #tpu.memory_space<smem>>
    %397 = vector.broadcast %396 : f32 to vector<2x256xf32>
    %398 = arith.mulf %383, %397 : vector<2x256xf32>
    %399 = arith.addf %395, %398 : vector<2x256xf32>
    %c71 = arith.constant 71 : index
    %400 = memref.load %arg5[%c71] : memref<96xf32, #tpu.memory_space<smem>>
    %401 = vector.broadcast %400 : f32 to vector<2x256xf32>
    %402 = arith.mulf %382, %401 : vector<2x256xf32>
    %403 = arith.addf %328, %402 : vector<2x256xf32>
    %c87 = arith.constant 87 : index
    %404 = memref.load %arg5[%c87] : memref<96xf32, #tpu.memory_space<smem>>
    %405 = vector.broadcast %404 : f32 to vector<2x256xf32>
    %406 = arith.mulf %383, %405 : vector<2x256xf32>
    %407 = arith.addf %403, %406 : vector<2x256xf32>
    %c13 = arith.constant 13 : index
    %408 = memref.load %arg5[%c13] : memref<96xf32, #tpu.memory_space<smem>>
    %409 = vector.broadcast %408 : f32 to vector<2x256xf32>
    %410 = arith.mulf %382, %409 : vector<2x256xf32>
    %411 = arith.addf %360, %410 : vector<2x256xf32>
    %c29 = arith.constant 29 : index
    %412 = memref.load %arg5[%c29] : memref<96xf32, #tpu.memory_space<smem>>
    %413 = vector.broadcast %412 : f32 to vector<2x256xf32>
    %414 = arith.mulf %383, %413 : vector<2x256xf32>
    %415 = arith.addf %411, %414 : vector<2x256xf32>
    %c45 = arith.constant 45 : index
    %416 = memref.load %arg5[%c45] : memref<96xf32, #tpu.memory_space<smem>>
    %417 = vector.broadcast %416 : f32 to vector<2x256xf32>
    %418 = arith.mulf %382, %417 : vector<2x256xf32>
    %419 = arith.addf %368, %418 : vector<2x256xf32>
    %c61 = arith.constant 61 : index
    %420 = memref.load %arg5[%c61] : memref<96xf32, #tpu.memory_space<smem>>
    %421 = vector.broadcast %420 : f32 to vector<2x256xf32>
    %422 = arith.mulf %383, %421 : vector<2x256xf32>
    %423 = arith.addf %419, %422 : vector<2x256xf32>
    %c77 = arith.constant 77 : index
    %424 = memref.load %arg5[%c77] : memref<96xf32, #tpu.memory_space<smem>>
    %425 = vector.broadcast %424 : f32 to vector<2x256xf32>
    %426 = arith.mulf %382, %425 : vector<2x256xf32>
    %427 = arith.addf %376, %426 : vector<2x256xf32>
    %c93 = arith.constant 93 : index
    %428 = memref.load %arg5[%c93] : memref<96xf32, #tpu.memory_space<smem>>
    %429 = vector.broadcast %428 : f32 to vector<2x256xf32>
    %430 = arith.mulf %383, %429 : vector<2x256xf32>
    %431 = arith.addf %427, %430 : vector<2x256xf32>
    %c497_i32 = arith.constant 497 : i32
    %432 = tpu.dynamic_rotate %66 by %c497_i32 dim 1 : vector<2x512xf32>, i32 -> vector<2x512xf32>
    %433 = arith.andi %76, %78 : vector<1x512xi1>
    %cst_44 = arith.constant 0.000000e+00 : f32
    %434 = vector.shape_cast %433 : vector<1x512xi1> to vector<1x512xi1>
    %435 = vector.broadcast %434 : vector<1x512xi1> to vector<2x512xi1>
    %436 = vector.broadcast %cst_44 : f32 to vector<2x512xf32>
    %437 = arith.select %435, %432, %436 : vector<2x512xi1>, vector<2x512xf32>
    %438 = vector.extract_strided_slice %437 {offsets = [0, 0], sizes = [2, 256], strides = [1, 1]} : vector<2x512xf32> to vector<2x256xf32>
    %439 = vector.extract_strided_slice %437 {offsets = [0, 256], sizes = [2, 256], strides = [1, 1]} : vector<2x512xf32> to vector<2x256xf32>
    %c10 = arith.constant 10 : index
    %440 = memref.load %arg5[%c10] : memref<96xf32, #tpu.memory_space<smem>>
    %441 = vector.broadcast %440 : f32 to vector<2x256xf32>
    %442 = arith.mulf %438, %441 : vector<2x256xf32>
    %443 = arith.addf %336, %442 : vector<2x256xf32>
    %c26 = arith.constant 26 : index
    %444 = memref.load %arg5[%c26] : memref<96xf32, #tpu.memory_space<smem>>
    %445 = vector.broadcast %444 : f32 to vector<2x256xf32>
    %446 = arith.mulf %439, %445 : vector<2x256xf32>
    %447 = arith.addf %443, %446 : vector<2x256xf32>
    %c42 = arith.constant 42 : index
    %448 = memref.load %arg5[%c42] : memref<96xf32, #tpu.memory_space<smem>>
    %449 = vector.broadcast %448 : f32 to vector<2x256xf32>
    %450 = arith.mulf %438, %449 : vector<2x256xf32>
    %451 = arith.addf %344, %450 : vector<2x256xf32>
    %c58 = arith.constant 58 : index
    %452 = memref.load %arg5[%c58] : memref<96xf32, #tpu.memory_space<smem>>
    %453 = vector.broadcast %452 : f32 to vector<2x256xf32>
    %454 = arith.mulf %439, %453 : vector<2x256xf32>
    %455 = arith.addf %451, %454 : vector<2x256xf32>
    %c74 = arith.constant 74 : index
    %456 = memref.load %arg5[%c74] : memref<96xf32, #tpu.memory_space<smem>>
    %457 = vector.broadcast %456 : f32 to vector<2x256xf32>
    %458 = arith.mulf %438, %457 : vector<2x256xf32>
    %459 = arith.addf %352, %458 : vector<2x256xf32>
    %c90 = arith.constant 90 : index
    %460 = memref.load %arg5[%c90] : memref<96xf32, #tpu.memory_space<smem>>
    %461 = vector.broadcast %460 : f32 to vector<2x256xf32>
    %462 = arith.mulf %439, %461 : vector<2x256xf32>
    %463 = arith.addf %459, %462 : vector<2x256xf32>
    %c496_i32 = arith.constant 496 : i32
    %464 = tpu.dynamic_rotate %66 by %c496_i32 dim 1 : vector<2x512xf32>, i32 -> vector<2x512xf32>
    %cst_45 = arith.constant 0.000000e+00 : f32
    %465 = vector.shape_cast %76 : vector<1x512xi1> to vector<1x512xi1>
    %466 = vector.broadcast %465 : vector<1x512xi1> to vector<2x512xi1>
    %467 = vector.broadcast %cst_45 : f32 to vector<2x512xf32>
    %468 = arith.select %466, %464, %467 : vector<2x512xi1>, vector<2x512xf32>
    %469 = vector.extract_strided_slice %468 {offsets = [0, 0], sizes = [2, 256], strides = [1, 1]} : vector<2x512xf32> to vector<2x256xf32>
    %470 = vector.extract_strided_slice %468 {offsets = [0, 256], sizes = [2, 256], strides = [1, 1]} : vector<2x512xf32> to vector<2x256xf32>
    %c11 = arith.constant 11 : index
    %471 = memref.load %arg5[%c11] : memref<96xf32, #tpu.memory_space<smem>>
    %472 = vector.broadcast %471 : f32 to vector<2x256xf32>
    %473 = arith.mulf %469, %472 : vector<2x256xf32>
    %474 = arith.addf %447, %473 : vector<2x256xf32>
    %c27 = arith.constant 27 : index
    %475 = memref.load %arg5[%c27] : memref<96xf32, #tpu.memory_space<smem>>
    %476 = vector.broadcast %475 : f32 to vector<2x256xf32>
    %477 = arith.mulf %470, %476 : vector<2x256xf32>
    %478 = arith.addf %474, %477 : vector<2x256xf32>
    %c43 = arith.constant 43 : index
    %479 = memref.load %arg5[%c43] : memref<96xf32, #tpu.memory_space<smem>>
    %480 = vector.broadcast %479 : f32 to vector<2x256xf32>
    %481 = arith.mulf %469, %480 : vector<2x256xf32>
    %482 = arith.addf %455, %481 : vector<2x256xf32>
    %c59 = arith.constant 59 : index
    %483 = memref.load %arg5[%c59] : memref<96xf32, #tpu.memory_space<smem>>
    %484 = vector.broadcast %483 : f32 to vector<2x256xf32>
    %485 = arith.mulf %470, %484 : vector<2x256xf32>
    %486 = arith.addf %482, %485 : vector<2x256xf32>
    %c75 = arith.constant 75 : index
    %487 = memref.load %arg5[%c75] : memref<96xf32, #tpu.memory_space<smem>>
    %488 = vector.broadcast %487 : f32 to vector<2x256xf32>
    %489 = arith.mulf %469, %488 : vector<2x256xf32>
    %490 = arith.addf %463, %489 : vector<2x256xf32>
    %c91 = arith.constant 91 : index
    %491 = memref.load %arg5[%c91] : memref<96xf32, #tpu.memory_space<smem>>
    %492 = vector.broadcast %491 : f32 to vector<2x256xf32>
    %493 = arith.mulf %470, %492 : vector<2x256xf32>
    %494 = arith.addf %490, %493 : vector<2x256xf32>
    %c14 = arith.constant 14 : index
    %495 = memref.load %arg5[%c14] : memref<96xf32, #tpu.memory_space<smem>>
    %496 = vector.broadcast %495 : f32 to vector<2x256xf32>
    %497 = arith.mulf %469, %496 : vector<2x256xf32>
    %498 = arith.addf %415, %497 : vector<2x256xf32>
    %c30 = arith.constant 30 : index
    %499 = memref.load %arg5[%c30] : memref<96xf32, #tpu.memory_space<smem>>
    %500 = vector.broadcast %499 : f32 to vector<2x256xf32>
    %501 = arith.mulf %470, %500 : vector<2x256xf32>
    %502 = arith.addf %498, %501 : vector<2x256xf32>
    %c46 = arith.constant 46 : index
    %503 = memref.load %arg5[%c46] : memref<96xf32, #tpu.memory_space<smem>>
    %504 = vector.broadcast %503 : f32 to vector<2x256xf32>
    %505 = arith.mulf %469, %504 : vector<2x256xf32>
    %506 = arith.addf %423, %505 : vector<2x256xf32>
    %c62 = arith.constant 62 : index
    %507 = memref.load %arg5[%c62] : memref<96xf32, #tpu.memory_space<smem>>
    %508 = vector.broadcast %507 : f32 to vector<2x256xf32>
    %509 = arith.mulf %470, %508 : vector<2x256xf32>
    %510 = arith.addf %506, %509 : vector<2x256xf32>
    %c78 = arith.constant 78 : index
    %511 = memref.load %arg5[%c78] : memref<96xf32, #tpu.memory_space<smem>>
    %512 = vector.broadcast %511 : f32 to vector<2x256xf32>
    %513 = arith.mulf %469, %512 : vector<2x256xf32>
    %514 = arith.addf %431, %513 : vector<2x256xf32>
    %c94 = arith.constant 94 : index
    %515 = memref.load %arg5[%c94] : memref<96xf32, #tpu.memory_space<smem>>
    %516 = vector.broadcast %515 : f32 to vector<2x256xf32>
    %517 = arith.mulf %470, %516 : vector<2x256xf32>
    %518 = arith.addf %514, %517 : vector<2x256xf32>
    %c495_i32 = arith.constant 495 : i32
    %519 = tpu.dynamic_rotate %66 by %c495_i32 dim 1 : vector<2x512xf32>, i32 -> vector<2x512xf32>
    %520 = arith.andi %76, %80 : vector<1x512xi1>
    %cst_46 = arith.constant 0.000000e+00 : f32
    %521 = vector.shape_cast %520 : vector<1x512xi1> to vector<1x512xi1>
    %522 = vector.broadcast %521 : vector<1x512xi1> to vector<2x512xi1>
    %523 = vector.broadcast %cst_46 : f32 to vector<2x512xf32>
    %524 = arith.select %522, %519, %523 : vector<2x512xi1>, vector<2x512xf32>
    %525 = vector.extract_strided_slice %524 {offsets = [0, 0], sizes = [2, 256], strides = [1, 1]} : vector<2x512xf32> to vector<2x256xf32>
    %526 = vector.extract_strided_slice %524 {offsets = [0, 256], sizes = [2, 256], strides = [1, 1]} : vector<2x512xf32> to vector<2x256xf32>
    %c15 = arith.constant 15 : index
    %527 = memref.load %arg5[%c15] : memref<96xf32, #tpu.memory_space<smem>>
    %528 = vector.broadcast %527 : f32 to vector<2x256xf32>
    %529 = arith.mulf %525, %528 : vector<2x256xf32>
    %530 = arith.addf %502, %529 : vector<2x256xf32>
    %c31 = arith.constant 31 : index
    %531 = memref.load %arg5[%c31] : memref<96xf32, #tpu.memory_space<smem>>
    %532 = vector.broadcast %531 : f32 to vector<2x256xf32>
    %533 = arith.mulf %526, %532 : vector<2x256xf32>
    %534 = arith.addf %530, %533 : vector<2x256xf32>
    %c47 = arith.constant 47 : index
    %535 = memref.load %arg5[%c47] : memref<96xf32, #tpu.memory_space<smem>>
    %536 = vector.broadcast %535 : f32 to vector<2x256xf32>
    %537 = arith.mulf %525, %536 : vector<2x256xf32>
    %538 = arith.addf %510, %537 : vector<2x256xf32>
    %c63 = arith.constant 63 : index
    %539 = memref.load %arg5[%c63] : memref<96xf32, #tpu.memory_space<smem>>
    %540 = vector.broadcast %539 : f32 to vector<2x256xf32>
    %541 = arith.mulf %526, %540 : vector<2x256xf32>
    %542 = arith.addf %538, %541 : vector<2x256xf32>
    %c79 = arith.constant 79 : index
    %543 = memref.load %arg5[%c79] : memref<96xf32, #tpu.memory_space<smem>>
    %544 = vector.broadcast %543 : f32 to vector<2x256xf32>
    %545 = arith.mulf %525, %544 : vector<2x256xf32>
    %546 = arith.addf %518, %545 : vector<2x256xf32>
    %c95 = arith.constant 95 : index
    %547 = memref.load %arg5[%c95] : memref<96xf32, #tpu.memory_space<smem>>
    %548 = vector.broadcast %547 : f32 to vector<2x256xf32>
    %549 = arith.mulf %526, %548 : vector<2x256xf32>
    %550 = arith.addf %546, %549 : vector<2x256xf32>
    %cst_47 = arith.constant 5.000000e-01 : f32
    %551 = vector.broadcast %cst_47 : f32 to vector<2x256xf32>
    %552 = arith.mulf %551, %288 : vector<2x256xf32>
    %553 = math.tanh %552 : vector<2x256xf32>
    %cst_48 = arith.constant 5.000000e-01 : f32
    %554 = vector.broadcast %cst_48 : f32 to vector<2x256xf32>
    %555 = arith.mulf %554, %553 : vector<2x256xf32>
    %cst_49 = arith.constant 5.000000e-01 : f32
    %556 = vector.broadcast %cst_49 : f32 to vector<2x256xf32>
    %557 = arith.addf %555, %556 : vector<2x256xf32>
    %cst_50 = arith.constant 5.000000e-01 : f32
    %558 = vector.broadcast %cst_50 : f32 to vector<2x256xf32>
    %559 = arith.mulf %558, %391 : vector<2x256xf32>
    %560 = math.tanh %559 : vector<2x256xf32>
    %cst_51 = arith.constant 5.000000e-01 : f32
    %561 = vector.broadcast %cst_51 : f32 to vector<2x256xf32>
    %562 = arith.mulf %561, %560 : vector<2x256xf32>
    %cst_52 = arith.constant 5.000000e-01 : f32
    %563 = vector.broadcast %cst_52 : f32 to vector<2x256xf32>
    %564 = arith.addf %562, %563 : vector<2x256xf32>
    %cst_53 = arith.constant 5.000000e-01 : f32
    %565 = vector.broadcast %cst_53 : f32 to vector<2x256xf32>
    %566 = arith.mulf %565, %478 : vector<2x256xf32>
    %567 = math.tanh %566 : vector<2x256xf32>
    %cst_54 = arith.constant 5.000000e-01 : f32
    %568 = vector.broadcast %cst_54 : f32 to vector<2x256xf32>
    %569 = arith.mulf %568, %567 : vector<2x256xf32>
    %cst_55 = arith.constant 5.000000e-01 : f32
    %570 = vector.broadcast %cst_55 : f32 to vector<2x256xf32>
    %571 = arith.addf %569, %570 : vector<2x256xf32>
    %cst_56 = arith.constant 5.000000e-01 : f32
    %572 = vector.broadcast %cst_56 : f32 to vector<2x256xf32>
    %573 = arith.mulf %572, %534 : vector<2x256xf32>
    %574 = math.tanh %573 : vector<2x256xf32>
    %cst_57 = arith.constant 5.000000e-01 : f32
    %575 = vector.broadcast %cst_57 : f32 to vector<2x256xf32>
    %576 = arith.mulf %575, %574 : vector<2x256xf32>
    %cst_58 = arith.constant 5.000000e-01 : f32
    %577 = vector.broadcast %cst_58 : f32 to vector<2x256xf32>
    %578 = arith.addf %576, %577 : vector<2x256xf32>
    %579 = tpu.concatenate %557, %564, %571, %578 in 1 : vector<2x256xf32>, vector<2x256xf32>, vector<2x256xf32>, vector<2x256xf32> -> vector<2x1024xf32>
    %c0_59 = arith.constant 0 : index
    %c0_60 = arith.constant 0 : index
    %580 = vector.load %arg7[%c0_59, %c0_60] : memref<2x3072xf32, #tpu.memory_space<vmem>>, vector<2x1024xf32>
    tpu.vector_store %arg7[%c0_59, %c0_60], %579 {strides = array<i32>} : memref<2x3072xf32, #tpu.memory_space<vmem>>, vector<2x1024xf32>,
    %cst_61 = arith.constant 5.000000e-01 : f32
    %581 = vector.broadcast %cst_61 : f32 to vector<2x256xf32>
    %582 = arith.mulf %581, %296 : vector<2x256xf32>
    %583 = math.tanh %582 : vector<2x256xf32>
    %cst_62 = arith.constant 5.000000e-01 : f32
    %584 = vector.broadcast %cst_62 : f32 to vector<2x256xf32>
    %585 = arith.mulf %584, %583 : vector<2x256xf32>
    %cst_63 = arith.constant 5.000000e-01 : f32
    %586 = vector.broadcast %cst_63 : f32 to vector<2x256xf32>
    %587 = arith.addf %585, %586 : vector<2x256xf32>
    %cst_64 = arith.constant 5.000000e-01 : f32
    %588 = vector.broadcast %cst_64 : f32 to vector<2x256xf32>
    %589 = arith.mulf %588, %399 : vector<2x256xf32>
    %590 = math.tanh %589 : vector<2x256xf32>
    %cst_65 = arith.constant 5.000000e-01 : f32
    %591 = vector.broadcast %cst_65 : f32 to vector<2x256xf32>
    %592 = arith.mulf %591, %590 : vector<2x256xf32>
    %cst_66 = arith.constant 5.000000e-01 : f32
    %593 = vector.broadcast %cst_66 : f32 to vector<2x256xf32>
    %594 = arith.addf %592, %593 : vector<2x256xf32>
    %cst_67 = arith.constant 5.000000e-01 : f32
    %595 = vector.broadcast %cst_67 : f32 to vector<2x256xf32>
    %596 = arith.mulf %595, %486 : vector<2x256xf32>
    %597 = math.tanh %596 : vector<2x256xf32>
    %cst_68 = arith.constant 5.000000e-01 : f32
    %598 = vector.broadcast %cst_68 : f32 to vector<2x256xf32>
    %599 = arith.mulf %598, %597 : vector<2x256xf32>
    %cst_69 = arith.constant 5.000000e-01 : f32
    %600 = vector.broadcast %cst_69 : f32 to vector<2x256xf32>
    %601 = arith.addf %599, %600 : vector<2x256xf32>
    %cst_70 = arith.constant 5.000000e-01 : f32
    %602 = vector.broadcast %cst_70 : f32 to vector<2x256xf32>
    %603 = arith.mulf %602, %542 : vector<2x256xf32>
    %604 = math.tanh %603 : vector<2x256xf32>
    %cst_71 = arith.constant 5.000000e-01 : f32
    %605 = vector.broadcast %cst_71 : f32 to vector<2x256xf32>
    %606 = arith.mulf %605, %604 : vector<2x256xf32>
    %cst_72 = arith.constant 5.000000e-01 : f32
    %607 = vector.broadcast %cst_72 : f32 to vector<2x256xf32>
    %608 = arith.addf %606, %607 : vector<2x256xf32>
    %609 = tpu.concatenate %587, %594, %601, %608 in 1 : vector<2x256xf32>, vector<2x256xf32>, vector<2x256xf32>, vector<2x256xf32> -> vector<2x1024xf32>
    %c0_73 = arith.constant 0 : index
    %c1024 = arith.constant 1024 : index
    %610 = vector.load %arg7[%c0_73, %c1024] : memref<2x3072xf32, #tpu.memory_space<vmem>>, vector<2x1024xf32>
    tpu.vector_store %arg7[%c0_73, %c1024], %609 {strides = array<i32>} : memref<2x3072xf32, #tpu.memory_space<vmem>>, vector<2x1024xf32>,
    %cst_74 = arith.constant 5.000000e-01 : f32
    %611 = vector.broadcast %cst_74 : f32 to vector<2x256xf32>
    %612 = arith.mulf %611, %304 : vector<2x256xf32>
    %613 = math.tanh %612 : vector<2x256xf32>
    %cst_75 = arith.constant 5.000000e-01 : f32
    %614 = vector.broadcast %cst_75 : f32 to vector<2x256xf32>
    %615 = arith.mulf %614, %613 : vector<2x256xf32>
    %cst_76 = arith.constant 5.000000e-01 : f32
    %616 = vector.broadcast %cst_76 : f32 to vector<2x256xf32>
    %617 = arith.addf %615, %616 : vector<2x256xf32>
    %cst_77 = arith.constant 5.000000e-01 : f32
    %618 = vector.broadcast %cst_77 : f32 to vector<2x256xf32>
    %619 = arith.mulf %618, %407 : vector<2x256xf32>
    %620 = math.tanh %619 : vector<2x256xf32>
    %cst_78 = arith.constant 5.000000e-01 : f32
    %621 = vector.broadcast %cst_78 : f32 to vector<2x256xf32>
    %622 = arith.mulf %621, %620 : vector<2x256xf32>
    %cst_79 = arith.constant 5.000000e-01 : f32
    %623 = vector.broadcast %cst_79 : f32 to vector<2x256xf32>
    %624 = arith.addf %622, %623 : vector<2x256xf32>
    %cst_80 = arith.constant 5.000000e-01 : f32
    %625 = vector.broadcast %cst_80 : f32 to vector<2x256xf32>
    %626 = arith.mulf %625, %494 : vector<2x256xf32>
    %627 = math.tanh %626 : vector<2x256xf32>
    %cst_81 = arith.constant 5.000000e-01 : f32
    %628 = vector.broadcast %cst_81 : f32 to vector<2x256xf32>
    %629 = arith.mulf %628, %627 : vector<2x256xf32>
    %cst_82 = arith.constant 5.000000e-01 : f32
    %630 = vector.broadcast %cst_82 : f32 to vector<2x256xf32>
    %631 = arith.addf %629, %630 : vector<2x256xf32>
    %cst_83 = arith.constant 5.000000e-01 : f32
    %632 = vector.broadcast %cst_83 : f32 to vector<2x256xf32>
    %633 = arith.mulf %632, %550 : vector<2x256xf32>
    %634 = math.tanh %633 : vector<2x256xf32>
    %cst_84 = arith.constant 5.000000e-01 : f32
    %635 = vector.broadcast %cst_84 : f32 to vector<2x256xf32>
    %636 = arith.mulf %635, %634 : vector<2x256xf32>
    %cst_85 = arith.constant 5.000000e-01 : f32
    %637 = vector.broadcast %cst_85 : f32 to vector<2x256xf32>
    %638 = arith.addf %636, %637 : vector<2x256xf32>
    %639 = tpu.concatenate %617, %624, %631, %638 in 1 : vector<2x256xf32>, vector<2x256xf32>, vector<2x256xf32>, vector<2x256xf32> -> vector<2x1024xf32>
    %c0_86 = arith.constant 0 : index
    %c2048 = arith.constant 2048 : index
    %640 = vector.load %arg7[%c0_86, %c2048] : memref<2x3072xf32, #tpu.memory_space<vmem>>, vector<2x1024xf32>
    tpu.vector_store %arg7[%c0_86, %c2048], %639 {strides = array<i32>} : memref<2x3072xf32, #tpu.memory_space<vmem>>, vector<2x1024xf32>,
    return
  }
}

</mosaic_0001>

<bundles_post_ra>
// kernel: my_decoder_forward.1
= control target key start
LH: loop header
LB: loop body
LE: loop exit
PB: predicated region body
PF: predicated region fallthrough
CT: control target
= control target key end

     0   :  { %s3517_s0 = inlined_call_operand.hbm [shape: f32[2,16], index: 0, kind: input, shape index: {}]   ;;  %s3518_s1 = inlined_call_operand.hbm [shape: f32[16,512], index: 1, kind: input, shape index: {}]   ;;  %s3519_s2 = inlined_call_operand.hbm [shape: f32[1,512], index: 2, kind: input, shape index: {}]   ;;  %s3520_s3 = inlined_call_operand.hbm [shape: f32[2], index: 3, kind: input, shape index: {}]   ;;  %s3521_s4 = inlined_call_operand.hbm [shape: f32[2], index: 4, kind: input, shape index: {}]   ;;  %s3522_s5 = inlined_call_operand.hbm [shape: f32[96], index: 5, kind: input, shape index: {}]   ;;  %s3523_s6 = inlined_call_operand.hbm [shape: f32[3], index: 6, kind: input, shape index: {}]   ;;  %s3524_s7 = inlined_call_operand.vmem [shape: f32[2,3072], index: 7, kind: output, shape index: {}]  }
   0x1   :  { %3682 = sst [smem:[#allocation159_spill]] %s3524_s7 }
   0x2   :  { %12 = vsyncpa [#allocation3], 0 }
   0x3   :  { %13 = vsyncpa [#allocation6], 0 }
   0x4   :  { %14 = vsyncpa [#allocation4], 0 }
   0x5   :  { %15 = vsyncpa [#allocation10], 0 }
   0x6   :  { %16 = vsyncpa [#allocation13], 0  ;;  %s1777_s24 = smov [#allocation5]   ;;  %s1661_s28 = scalar_lea.hbm %s3518_s1, 1024 }
   0x7   :  { %s32_s25 = sshll.u32 %s1777_s24, 4  ;;  %p1662_p0 = scmp.ne.s32.totalorder %s3518_s1, %s1661_s28  ;;  %s33_s25 = int_to_ptr.vmem [resolvable:$true] %s32_s25 }
   0x8   :  { %p1665_p1 = scmp.lt.u32.totalorder %s1661_s28, %s3518_s1 }
   0xa   :  { %p1667_p2 = pnand %p1665_p1, %p1662_p0 }
   0xc   :  { %1670 = shalt.err (!%p1667_p2)
}
   0xd   :  { %s1671_s10 = scalar_lea.vmem %s33_s25, 1024  ;;  %p1676_p4 = scmp.lt.s32.totalorder %s33_s25, %s33_s25 }
   0xe   :  { %p1672_p3 = scmp.ne.s32.totalorder %s33_s25, %s1671_s10  ;;  %p1677_p5 = scmp.lt.s32.totalorder %s1671_s10, %s1671_s10 }
  0x10   :  { %p1678_p6 = por %p1677_p5, %p1676_p4 }
  0x12   :  { %p1679_p7 = pnand %p1678_p6, %p1672_p3 }
  0x14   :  { %1682 = shalt.err (!%p1679_p7)
}
  0x15   :  { %s1778_s11 = smov 512   ;;  %s1779_s12 = smov 32  }
  0x16   :  { %38 = dma.hbm_to_vmem [thread:$0]  %s3518_s1, 1024, %s33_s25, [#allocation6], %s1778_s11, %s1778_s11, %s1779_s12  }
  0x17   :  { %s1683_s17 = scalar_lea.hbm %s3521_s4, 16 }
  0x18   :  { %p1684_p8 = scmp.ne.s32.totalorder %s3521_s4, %s1683_s17  ;;  %p1687_p9 = scmp.lt.u32.totalorder %s1683_s17, %s3521_s4 }
  0x1a   :  { %p1689_p10 = pnand %p1687_p9, %p1684_p8 }
  0x1c   :  { %1692 = shalt.err (!%p1689_p10)
}
  0x1d   :  { %s1780_s22 = smov [#allocation9]   ;;  %s1781_s1 = smov [#allocation2]  }
  0x1e   :  { %64 = dma.hbm_to_smem %s3521_s4, 16, %s1780_s22, [#allocation10]  }
  0x1f   :  { %s23_s25 = sshll.u32 %s1781_s1, 4  ;;  %s1782_s26 = smov [#allocation7]   ;;  %s24_s25 = int_to_ptr.vmem [resolvable:$true] %s23_s25 }
  0x20   :  { %s45_s27 = sshll.u32 %s1782_s26, 4  ;;  %s1693_s30 = scalar_lea.hbm %s3517_s0, 32  ;;  %s46_s27 = int_to_ptr.vmem [resolvable:$true] %s45_s27 }
  0x21   :  { %p1694_p11 = scmp.ne.s32.totalorder %s3517_s0, %s1693_s30  ;;  %p1697_p12 = scmp.lt.u32.totalorder %s1693_s30, %s3517_s0 }
  0x23   :  { %p1699_p13 = pnand %p1697_p12, %p1694_p11 }
  0x25   :  { %1702 = shalt.err (!%p1699_p13)
}
  0x26   :  { %s1703_s4 = scalar_lea.vmem %s24_s25, 32  ;;  %p1708_p1 = scmp.lt.s32.totalorder %s24_s25, %s24_s25 }
  0x27   :  { %p1704_p0 = scmp.ne.s32.totalorder %s24_s25, %s1703_s4  ;;  %p1709_p2 = scmp.lt.s32.totalorder %s1703_s4, %s1703_s4 }
  0x29   :  { %p1710_p3 = por %p1709_p2, %p1708_p1 }
  0x2b   :  { %p1711_p4 = pnand %p1710_p3, %p1704_p0 }
  0x2d   :  { %1714 = shalt.err (!%p1711_p4)
}
  0x2e   :  { %26 = dma.hbm_to_vmem [thread:$0]  %s3517_s0, 32, %s24_s25, [#allocation3]  }
  0x2f   :  { %s1715_s16 = scalar_lea.hbm %s3519_s2, 64 }
  0x30   :  { %p1716_p5 = scmp.ne.s32.totalorder %s3519_s2, %s1715_s16  ;;  %p1719_p6 = scmp.lt.u32.totalorder %s1715_s16, %s3519_s2 }
  0x32   :  { %p1721_p7 = pnand %p1719_p6, %p1716_p5 }
  0x34   :  { %1724 = shalt.err (!%p1721_p7)
}
  0x35   :  { %s1725_s21 = scalar_lea.vmem %s46_s27, 64  ;;  %p1730_p9 = scmp.lt.s32.totalorder %s46_s27, %s46_s27 }
  0x36   :  { %p1726_p8 = scmp.ne.s32.totalorder %s46_s27, %s1725_s21  ;;  %p1731_p10 = scmp.lt.s32.totalorder %s1725_s21, %s1725_s21 }
  0x38   :  { %p1732_p11 = por %p1731_p10, %p1730_p9 }
  0x3a   :  { %p1733_p12 = pnand %p1732_p11, %p1726_p8 }
  0x3c   :  { %1736 = shalt.err (!%p1733_p12)
}
  0x3d   :  { %48 = dma.hbm_to_vmem [thread:$0]  %s3519_s2, 64, %s46_s27, [#allocation6]  }
  0x3e   :  { %s1737_s1 = scalar_lea.hbm %s3520_s3, 16 }
  0x3f   :  { %p1738_p13 = scmp.ne.s32.totalorder %s3520_s3, %s1737_s1  ;;  %p1741_p0 = scmp.lt.u32.totalorder %s1737_s1, %s3520_s3 }
  0x41   :  { %p1743_p1 = pnand %p1741_p0, %p1738_p13 }
  0x43   :  { %1746 = shalt.err (!%p1743_p1)
}
  0x44   :  { %s1783_s30 = smov [#allocation8]   ;;  %s1747_s10 = scalar_lea.hbm %s3522_s5, 16 }
  0x45   :  { %56 = dma.hbm_to_smem %s3520_s3, 16, %s1783_s30, [#allocation4]  }
  0x46   :  { %p1748_p2 = scmp.ne.s32.totalorder %s3522_s5, %s1747_s10  ;;  %p1751_p3 = scmp.lt.u32.totalorder %s1747_s10, %s3522_s5 }
  0x48   :  { %p1753_p4 = pnand %p1751_p3, %p1748_p2 }
  0x4a   :  { %1756 = shalt.err (!%p1753_p4)
}
  0x4b   :  { %s1784_s14 = smov [#allocation11]   ;;  %s1757_s18 = scalar_lea.hbm %s3523_s6, 16 }
  0x4c   :  { %72 = dma.hbm_to_smem %s3522_s5, 16, %s1784_s14, [#allocation10]  }
  0x4d   :  { %p1758_p5 = scmp.ne.s32.totalorder %s3523_s6, %s1757_s18  ;;  %p1761_p6 = scmp.lt.u32.totalorder %s1757_s18, %s3523_s6 }
  0x4f   :  { %p1763_p7 = pnand %p1761_p6, %p1758_p5 }
  0x51   :  { %1766 = shalt.err (!%p1763_p7)
}
  0x52   :  { %s1785_s22 = smov [#allocation12]  }
  0x53   :  { %80 = dma.hbm_to_smem %s3523_s6, 16, %s1785_s22, [#allocation13]  }
  0x54   :  { %1767 = dma.done.wait [#allocation3], 32  }
  0x55   :  { %1768 = vsyncadd [#allocation3], 4294967264 }
  0x56   :  { %1769 = dma.done.wait [#allocation6], 1088  }
  0x57   :  { %1770 = vsyncadd [#allocation6], 4294966208 }
  0x58   :  { %1771 = dma.done.wait [#allocation4], 16  }
  0x59   :  { %1772 = vsyncadd [#allocation4], 4294967280 }
  0x5a   :  { %1773 = dma.done.wait [#allocation10], 32  }
  0x5b   :  { %1774 = vsyncadd [#allocation10], 4294967264 }
  0x5c   :  { %1775 = dma.done.wait [#allocation13], 16  }
  0x5d   :  { %1776 = vsyncadd [#allocation13], 4294967280 }
  0x5e   :  { %102 = sfence }
  0x5f   :  { %v105_v0 = vld [vmem:[#allocation5 + $0x8] sm:$0xff]  ;;  %v104_v2 = vld [vmem:[#allocation5] sm:$0xff]  ;;  %v1786_v5 = vmov 0.0   ;;  %v107_v6 = vld [vmem:[#allocation5 + $0x18] sm:$0xff]  ;;  %vm134_vm0 = vcmask 130048   ;;  %v114_v14 = vlaneseq  ;;  %vm289_vm1 = vcmask 1041408  }
  0x60   :  { %v109_v1 = vld [vmem:[#allocation5 + $0x28] sm:$0xff]  ;;  %v108_v4 = vld [vmem:[#allocation5 + $0x20] sm:$0xff]  ;;  %202 = vmatprep.mubr.f32.mxu0 %v1786_v5  ;;  %273 = vmatprep.mubr.f32.mxu1 %v1786_v5  ;;  %v111_v8 = vld [vmem:[#allocation5 + $0x38] sm:$0xff]  ;;  %s322_s30 = sld [smem:[#allocation8]]  ;;  %s1787_s3 = smov 17  }
  0x61   :  { %v1570_v3 = vpack.c.bf16 %v109_v1, %v105_v0  ;;  %v1572_v7 = vpack.c.bf16 %v108_v4, %v104_v2  ;;  %v106_v9 = vld [vmem:[#allocation5 + $0x10] sm:$0xff]  ;;  %v1574_v11 = vpack.c.bf16 %v111_v8, %v107_v6  ;;  %v103_v13 = vld [vmem:[#allocation2] sm:$0x3]  ;;  %v1921_v15 = vshrl.u32 %v114_v14, 7  ;;  %v112_v17 = vld [vmem:[#allocation7] sm:$0xf] }
  0x62   :  { %v110_v10 = vld [vmem:[#allocation5 + $0x30] sm:$0xff]  ;;  %s324_s8 = sld [smem:[#allocation9]]  ;;  %s1788_s17 = smov 16  }
  0x63   :  { %1571 = vmatprep.subr.bf16.mxu0 %v1570_v3  ;;  %v1576_v12 = vpack.c.bf16 %v110_v10, %v106_v9  ;;  %1575 = vmatprep.subr.bf16.mxu1 %v1574_v11  ;;  %v116_v16 = vsub.s32 0, %v1921_v15  ;;  %v120_v18 = vsub.s32 1, %v1921_v15  ;;  %v124_v19 = vsub.s32 2, %v1921_v15  ;;  %s1789_s18 = smov 1   ;;  %s1790_s19 = smov 15  }
  0x64   :  { %1573 = vmatpush1.bf16.msra.mxu0 %v1572_v7  ;;  %v128_v20 = vsub.s32 3, %v1921_v15  ;;  %s1791_s20 = smov 127   ;;  %s1792_s21 = smov 113  }
  0x65   :  { %1577 = vmatpush1.bf16.msra.mxu1 %v1576_v12  ;;  %v117_v21 = vrot.slane %v112_v17, %v116_v16  ;;  %v121_v22 = vrot.slane %v112_v17, %v120_v18  ;;  %v125_v23 = vrot.slane %v112_v17, %v124_v19  ;;  %s1793_s0 = smov 112   ;;  %s1794_s22 = smov 111  }
  0x66   :  { %v129_v25 = vrot.slane %v112_v17, %v128_v20  ;;  %s1471_s23 = sld [smem:[#allocation8 + $0x1]]  ;;  %s2002_s24 = sld [smem:[#allocation11 + $0xc]] }
  0x67   :  { %1469 = vmatmul.mubr.msk.f32.vlgmr.msra.gmra.mrb[0].mxu0 %vm134_vm0, %v103_v13  ;;  %s2168_s7 = sld [smem:[#allocation11 + $0x5]] }
  0x68   :  { %1470 = vmatmul.mubr.msk.f32.vlgmr.msra.gmra.mrb[0].mxu1 %vm134_vm0, %v103_v13 }
  0x6d   :  { %3710 = sst [smem:[#allocation46_spill]] %s2168_s7  ;;  %s2181_s7 = sld [smem:[#allocation11 + $0x21]] }
  0x73   :  { %3714 = sst [smem:[#allocation50_spill]] %s2181_s7 }
 0x13a   :  { %v204_v24 = vpop.f32.mrb[0].mxu0 }
 0x13b   :  { %v1927_v26 = vadd.f32 %v204_v24, %v117_v21  ;;  %v206_v27 = vpop.f32.mrb[1].mxu0  ;;  %v275_v29 = vpop.f32.mrb[0].mxu1 }
 0x13c   :  { %v1929_v28 = vadd.f32 %v206_v27, %v121_v22  ;;  %v1935_v32 = vadd.f32 %v275_v29, %v125_v23  ;;  %v277_v33 = vpop.f32.mrb[1].mxu1 }
 0x13d   :  { %v290_v30 = vsel %vm289_vm1, %v1927_v26, 0.0  ;;  %v285_v31 = vmul.f32 %v1927_v26, %v1927_v26  ;;  %v1941_v36 = vadd.f32 %v277_v33, %v129_v25 }
 0x13e   :  { %v291_v34 = vsel %vm289_vm1, %v1929_v28, 0.0  ;;  %v286_v35 = vmul.f32 %v1929_v28, %v1929_v28  ;;  %v327_v38 = vsel %vm289_vm1, %v1935_v32, 0.0  ;;  %v287_v39 = vmul.f32 %v1935_v32, %v1935_v32 }
 0x13f   :  { %v292_v37 = vadd.f32 %v291_v34, %v290_v30  ;;  %v303_v40 = vsel %vm289_vm1, %v285_v31, 0.0  ;;  %v328_v42 = vsel %vm289_vm1, %v1941_v36, 0.0  ;;  %v288_v43 = vmul.f32 %v1941_v36, %v1941_v36 }
 0x140   :  { %v304_v41 = vsel %vm289_vm1, %v286_v35, 0.0  ;;  %v329_v44 = vadd.f32 %v328_v42, %v327_v38  ;;  %v340_v45 = vsel %vm289_vm1, %v287_v39, 0.0  ;;  %v867_v30 = vstv %s2002_s24  ;;  %s2127_s24 = sld [smem:[#allocation11 + $0x39]] }
 0x141   :  { %293 = vadd.xlane.f32.xlu0 %v292_v37  ;;  %v341_v46 = vsel %vm289_vm1, %v288_v43, 0.0  ;;  %v305_v47 = vadd.f32 %v304_v41, %v303_v40 }
 0x142   :  { %330 = vadd.xlane.f32.xlu1 %v329_v44  ;;  %v342_v48 = vadd.f32 %v341_v46, %v340_v45 }
 0x145   :  { %306 = vadd.xlane.f32.xlu0 %v305_v47 }
 0x146   :  { %343 = vadd.xlane.f32.xlu1 %v342_v48  ;;  %3696 = sst [smem:[#allocation32_spill]] %s2127_s24  ;;  %s2283_s24 = sld [smem:[#allocation11 + $0xb]] }
 0x1ce   :  { %v294_v49 = vpop.xlane.xlu0 %293 }
 0x1cf   :  { %v295_v50 = vrot.slane %v294_v49, 4  ;;  %v331_v63 = vpop.xlane.xlu1 %330 }
 0x1d0   :  { %v332_v1 = vrot.slane %v331_v63, 4 }
 0x1d1   :  { %v296_v51 = vadd.f32 %v295_v50, %v294_v49 }
 0x1d2   :  { %v307_v52 = vpop.xlane.xlu0 %306  ;;  %v333_v3 = vadd.f32 %v332_v1, %v331_v63 }
 0x1d3   :  { %v297_v53 = vrot.slane %v296_v51, 2  ;;  %v308_v54 = vrot.slane %v307_v52, 4  ;;  %v344_v0 = vpop.xlane.xlu1 %343 }
 0x1d4   :  { %v345_v2 = vrot.slane %v344_v0, 4  ;;  %v334_v5 = vrot.slane %v333_v3, 2 }
 0x1d5   :  { %v309_v55 = vadd.f32 %v308_v54, %v307_v52  ;;  %v298_v56 = vadd.f32 %v297_v53, %v296_v51 }
 0x1d6   :  { %v346_v4 = vadd.f32 %v345_v2, %v344_v0  ;;  %v335_v8 = vadd.f32 %v334_v5, %v333_v3 }
 0x1d7   :  { %v310_v57 = vrot.slane %v309_v55, 2  ;;  %v299_v58 = vrot.slane %v298_v56, 1 }
 0x1d8   :  { %v347_v6 = vrot.slane %v346_v4, 2  ;;  %v336_v10 = vrot.slane %v335_v8, 1 }
 0x1d9   :  { %v300_v59 = vadd.f32 %v299_v58, %v298_v56  ;;  %v311_v60 = vadd.f32 %v310_v57, %v309_v55 }
 0x1da   :  { %v348_v9 = vadd.f32 %v347_v6, %v346_v4  ;;  %v337_v13 = vadd.f32 %v336_v10, %v335_v8  ;;  %v1795_v8 = vmov 1983009808   ;;  %v2130_v10 = vand.u32 127, %v114_v14 }
 0x1db   :  { %1578 = vpush %v300_v59  ;;  %v312_v61 = vrot.slane %v311_v60, 1 }
 0x1dc   :  { %v349_v11 = vrot.slane %v348_v9, 1  ;;  %v2149_v14 = vadd.s32 128, %v2130_v10  ;;  %vm442_vm8 = vcmp.lt.s32.totalorder %v2130_v10, 17  ;;  %vm507_vm9 = vcmp.lt.s32.totalorder %v2130_v10, 16 }
 0x1dd   :  { %v313_v62 = vadd.f32 %v312_v61, %v311_v60  ;;  %vm669_vm10 = vcmp.lt.s32.totalorder %v2130_v10, 1  ;;  %vm910_vm12 = vcmp.lt.s32.totalorder %v2130_v10, 127  ;;  %vm604_vm14 = vcmp.lt.s32.totalorder %v2130_v10, 15 }
 0x1de   :  { %v350_v16 = vadd.f32 %v349_v11, %v348_v9  ;;  %v1269_v9 = vunpack.c.l.s4 %v1795_v8 }
 0x1df   :  { %1580 = vpush %v313_v62 }
 0x1e0   :  { %v1270_v11 = vunpack.c.0.s8 %v1269_v9 }
 0x20c   :  { %s1579_s5 = spop %1578 }
 0x20d   :  { %s1955_s6 = smul.f32 0.001953125, %s1579_s5  ;;  %s2004_s5 = sld [smem:[#allocation11 + $0x2c]] }
 0x20f   :  { %s316_s1 = smul.f32 %s1955_s6, %s1955_s6 }
 0x210   :  { %s1581_s25 = spop %1580 }
 0x211   :  { %s315_s26 = smul.f32 0.001953125, %s1581_s25  ;;  %s428_s25 = sld [smem:[#allocation12]] }
 0x213   :  { %s317_s28 = ssub.f32 %s315_s26, %s316_s1  ;;  %s2006_s1 = sld [smem:[#allocation11 + $0x4c]]  ;;  %v879_v31 = vstv %s2004_s5 }
 0x214   :  { %s1473_s26 = sld [smem:[#allocation12 + $0x1]]  ;;  %s2132_s5 = sld [smem:[#allocation11]] }
 0x215   :  { %s318_s29 = sadd.f32 1e-05, %s317_s28  ;;  %s1474_s28 = sld [smem:[#allocation12 + $0x2]] }
 0x217   :  { %v319_v7 = vstv %s318_s29  ;;  %s2008_s29 = sld [smem:[#allocation11 + $0x1c]]  ;;  %v2020_v38 = vstv %s428_s25  ;;  %s2138_s25 = sld [smem:[#allocation11 + $0x40]] }
 0x218   :  { %1609 = vrsqrt.f32 %v319_v7 }
 0x219   :  { %v891_v33 = vstv %s2006_s1  ;;  %s2136_s1 = sld [smem:[#allocation11 + $0x20]] }
 0x21a   :  { %v2022_v39 = vstv %s1473_s26  ;;  %s2140_s26 = sld [smem:[#allocation11 + $0x4]] }
 0x21b   :  { %v2027_v45 = vstv %s1474_s28  ;;  %s2142_s28 = sld [smem:[#allocation11 + $0x24]] }
 0x21d   :  { %v873_v46 = vstv %s2008_s29  ;;  %3699 = sst [smem:[#allocation35_spill]] %s2138_s25  ;;  %s2144_s29 = sld [smem:[#allocation11 + $0x44]] }
 0x21e   :  { %s2235_s25 = sld [smem:[#allocation11 + $0xe]] }
 0x21f   :  { %3698 = sst [smem:[#allocation34_spill]] %s2136_s1  ;;  %s2237_s1 = sld [smem:[#allocation11 + $0x2e]] }
 0x220   :  { %3700 = sst [smem:[#allocation36_spill]] %s2140_s26  ;;  %s2338_s26 = sld [smem:[#allocation11 + $0x54]] }
 0x221   :  { %3701 = sst [smem:[#allocation37_spill]] %s2142_s28 }
 0x222   :  { %v1610_v12 = vpop.eup %1609 }
 0x223   :  { %1582 = vpush %v1610_v12  ;;  %3702 = sst [smem:[#allocation38_spill]] %s2144_s29  ;;  %s2243_s29 = sld [smem:[#allocation11 + $0xf]] }
 0x224   :  { %1584 = vpush %v337_v13 }
 0x225   :  { %1586 = vpush %v350_v16  ;;  %v2164_v16 = vsub.s32 %v1270_v11, %v1921_v15  ;;  %v405_v15 = vshra.s32 %v2149_v14, 4  ;;  %3730 = sst [smem:[#allocation60_spill]] %s2237_s1 }
 0x226   :  { %3754 = sst [smem:[#allocation79_spill]] %s2338_s26 }
 0x227   :  { %3708 = vst [vmem:[#allocation44_spill] sm:$0xff] %v2164_v16 }
 0x229   :  { %3732 = sst [smem:[#allocation61_spill]] %s2243_s29  ;;  %s3802_s29 = sld [smem:[#allocation32_spill]] }
 0x254   :  { %s1583_s9 = spop %1582 }
 0x255   :  { %s323_s2 = smul.f32 %s1583_s9, %s322_s30  ;;  %s1585_s27 = spop %1584 }
 0x256   :  { %s1959_s10 = smul.f32 0.001953125, %s1585_s27  ;;  %s1587_s11 = spop %1586 }
 0x257   :  { %s325_s4 = smul.f32 %s323_s2, %s1955_s6  ;;  %v368_v17 = vstv %s323_s2  ;;  %s1472_s6 = sld [smem:[#allocation9 + $0x1]] }
 0x258   :  { %s353_s12 = smul.f32 %s1959_s10, %s1959_s10  ;;  %v380_v18 = vmul.f32 %v368_v17, %v1927_v26  ;;  %v381_v19 = vmul.f32 %v368_v17, %v1929_v28  ;;  %s2012_s2 = sld [smem:[#allocation11 + $0x5c]] }
 0x259   :  { %s326_s13 = ssub.f32 %s324_s8, %s325_s4  ;;  %s352_s14 = smul.f32 0.001953125, %s1587_s11 }
 0x25a   :  { %s2010_s8 = sld [smem:[#allocation11 + $0x3c]]  ;;  %s2097_s4 = sld [smem:[#allocation11 + $0x23]] }
 0x25b   :  { %v374_v20 = vstv %s326_s13  ;;  %s354_s15 = ssub.f32 %s352_s14, %s353_s12  ;;  %s2099_s12 = sld [smem:[#allocation11 + $0x43]] }
 0x25c   :  { %v384_v21 = vadd.f32 %v380_v18, %v374_v20  ;;  %v385_v22 = vadd.f32 %v381_v19, %v374_v20  ;;  %s2101_s13 = sld [smem:[#allocation11 + $0x6]] }
 0x25d   :  { %s355_s16 = sadd.f32 1e-05, %s354_s15  ;;  %s2103_s14 = sld [smem:[#allocation11 + $0x26]] }
 0x25e   :  { %vm388_vm2 = vcmp.gt.f32.partialorder %v384_v21, 0.0  ;;  %vm389_vm3 = vcmp.gt.f32.partialorder %v385_v22, 0.0  ;;  %v392_v23 = vmul.f32 0.1, %v384_v21  ;;  %v393_v24 = vmul.f32 0.1, %v385_v22 }
 0x25f   :  { %v356_v25 = vstv %s355_s16  ;;  %s2105_s15 = sld [smem:[#allocation11 + $0x46]]  ;;  %s2107_s16 = sld [smem:[#allocation11 + $0x9]] }
 0x260   :  { %v1966_v27 = vsel %vm388_vm2, %v384_v21, %v392_v23  ;;  %v1968_v29 = vsel %vm389_vm3, %v385_v22, %v393_v24  ;;  %1611 = vrsqrt.f32 %v356_v25  ;;  %v885_v47 = vstv %s2010_s8  ;;  %s2151_s8 = sld [smem:[#allocation11 + $0x22]] }
 0x261   :  { %436 = vrot.lane.b32.xlu1 %v1968_v29, %s1787_s3  ;;  %434 = vrot.lane.b32.xlu0 %v1966_v27, %s1787_s3  ;;  %v868_v40 = vmul.f32 %v867_v30, %v1966_v27  ;;  %v880_v43 = vmul.f32 %v879_v31, %v1966_v27  ;;  %v892_v44 = vmul.f32 %v891_v33, %v1966_v27  ;;  %v771_v18 = vstv %s2097_s4  ;;  %s2319_s4 = sld [smem:[#allocation11 + $0x31]] }
 0x262   :  { %v869_v57 = vmul.f32 %v867_v30, %v1968_v29  ;;  %v881_v58 = vmul.f32 %v879_v31, %v1968_v29  ;;  %v893_v62 = vmul.f32 %v891_v33, %v1968_v29  ;;  %3686 = sst [smem:[#allocation22_spill]] %s2101_s13  ;;  %v783_v19 = vstv %s2099_s12  ;;  %s2321_s12 = sld [smem:[#allocation11 + $0x51]] }
 0x263   :  { %v870_v49 = vadd.f32 %v868_v40, %v2020_v38  ;;  %v882_v52 = vadd.f32 %v880_v43, %v2022_v39  ;;  %v894_v53 = vadd.f32 %v892_v44, %v2027_v45  ;;  %v795_v20 = vstv %s2101_s13  ;;  %s2194_s13 = sld [smem:[#allocation11 + $0x27]] }
 0x264   :  { %v871_v63 = vadd.f32 %v869_v57, %v2020_v38  ;;  %v883_v1 = vadd.f32 %v881_v58, %v2022_v39  ;;  %v895_v3 = vadd.f32 %v893_v62, %v2027_v45  ;;  %v807_v21 = vstv %s2103_s14  ;;  %s2412_s14 = sld [smem:[#allocation11 + $0x12]] }
 0x265   :  { %499 = vrot.lane.b32.xlu1 %v1966_v27, %s1788_s17  ;;  %501 = vrot.lane.b32.xlu0 %v1968_v29, %s1788_s17  ;;  %v819_v22 = vstv %s2105_s15  ;;  %v831_v23 = vstv %s2107_s16  ;;  %v2214_v44 = vand.u32 15, %v405_v15  ;;  %v2317_v58 = vadd.s32 384, %v2130_v10  ;;  %s2420_s15 = sld [smem:[#allocation11 + $0x32]] }
 0x266   :  { %3704 = sst [smem:[#allocation40_spill]] %s2151_s8  ;;  %s2172_s8 = sld [smem:[#allocation11 + $0x45]]  ;;  %v2350_v57 = vmul.f32 %v795_v20, %v1966_v27  ;;  %v2394_v11 = vmul.f32 %v831_v23, %v1966_v27  ;;  %vm1007_vm2 = vcmp.lt.s32.totalorder %v2130_v10, 113  ;;  %vm3671_vm3 = vcmp.lt.s32.totalorder %v2130_v10, 112 }
 0x267   :  { %3723 = vst [vmem:[#allocation57_spill] sm:$0xff] %v2214_v44  ;;  %vm413_vm6 = vcmp.ge.s32.totalorder %v2214_v44, 1  ;;  %3749 = sst [smem:[#allocation74_spill]] %s2319_s4  ;;  %s2462_s4 = sld [smem:[#allocation11 + $0x35]] }
 0x268   :  { %3750 = sst [smem:[#allocation75_spill]] %s2321_s12  ;;  %3759 = vst [vmem:[#allocation82_spill] sm:$0xff] %v2350_v57  ;;  %3768 = vst [vmem:[#allocation89_spill] sm:$0xff] %v2394_v11  ;;  %s2422_s16 = sld [smem:[#allocation11 + $0x52]] }
 0x269   :  { %663 = vrot.lane.b32.xlu1 %v1968_v29, %s1789_s18  ;;  %661 = vrot.lane.b32.xlu0 %v1966_v27, %s1789_s18  ;;  %3717 = sst [smem:[#allocation53_spill]] %s2194_s13  ;;  %s2327_s13 = sld [smem:[#allocation11 + $0x14]] }
 0x26a   :  { %v1612_v26 = vpop.eup %1611  ;;  %3771 = sst [smem:[#allocation92_spill]] %s2412_s14  ;;  %s2444_s12 = sld [smem:[#allocation11 + $0x15]] }
 0x26b   :  { %1588 = vpush %v1612_v26  ;;  %3774 = sst [smem:[#allocation95_spill]] %s2420_s15  ;;  %s3845_s14 = sld [smem:[#allocation38_spill]] }
 0x26c   :  { %3712 = sst [smem:[#allocation48_spill]] %s2172_s8  ;;  %s2623_s15 = sld [smem:[#allocation11 + $0x5a]] }
 0x26d   :  { %598 = vrot.lane.b32.xlu1 %v1968_v29, %s1790_s19  ;;  %596 = vrot.lane.b32.xlu0 %v1966_v27, %s1790_s19  ;;  %s2188_s8 = sld [smem:[#allocation11 + $0x41]] }
 0x26e   :  { %3775 = sst [smem:[#allocation96_spill]] %s2422_s16 }
 0x26f   :  { %3751 = sst [smem:[#allocation76_spill]] %s2327_s13  ;;  %s2442_s13 = sld [smem:[#allocation11 + $0x58]] }
 0x270   :  { %s2621_s16 = sld [smem:[#allocation11 + $0x3a]] }
 0x271   :  { %902 = vrot.lane.b32.xlu1 %v1966_v27, %s1791_s20  ;;  %904 = vrot.lane.b32.xlu0 %v1968_v29, %s1791_s20 }
 0x273   :  { %3716 = sst [smem:[#allocation52_spill]] %s2188_s8 }
 0x275   :  { %1001 = vrot.lane.b32.xlu1 %v1968_v29, %s1792_s21  ;;  %999 = vrot.lane.b32.xlu0 %v1966_v27, %s1792_s21 }
 0x279   :  { %1064 = vrot.lane.b32.xlu1 %v1966_v27, %s1793_s0  ;;  %1066 = vrot.lane.b32.xlu0 %v1968_v29, %s1793_s0 }
 0x27d   :  { %1163 = vrot.lane.b32.xlu1 %v1968_v29, %s1794_s22  ;;  %1161 = vrot.lane.b32.xlu0 %v1966_v27, %s1794_s22 }
 0x29c   :  { %s1589_s30 = spop %1588 }
 0x29d   :  { %s360_s9 = smul.f32 %s1589_s30, %s1471_s23  ;;  %s2125_s23 = sld [smem:[#allocation11 + $0x19]] }
 0x29e   :  { %s2146_s30 = sld [smem:[#allocation11 + $0x2]] }
 0x29f   :  { %s362_s27 = smul.f32 %s360_s9, %s1959_s10  ;;  %v369_v28 = vstv %s360_s9  ;;  %s2095_s10 = sld [smem:[#allocation11 + $0x3]] }
 0x2a0   :  { %v382_v34 = vmul.f32 %v369_v28, %v1935_v32  ;;  %v383_v35 = vmul.f32 %v369_v28, %v1941_v36  ;;  %v897_v32 = vstv %s2012_s2  ;;  %s2153_s9 = sld [smem:[#allocation11 + $0x42]]  ;;  %s2159_s2 = sld [smem:[#allocation11 + $0x8]] }
 0x2a1   :  { %s363_s11 = ssub.f32 %s1472_s6, %s362_s27  ;;  %s2134_s6 = sld [smem:[#allocation11 + $0x59]] }
 0x2a2   :  { %s2161_s27 = sld [smem:[#allocation11 + $0x28]] }
 0x2a3   :  { %v375_v37 = vstv %s363_s11  ;;  %3695 = sst [smem:[#allocation31_spill]] %s2125_s23  ;;  %s2166_s11 = sld [smem:[#allocation11 + $0x48]] }
 0x2a4   :  { %v386_v41 = vadd.f32 %v382_v34, %v375_v37  ;;  %v387_v42 = vadd.f32 %v383_v35, %v375_v37  ;;  %3703 = sst [smem:[#allocation39_spill]] %s2146_s30  ;;  %v401_v35 = vand.u32 15, %v2149_v14  ;;  %s2241_s30 = sld [smem:[#allocation11 + $0x4e]] }
 0x2a5   :  { %v759_v17 = vstv %s2095_s10  ;;  %s2285_s23 = sld [smem:[#allocation11 + $0x2b]] }
 0x2a6   :  { %vm390_vm4 = vcmp.gt.f32.partialorder %v386_v41, 0.0  ;;  %vm391_vm5 = vcmp.gt.f32.partialorder %v387_v42, 0.0  ;;  %v394_v36 = vmul.f32 0.1, %v386_v41  ;;  %v395_v48 = vmul.f32 0.1, %v387_v42 }
 0x2a7   :  { %3697 = sst [smem:[#allocation33_spill]] %s2134_s6  ;;  %s2227_s6 = sld [smem:[#allocation11 + $0x2a]]  ;;  %v2248_v62 = vmul.f32 %v759_v17, %v1968_v29  ;;  %v2276_v15 = vmul.f32 %v759_v17, %v1966_v27  ;;  %v2299_v17 = vmul.f32 %v795_v20, %v1968_v29  ;;  %vm2306_vm7 = vcmp.ge.s32.totalorder %v401_v35, 1 }
 0x2a8   :  { %v2033_v50 = vsel %vm390_vm4, %v386_v41, %v394_v36  ;;  %v2035_v51 = vsel %vm391_vm5, %v387_v42, %v395_v48  ;;  %3705 = sst [smem:[#allocation41_spill]] %s2153_s9  ;;  %s2170_s9 = sld [smem:[#allocation11 + $0x25]]  ;;  %v2366_v20 = vmul.f32 %v819_v22, %v1966_v27  ;;  %v2379_v48 = vmul.f32 %v831_v23, %v1968_v29  ;;  %vm2450_vm11 = vmand %vm413_vm6, %vm2306_vm7 }
 0x2a9   :  { %440 = vrot.lane.b32.xlu1 %v2035_v51, %s1787_s3  ;;  %667 = vrot.lane.b32.xlu0 %v2035_v51, %s1789_s18  ;;  %v874_v54 = vmul.f32 %v873_v46, %v2033_v50  ;;  %v886_v55 = vmul.f32 %v885_v47, %v2033_v50  ;;  %v898_v56 = vmul.f32 %v897_v32, %v2033_v50  ;;  %3706 = sst [smem:[#allocation42_spill]] %s2159_s2  ;;  %s2301_s10 = sld [smem:[#allocation11 + $0x4b]]  ;;  %vm2492_vm13 = vcmp.le.s32.totalorder %v401_v35, 14 }
 0x2aa   :  { %v875_v0 = vmul.f32 %v873_v46, %v2035_v51  ;;  %v887_v2 = vmul.f32 %v885_v47, %v2035_v51  ;;  %v899_v4 = vmul.f32 %v897_v32, %v2035_v51  ;;  %3707 = sst [smem:[#allocation43_spill]] %s2161_s27  ;;  %3733 = vst [vmem:[#allocation62_spill] sm:$0xff] %v2248_v62  ;;  %3739 = vst [vmem:[#allocation66_spill] sm:$0xff] %v2276_v15  ;;  %s2287_s27 = sld [smem:[#allocation11 + $0x11]]  ;;  %vm3669_vm4 = vcmp.lt.s32.totalorder %v2130_v10, 111 }
 0x2ab   :  { %v2048_v59 = vadd.f32 %v874_v54, %v870_v49  ;;  %v2050_v60 = vadd.f32 %v886_v55, %v882_v52  ;;  %v2052_v61 = vadd.f32 %v898_v56, %v894_v53  ;;  %3709 = sst [smem:[#allocation45_spill]] %s2166_s11  ;;  %s2179_s11 = sld [smem:[#allocation11 + $0x1]]  ;;  %v3611_v56 = vand.u32 15, %v2130_v10  ;;  %3744 = vst [vmem:[#allocation71_spill] sm:$0xff] %v2299_v17  ;;  %3763 = vst [vmem:[#allocation84_spill] sm:$0xff] %v2366_v20 }
 0x2ac   :  { %v2065_v5 = vadd.f32 %v875_v0, %v871_v63  ;;  %v2067_v6 = vadd.f32 %v887_v2, %v883_v1  ;;  %v2073_v7 = vadd.f32 %v899_v4, %v895_v3  ;;  %v2253_v63 = vmul.f32 %v771_v18, %v1968_v29  ;;  %3741 = sst [smem:[#allocation68_spill]] %s2285_s23  ;;  %3765 = vst [vmem:[#allocation86_spill] sm:$0xff] %v2379_v48  ;;  %s3798_s2 = sld [smem:[#allocation31_spill]]  ;;  %vm610_vm5 = vmand %vm413_vm6, %vm2492_vm13 }
 0x2ad   :  { %505 = vrot.lane.b32.xlu1 %v2035_v51, %s1788_s17  ;;  %503 = vrot.lane.b32.xlu0 %v2033_v50, %s1788_s17  ;;  %s2111_s17 = sld [smem:[#allocation11 + $0x49]]  ;;  %v404_v2 = vshra.s32 %v2130_v10, 4  ;;  %v2265_v3 = vmul.f32 %v783_v19, %v1968_v29  ;;  %v2281_v1 = vmul.f32 %v771_v18, %v1966_v27  ;;  %v2294_v54 = vmul.f32 %v783_v19, %v1966_v27  ;;  %s3809_s26 = sld [smem:[#allocation33_spill]] }
 0x2ae   :  { %3683 = vst [vmem:[#allocation19_spill] sm:$0xff] %v2065_v5  ;;  %3684 = vst [vmem:[#allocation20_spill] sm:$0xff] %v2067_v6  ;;  %3711 = sst [smem:[#allocation47_spill]] %s2170_s9  ;;  %s2186_s9 = sld [smem:[#allocation11 + $0x7]]  ;;  %v3746_v18 = vmov 0  ;;  %v2314_v52 = vadd.s32 256, %v2130_v10  ;;  %v2334_v53 = vmul.f32 %v807_v21, %v1968_v29  ;;  %v2361_v0 = vmul.f32 %v807_v21, %v1966_v27 }
 0x2af   :  { %3685 = vst [vmem:[#allocation21_spill] sm:$0xff] %v2073_v7  ;;  %3734 = vst [vmem:[#allocation63_spill] sm:$0xff] %v2253_v63  ;;  %3745 = sst [smem:[#allocation72_spill]] %s2301_s10  ;;  %v3747_v18 = vsel %vm2306_vm7, 4294967295, %v3746_v18  ;;  %v2325_v19 = vand.u32 15, %v404_v2  ;;  %v2345_v2 = vmul.f32 %v819_v22, %v1968_v29  ;;  %v407_v21 = vshra.s32 %v2317_v58, 4 }
 0x2b0   :  { %3738 = vst [vmem:[#allocation65_spill] sm:$0xff] %v2265_v3  ;;  %3740 = vst [vmem:[#allocation67_spill] sm:$0xff] %v2281_v1  ;;  %3742 = sst [smem:[#allocation69_spill]] %s2287_s27  ;;  %v406_v49 = vshra.s32 %v2314_v52, 4  ;;  %s2464_s27 = sld [smem:[#allocation11 + $0x55]]  ;;  %vm2525_vm15 = vcmp.le.s32.totalorder %v3611_v56, 14 }
 0x2b1   :  { %438 = vrot.lane.b32.xlu1 %v2033_v50, %s1787_s3  ;;  %602 = vrot.lane.b32.xlu0 %v2035_v51, %s1790_s19  ;;  %s2109_s3 = sld [smem:[#allocation11 + $0x29]]  ;;  %3713 = sst [smem:[#allocation49_spill]] %s2179_s11  ;;  %3743 = vst [vmem:[#allocation70_spill] sm:$0xff] %v2294_v54  ;;  %3748 = vst [vmem:[#allocation73_spill] sm:$0xff] %v3747_v18  ;;  %v2418_v46 = vand.u32 15, %v407_v21  ;;  %vm416_vm0 = vcmp.le.s32.totalorder %v2325_v19, 14 }
 0x2b2   :  { %s2196_s11 = sld [smem:[#allocation11 + $0x47]]  ;;  %s3731_s28 = sld [smem:[#allocation49_spill]]  ;;  %3753 = vst [vmem:[#allocation78_spill] sm:$0xff] %v2334_v53  ;;  %3757 = vst [vmem:[#allocation81_spill] sm:$0xff] %v2345_v2  ;;  %v3818_v16 = vstv %s3798_s2  ;;  %v3833_v48 = vstv %s3798_s2 }
 0x2b3   :  { %3688 = sst [smem:[#allocation24_spill]] %s2111_s17  ;;  %v855_v28 = vstv %s2111_s17  ;;  %s2258_s17 = sld [smem:[#allocation11 + $0x2f]]  ;;  %3762 = vst [vmem:[#allocation83_spill] sm:$0xff] %v2361_v0  ;;  %3773 = vst [vmem:[#allocation94_spill] sm:$0xff] %v2418_v46  ;;  %v2587_v7 = vmul.f32 %v3833_v48, %v2033_v50 }
 0x2b4   :  { %3715 = sst [smem:[#allocation51_spill]] %s2186_s9  ;;  %v2389_v36 = vmul.f32 %v855_v28, %v1968_v29  ;;  %s2519_s10 = sld [smem:[#allocation11 + $0x1d]] }
 0x2b5   :  { %665 = vrot.lane.b32.xlu1 %v2033_v50, %s1789_s18  ;;  %600 = vrot.lane.b32.xlu0 %v2033_v50, %s1790_s19  ;;  %s2113_s18 = sld [smem:[#allocation11 + $0x13]]  ;;  %s2329_s9 = sld [smem:[#allocation11 + $0x34]]  ;;  %3834 = vst [vmem:[#allocation120_spill] sm:$0xff] %v2587_v7 }
 0x2b6   :  { %s2115_s19 = sld [smem:[#allocation11 + $0x33]]  ;;  %3767 = vst [vmem:[#allocation88_spill] sm:$0xff] %v2389_v36  ;;  %v3820_v36 = vstv %s3802_s29  ;;  %s3831_s23 = sld [smem:[#allocation35_spill]] }
 0x2b7   :  { %3687 = sst [smem:[#allocation23_spill]] %s2109_s3  ;;  %v843_v26 = vstv %s2109_s3  ;;  %s2229_s3 = sld [smem:[#allocation11 + $0x4a]] }
 0x2b8   :  { %3718 = sst [smem:[#allocation54_spill]] %s2196_s11  ;;  %s2340_s11 = sld [smem:[#allocation11 + $0x10]]  ;;  %v2384_v22 = vmul.f32 %v843_v26, %v1968_v29  ;;  %v2399_v32 = vmul.f32 %v843_v26, %v1966_v27  ;;  %v2407_v29 = vmul.f32 %v855_v28, %v1966_v27  ;;  %v2416_v26 = vand.u32 15, %v406_v49 }
 0x2b9   :  { %906 = vrot.lane.b32.xlu1 %v2033_v50, %s1791_s20  ;;  %1003 = vrot.lane.b32.xlu0 %v2033_v50, %s1792_s21  ;;  %3736 = sst [smem:[#allocation22_spill]] %s2258_s17  ;;  %s2563_s17 = sld [smem:[#allocation11 + $0x3d]] }
 0x2ba   :  { %3766 = vst [vmem:[#allocation87_spill] sm:$0xff] %v2384_v22  ;;  %3769 = vst [vmem:[#allocation90_spill] sm:$0xff] %v2399_v32  ;;  %3808 = sst [smem:[#allocation32_spill]] %s2519_s10  ;;  %s3855_s10 = sld [smem:[#allocation45_spill]] }
 0x2bb   :  { %3689 = sst [smem:[#allocation25_spill]] %s2113_s18  ;;  %v765_v24 = vstv %s2113_s18  ;;  %s2209_s18 = sld [smem:[#allocation11 + $0x2d]]  ;;  %3770 = vst [vmem:[#allocation91_spill] sm:$0xff] %v2407_v29  ;;  %3772 = vst [vmem:[#allocation93_spill] sm:$0xff] %v2416_v26 }
 0x2bc   :  { %3690 = sst [smem:[#allocation26_spill]] %s2115_s19  ;;  %v777_v25 = vstv %s2115_s19  ;;  %s2207_s19 = sld [smem:[#allocation11 + $0xd]]  ;;  %v2469_v27 = vmul.f32 %v765_v24, %v2033_v50  ;;  %v2474_v23 = vmul.f32 %v765_v24, %v2035_v51  ;;  %v3799_v24 = vmov 0 }
 0x2bd   :  { %908 = vrot.lane.b32.xlu1 %v2035_v51, %s1791_s20  ;;  %1005 = vrot.lane.b32.xlu0 %v2035_v51, %s1792_s21  ;;  %s2117_s20 = sld [smem:[#allocation11 + $0x53]]  ;;  %s2119_s21 = sld [smem:[#allocation11 + $0x16]]  ;;  %v2479_v43 = vmul.f32 %v777_v25, %v2033_v50  ;;  %v2484_v41 = vmul.f32 %v777_v25, %v2035_v51  ;;  %v3800_v24 = vsel %vm2492_vm13, 4294967295, %v3799_v24 }
 0x2be   :  { %3752 = sst [smem:[#allocation77_spill]] %s2329_s9  ;;  %3790 = vst [vmem:[#allocation101_spill] sm:$0xff] %v2469_v27  ;;  %3792 = vst [vmem:[#allocation102_spill] sm:$0xff] %v2474_v23  ;;  %s2605_s2 = sld [smem:[#allocation11 + $0x1a]] }
 0x2bf   :  { %3755 = sst [smem:[#allocation80_spill]] %s2340_s11  ;;  %3793 = vst [vmem:[#allocation103_spill] sm:$0xff] %v2479_v43  ;;  %3795 = vst [vmem:[#allocation104_spill] sm:$0xff] %v2484_v41  ;;  %s2565_s9 = sld [smem:[#allocation11 + $0x5d]] }
 0x2c0   :  { %3782 = sst [smem:[#allocation25_spill]] %s2442_s13  ;;  %s2488_s11 = sld [smem:[#allocation11 + $0x37]]  ;;  %3801 = vst [vmem:[#allocation105_spill] sm:$0xff] %v3800_v24  ;;  %v3864_v17 = vstv %s3855_s10 }
 0x2c1   :  { %1068 = vrot.lane.b32.xlu1 %v2033_v50, %s1793_s0  ;;  %1165 = vrot.lane.b32.xlu0 %v2033_v50, %s1794_s22  ;;  %3720 = sst [smem:[#allocation56_spill]] %s2209_s18  ;;  %s2356_s18 = sld [smem:[#allocation11 + $0x50]] }
 0x2c2   :  { %3719 = sst [smem:[#allocation55_spill]] %s2207_s19  ;;  %s2714_s13 = sld [smem:[#allocation11 + $0x3b]] }
 0x2c3   :  { %3691 = sst [smem:[#allocation27_spill]] %s2117_s20  ;;  %v789_v30 = vstv %s2117_s20  ;;  %v801_v31 = vstv %s2119_s21  ;;  %s2430_s19 = sld [smem:[#allocation11 + $0x18]] }
 0x2c4   :  { %3692 = sst [smem:[#allocation28_spill]] %s2119_s21  ;;  %s2221_s21 = sld [smem:[#allocation11 + $0xa]]  ;;  %v2500_v42 = vmul.f32 %v789_v30, %v2033_v50  ;;  %v2505_v25 = vmul.f32 %v789_v30, %v2035_v51  ;;  %v2510_v47 = vmul.f32 %v801_v31, %v2033_v50  ;;  %v2515_v14 = vmul.f32 %v801_v31, %v2035_v51 }
 0x2c5   :  { %1070 = vrot.lane.b32.xlu1 %v2035_v51, %s1793_s0  ;;  %s2121_s0 = sld [smem:[#allocation11 + $0x36]]  ;;  %s2432_s20 = sld [smem:[#allocation11 + $0x38]] }
 0x2c6   :  { %3783 = sst [smem:[#allocation26_spill]] %s2444_s12  ;;  %3803 = vst [vmem:[#allocation106_spill] sm:$0xff] %v2500_v42  ;;  %3804 = vst [vmem:[#allocation107_spill] sm:$0xff] %v2505_v25 }
 0x2c7   :  { %3761 = sst [smem:[#allocation24_spill]] %s2356_s18  ;;  %3805 = vst [vmem:[#allocation108_spill] sm:$0xff] %v2510_v47  ;;  %3806 = vst [vmem:[#allocation109_spill] sm:$0xff] %v2515_v14  ;;  %s3850_s12 = sld [smem:[#allocation42_spill]]  ;;  %v3851_v47 = vstv %s3845_s14 }
 0x2c8   :  { %3788 = sst [smem:[#allocation27_spill]] %s2462_s4  ;;  %s2712_s4 = sld [smem:[#allocation11 + $0x1b]] }
 0x2c9   :  { %1167 = vrot.lane.b32.xlu1 %v2035_v51, %s1794_s22  ;;  %s2123_s22 = sld [smem:[#allocation11 + $0x56]]  ;;  %3776 = sst [smem:[#allocation97_spill]] %s2430_s19 }
 0x2ca   :  { %3726 = sst [smem:[#allocation59_spill]] %s2221_s21  ;;  %s3886_s14 = sld [smem:[#allocation54_spill]] }
 0x2cb   :  { %3693 = sst [smem:[#allocation29_spill]] %s2121_s0  ;;  %v813_v33 = vstv %s2121_s0  ;;  %s2219_s0 = sld [smem:[#allocation11 + $0x4d]] }
 0x2cc   :  { %3777 = sst [smem:[#allocation98_spill]] %s2432_s20  ;;  %v2532_v29 = vmul.f32 %v813_v33, %v2033_v50  ;;  %v2537_v31 = vmul.f32 %v813_v33, %v2035_v51  ;;  %v2556_v33 = vmul.f32 %v3818_v16, %v2035_v51  ;;  %s3874_s20 = sld [smem:[#allocation46_spill]] }
 0x2cd   :  { %3789 = sst [smem:[#allocation28_spill]] %s2464_s27  ;;  %v3859_v18 = vstv %s3850_s12  ;;  %s2734_s19 = sld [smem:[#allocation11 + $0x5b]]  ;;  %v3952_v16 = vstv %s3850_s12 }
 0x2ce   :  { %3812 = vst [vmem:[#allocation110_spill] sm:$0xff] %v2532_v29  ;;  %3813 = vst [vmem:[#allocation111_spill] sm:$0xff] %v2537_v31  ;;  %3822 = sst [smem:[#allocation33_spill]] %s2563_s17  ;;  %s3861_s17 = sld [smem:[#allocation40_spill]] }
 0x2cf   :  { %3694 = sst [smem:[#allocation30_spill]] %s2123_s22  ;;  %s2260_s22 = sld [smem:[#allocation11 + $0x4f]]  ;;  %3819 = vst [vmem:[#allocation114_spill] sm:$0xff] %v2556_v33 }
 0x2d0   :  { %s3794_s18 = sld [smem:[#allocation30_spill]]  ;;  %3823 = sst [smem:[#allocation116_spill]] %s2565_s9 }
 0x2d1   :  { %3725 = sst [smem:[#allocation58_spill]] %s2219_s0  ;;  %s2354_s0 = sld [smem:[#allocation11 + $0x30]] }
 0x2d2   :  { %3797 = sst [smem:[#allocation30_spill]] %s2488_s11  ;;  %s3853_s11 = sld [smem:[#allocation43_spill]] }
 0x2d3   :  { %v2155_v12 = vpop.permute.xlu1 %436  ;;  %v2157_v13 = vpop.permute.xlu0 %434  ;;  %3846 = sst [smem:[#allocation35_spill]] %s2621_s16  ;;  %s3860_s9 = sld [smem:[#allocation39_spill]] }
 0x2d4   :  { %v445_v28 = vsel %vm442_vm8, %v2157_v13, %v2155_v12  ;;  %s3871_s27 = sld [smem:[#allocation58_spill]]  ;;  %s3876_s16 = sld [smem:[#allocation47_spill]] }
 0x2d5   :  { %3737 = sst [smem:[#allocation64_spill]] %s2260_s22  ;;  %s2517_s22 = sld [smem:[#allocation11 + $0x57]]  ;;  %v460_v35 = vsel %vm2450_vm11, %v445_v28, 0.0 }
 0x2d6   :  { %v3814_v34 = vstv %s3794_s18  ;;  %s3828_s18 = sld [smem:[#allocation34_spill]]  ;;  %s3964_s12 = sld [smem:[#allocation77_spill]] }
 0x2d7   :  { %v2203_v37 = vpop.permute.xlu1 %499  ;;  %v2205_v40 = vpop.permute.xlu0 %501  ;;  %3760 = sst [smem:[#allocation23_spill]] %s2354_s0  ;;  %s2486_s0 = sld [smem:[#allocation11 + $0x17]]  ;;  %v2542_v28 = vmul.f32 %v3814_v34, %v2033_v50  ;;  %v3816_v32 = vmov %v3814_v34  ;;  %v2561_v34 = vmul.f32 %v3820_v36, %v2035_v51 }
 0x2d8   :  { %v510_v56 = vsel %vm507_vm9, %v2203_v37, %v2205_v40  ;;  %v2551_v11 = vmul.f32 %v3816_v32, %v2035_v51  ;;  %v3825_v32 = vand.u32 15, %v2130_v10  ;;  %3840 = sst [smem:[#allocation34_spill]] %s2605_s2  ;;  %v3863_v0 = vstv %s3853_s11  ;;  %s3870_s2 = sld [smem:[#allocation56_spill]] }
 0x2d9   :  { %3815 = vst [vmem:[#allocation112_spill] sm:$0xff] %v2542_v28  ;;  %3821 = vst [vmem:[#allocation115_spill] sm:$0xff] %v2561_v34  ;;  %v3830_v34 = vstv %s3809_s26  ;;  %v3839_v28 = vstv %s2132_s5  ;;  %s3843_s26 = sld [smem:[#allocation37_spill]] }
 0x2da   :  { %3817 = vst [vmem:[#allocation113_spill] sm:$0xff] %v2551_v11  ;;  %vm2572_vm1 = vcmp.ge.s32.totalorder %v3825_v32, 1  ;;  %v2582_v33 = vmul.f32 %v3830_v34, %v2035_v51  ;;  %v3835_v32 = vstv %s3802_s29  ;;  %v3837_v5 = vmov %v3830_v34  ;;  %s3841_s29 = sld [smem:[#allocation36_spill]] }
 0x2db   :  { %v2267_v4 = vpop.permute.xlu1 %663  ;;  %v2269_v8 = vpop.permute.xlu0 %661  ;;  %3807 = sst [smem:[#allocation31_spill]] %s2517_s22  ;;  %v2592_v6 = vmul.f32 %v3835_v32, %v2033_v50  ;;  %v2597_v11 = vmul.f32 %v3837_v5, %v2033_v50  ;;  %v466_v31 = vmul.f32 %v3839_v28, %v460_v35  ;;  %v521_v32 = vsel %vm413_vm6, %v510_v56, 0.0  ;;  %s3862_s22 = sld [smem:[#allocation55_spill]]  ;;  %vm2702_vm11 = vmand %vm416_vm0, %vm2572_vm1 }
 0x2dc   :  { %3832 = vst [vmem:[#allocation119_spill] sm:$0xff] %v2582_v33  ;;  %v3842_v28 = vstv %s3828_s18  ;;  %v3844_v51 = vstv %s3831_s23  ;;  %v672_v48 = vsel %vm669_vm10, %v2269_v8, %v2267_v4  ;;  %3847 = sst [smem:[#allocation36_spill]] %s2623_s15  ;;  %v587_v56 = vmul.f32 %v3851_v47, %v521_v32  ;;  %s3878_s15 = sld [smem:[#allocation48_spill]] }
 0x2dd   :  { %3796 = sst [smem:[#allocation29_spill]] %s2486_s0  ;;  %3836 = vst [vmem:[#allocation121_spill] sm:$0xff] %v2592_v6  ;;  %3838 = vst [vmem:[#allocation122_spill] sm:$0xff] %v2597_v11  ;;  %v478_v11 = vmul.f32 %v3842_v28, %v460_v35  ;;  %v490_v34 = vmul.f32 %v3844_v51, %v460_v35  ;;  %v2631_v35 = vadd.f32 %v466_v31, %v2020_v38  ;;  %v683_v5 = vsel %vm2306_vm7, %v672_v48, 0.0  ;;  %s3867_s0 = sld [smem:[#allocation41_spill]] }
 0x2de   :  { %v3856_v28 = vstv %s3731_s28  ;;  %v725_v2 = vmul.f32 %v3859_v18, %v683_v5  ;;  %vm412_vm6 = vcmp.ge.s32.totalorder %v2325_v19, 1  ;;  %v749_v57 = vmul.f32 %v3864_v17, %v683_v5  ;;  %s2749_s28 = sld [smem:[#allocation11 + $0x3e]] }
 0x2df   :  { %v2369_v9 = vpop.permute.xlu1 %598  ;;  %v2371_v55 = vpop.permute.xlu0 %596  ;;  %v3849_v29 = vstv %s3843_s26  ;;  %v2652_v33 = vadd.f32 %v478_v11, %v2022_v39  ;;  %v2655_v47 = vadd.f32 %v490_v34, %v2027_v45  ;;  %v3857_v11 = vstv %s2181_s7  ;;  %s3885_s7 = sld [smem:[#allocation53_spill]] }
 0x2e0   :  { %3764 = vst [vmem:[#allocation85_spill] sm:$0xff] %v2369_v9  ;;  %v3848_v51 = vstv %s3841_s29  ;;  %v575_v14 = vmul.f32 %v3849_v29, %v521_v32  ;;  %v607_v7 = vsel %vm604_vm14, %v2371_v55, %v2369_v9  ;;  %v2673_v34 = vmul.f32 %v3857_v11, %v521_v32  ;;  %s2751_s26 = sld [smem:[#allocation11 + $0x5e]] }
 0x2e1   :  { %v563_v6 = vmul.f32 %v3848_v51, %v521_v32  ;;  %v3858_v29 = vstv %s2188_s8  ;;  %v737_v11 = vmul.f32 %v3863_v0, %v683_v5  ;;  %v2696_v18 = vadd.f32 %v587_v56, %v2027_v45  ;;  %s2736_s8 = sld [smem:[#allocation11 + $0x1e]] }
 0x2e2   :  { %v2677_v48 = vmul.f32 %v3858_v29, %v521_v32  ;;  %v3873_v29 = vstv %s3861_s17  ;;  %v3875_v24 = vstv %s3862_s22  ;;  %v3883_v9 = vstv %s3871_s27  ;;  %s3884_s22 = sld [smem:[#allocation51_spill]]  ;;  %s2765_s27 = sld [smem:[#allocation11 + $0x1f]] }
 0x2e3   :  { %v2434_v49 = vpop.permute.xlu1 %902  ;;  %v2436_v21 = vpop.permute.xlu0 %904  ;;  %3866 = vst [vmem:[#allocation126_spill] sm:$0xff] %v2696_v18  ;;  %v2722_v53 = vmul.f32 %v3873_v29, %v683_v5  ;;  %v3893_v18 = vstv %s3878_s15  ;;  %s2791_s15 = sld [smem:[#allocation11 + $0x5f]] }
 0x2e4   :  { %3778 = vst [vmem:[#allocation99_spill] sm:$0xff] %v2434_v49  ;;  %3780 = vst [vmem:[#allocation100_spill] sm:$0xff] %v2436_v21  ;;  %v913_v31 = vsel %vm910_vm12, %v2434_v49, %v2436_v21  ;;  %v2669_v49 = vmul.f32 %v3856_v28, %v521_v32  ;;  %v2685_v28 = vadd.f32 %v563_v6, %v2020_v38 }
 0x2e5   :  { %v923_v20 = vsel %vm2525_vm15, %v913_v31, 0.0  ;;  %v2693_v32 = vadd.f32 %v575_v14, %v2022_v39  ;;  %v622_v31 = vsel %vm610_vm5, %v607_v7, 0.0  ;;  %v3872_v7 = vstv %s3860_s9  ;;  %vm2781_vm5 = vmand %vm416_vm0, %vm2525_vm15 }
 0x2e6   :  { %v2718_v56 = vmul.f32 %v3872_v7, %v683_v5  ;;  %v965_v44 = vmul.f32 %v3875_v24, %v923_v20  ;;  %v3880_v7 = vstv %s3867_s0  ;;  %v2743_v24 = vadd.f32 %v725_v2, %v2020_v38 }
 0x2e7   :  { %v2567_v22 = vpop.permute.xlu1 %1001  ;;  %v2577_v36 = vpop.permute.xlu0 %999  ;;  %3865 = vst [vmem:[#allocation125_spill] sm:$0xff] %v2693_v32  ;;  %v2740_v29 = vmul.f32 %v3880_v7, %v683_v5  ;;  %v2757_v5 = vadd.f32 %v749_v57, %v2027_v45  ;;  %v3889_v7 = vstv %s3874_s20  ;;  %s3906_s20 = sld [smem:[#allocation72_spill]] }
 0x2e8   :  { %3824 = vst [vmem:[#allocation117_spill] sm:$0xff] %v2567_v22  ;;  %3829 = vst [vmem:[#allocation118_spill] sm:$0xff] %v2577_v36  ;;  %v1010_v0 = vsel %vm1007_vm2, %v2577_v36, %v2567_v22  ;;  %v3882_v22 = vstv %s3870_s2  ;;  %v2761_v2 = vmul.f32 %v3889_v7, %v622_v31  ;;  %s2789_s2 = sld [smem:[#allocation11 + $0x3f]] }
 0x2e9   :  { %3881 = vst [vmem:[#allocation129_spill] sm:$0xff] %v2743_v24  ;;  %v977_v21 = vmul.f32 %v3882_v22, %v923_v20  ;;  %3888 = vst [vmem:[#allocation131_spill] sm:$0xff] %v2757_v5  ;;  %v1024_v22 = vsel %vm2702_vm11, %v1010_v0, 0.0  ;;  %3898 = sst [smem:[#allocation43_spill]] %s2791_s15  ;;  %vm414_vm11 = vcmp.ge.s32.totalorder %v2416_v26, 1  ;;  %s3970_s15 = sld [smem:[#allocation50_spill]] }
 0x2ea   :  { %3890 = vst [vmem:[#allocation132_spill] sm:$0xff] %v2761_v2 }
 0x2eb   :  { %v2647_v50 = vpop.permute.xlu1 %1064  ;;  %v2649_v51 = vpop.permute.xlu0 %1066 }
 0x2ec   :  { %3852 = vst [vmem:[#allocation123_spill] sm:$0xff] %v2647_v50  ;;  %3854 = vst [vmem:[#allocation124_spill] sm:$0xff] %v2649_v51  ;;  %v1075_v36 = vsel %vm3671_vm3, %v2647_v50, %v2649_v51  ;;  %v989_v50 = vmul.f32 %v3883_v9, %v923_v20  ;;  %v2754_v51 = vadd.f32 %v737_v11, %v2022_v39  ;;  %v3891_v9 = vstv %s3876_s16  ;;  %s3904_s16 = sld [smem:[#allocation68_spill]] }
 0x2ed   :  { %v2769_v24 = vmul.f32 %v3891_v9, %v622_v31  ;;  %v2773_v11 = vmul.f32 %v3893_v18, %v622_v31  ;;  %v1085_v57 = vsel %vm416_vm0, %v1075_v36, 0.0  ;;  %v3899_v36 = vstv %s3884_s22 }
 0x2ee   :  { %3887 = vst [vmem:[#allocation130_spill] sm:$0xff] %v2754_v51  ;;  %3897 = sst [smem:[#allocation42_spill]] %s2789_s2  ;;  %v2795_v18 = vmul.f32 %v3899_v36, %v923_v20  ;;  %v3901_v31 = vstv %s3885_s7  ;;  %v3903_v9 = vstv %s3886_s14  ;;  %v2806_v51 = vadd.f32 %v965_v44, %v2048_v59  ;;  %s3917_s14 = sld [smem:[#allocation61_spill]] }
 0x2ef   :  { %v2730_v14 = vpop.permute.xlu1 %1163  ;;  %v2732_v17 = vpop.permute.xlu0 %1161  ;;  %3892 = vst [vmem:[#allocation133_spill] sm:$0xff] %v2769_v24  ;;  %3894 = vst [vmem:[#allocation134_spill] sm:$0xff] %v2773_v11  ;;  %v2799_v7 = vmul.f32 %v3901_v31, %v923_v20  ;;  %v2803_v5 = vmul.f32 %v3903_v9, %v923_v20  ;;  %v3910_v36 = vstv %s2221_s21  ;;  %v3912_v31 = vstv %s2227_s6  ;;  %s3920_s21 = sld [smem:[#allocation22_spill]]  ;;  %s3971_s2 = sld [smem:[#allocation52_spill]] }
 0x2f0   :  { %3877 = vst [vmem:[#allocation127_spill] sm:$0xff] %v2730_v14  ;;  %3879 = vst [vmem:[#allocation128_spill] sm:$0xff] %v2732_v17  ;;  %v1172_v0 = vsel %vm3669_vm4, %v2732_v17, %v2730_v14  ;;  %v2809_v17 = vadd.f32 %v977_v21, %v2050_v60  ;;  %v2812_v14 = vadd.f32 %v989_v50, %v2052_v61  ;;  %vm415_vm0 = vcmp.ge.s32.totalorder %v2418_v46, 1 }
 0x2f1   :  { %3900 = vst [vmem:[#allocation135_spill] sm:$0xff] %v2795_v18  ;;  %3902 = vst [vmem:[#allocation136_spill] sm:$0xff] %v2799_v7  ;;  %v2816_v18 = vmul.f32 %v3910_v36, %v1024_v22  ;;  %v2820_v7 = vmul.f32 %v3912_v31, %v1024_v22  ;;  %v3914_v20 = vstv %s2229_s3  ;;  %v3916_v60 = vstv %s2235_s25 }
 0x2f2   :  { %3905 = vst [vmem:[#allocation137_spill] sm:$0xff] %v2803_v5  ;;  %3907 = vst [vmem:[#allocation138_spill] sm:$0xff] %v2806_v51  ;;  %v2825_v59 = vmul.f32 %v3914_v20, %v1024_v22  ;;  %v2829_v44 = vmul.f32 %v3916_v60, %v1085_v57  ;;  %v3919_v61 = vstv %s2237_s1  ;;  %v1186_v50 = vsel %vm2781_vm5, %v1172_v0, 0.0  ;;  %s3929_s1 = sld [smem:[#allocation64_spill]] }
 0x2f3   :  { %3908 = vst [vmem:[#allocation139_spill] sm:$0xff] %v2809_v17  ;;  %3909 = vst [vmem:[#allocation140_spill] sm:$0xff] %v2812_v14  ;;  %v2833_v21 = vmul.f32 %v3919_v61, %v1085_v57  ;;  %v3922_v9 = vstv %s2241_s30  ;;  %v3924_v22 = vand.u32 15, %v2314_v52  ;;  %v3925_v31 = vmov 0 }
 0x2f4   :  { %3911 = vst [vmem:[#allocation141_spill] sm:$0xff] %v2816_v18  ;;  %3913 = vst [vmem:[#allocation142_spill] sm:$0xff] %v2820_v7  ;;  %v2840_v36 = vmul.f32 %v3922_v9, %v1085_v57  ;;  %v3928_v20 = vstv %s2283_s24  ;;  %v3931_v61 = vstv %s3904_s16  ;;  %v3933_v0 = vstv %s3906_s20 }
 0x2f5   :  { %3915 = vst [vmem:[#allocation143_spill] sm:$0xff] %v2825_v59  ;;  %3918 = vst [vmem:[#allocation144_spill] sm:$0xff] %v2829_v44  ;;  %vm2844_vm4 = vcmp.ge.s32.totalorder %v3924_v22, 1  ;;  %v2850_v60 = vmul.f32 %v3928_v20, %v1085_v57  ;;  %v2854_v6 = vmul.f32 %v3931_v61, %v1085_v57  ;;  %v3937_v22 = vand.u32 15, %v2317_v58  ;;  %v4139_v20 = vld [vmem:[#allocation118_spill] sm:$0xff] }
 0x2f6   :  { %3921 = vst [vmem:[#allocation145_spill] sm:$0xff] %v2833_v21  ;;  %3923 = vst [vmem:[#allocation146_spill] sm:$0xff] %v2840_v36  ;;  %v3926_v31 = vsel %vm2844_vm4, 4294967295, %v3925_v31  ;;  %v2858_v21 = vmul.f32 %v3933_v0, %v1085_v57  ;;  %v3940_v44 = vstv %s3917_s14  ;;  %v3947_v7 = vstv %s3828_s18  ;;  %s3955_s18 = sld [smem:[#allocation38_spill]] }
 0x2f7   :  { %3927 = vst [vmem:[#allocation147_spill] sm:$0xff] %v3926_v31  ;;  %3930 = vst [vmem:[#allocation148_spill] sm:$0xff] %v2850_v60  ;;  %vm2870_vm3 = vcmp.ge.s32.totalorder %v3937_v22, 1  ;;  %v3949_v17 = vstv %s3860_s9  ;;  %v3951_v9 = vstv %s3867_s0  ;;  %v3953_v5 = vstv %s3853_s11  ;;  %s3958_s0 = sld [smem:[#allocation74_spill]]  ;;  %s3961_s11 = sld [smem:[#allocation75_spill]] }
 0x2f8   :  { %3932 = vst [vmem:[#allocation149_spill] sm:$0xff] %v2854_v6  ;;  %3934 = vst [vmem:[#allocation150_spill] sm:$0xff] %v2858_v21  ;;  %v2880_v21 = vmul.f32 %v3940_v44, %v1186_v50  ;;  %v3942_v6 = vstv %s3920_s21  ;;  %v3944_v57 = vstv %s3929_s1  ;;  %s3968_s9 = sld [smem:[#allocation49_spill]]  ;;  %v3987_v23 = vstv %s3970_s15  ;;  %s3998_s15 = sld [smem:[#allocation46_spill]] }
 0x2f9   :  { %vm2864_vm5 = vmand %vm412_vm6, %vm2572_vm1  ;;  %v2884_v60 = vmul.f32 %v3942_v6, %v1186_v50  ;;  %v2892_v0 = vmul.f32 %v3944_v57, %v1186_v50  ;;  %v3946_v57 = vstv %s2132_s5  ;;  %s3954_s5 = sld [smem:[#allocation37_spill]]  ;;  %v3988_v3 = vstv %s3971_s2  ;;  %s3999_s2 = sld [smem:[#allocation47_spill]] }
 0x2fa   :  { %3941 = vst [vmem:[#allocation151_spill] sm:$0xff] %v2880_v21 }
 0x2fb   :  { %3943 = vst [vmem:[#allocation152_spill] sm:$0xff] %v2884_v60  ;;  %3945 = vst [vmem:[#allocation153_spill] sm:$0xff] %v2892_v0 }
 0x2fe   :  { %v3985_v26 = vstv %s3968_s9  ;;  %s4019_s9 = sld [smem:[#allocation25_spill]] }
 0x31b   :  { %v441_v22 = vpop.permute.xlu1 %440  ;;  %v2886_v59 = vpop.permute.xlu0 %667 }
 0x31c   :  { %v446_v44 = vsel %vm442_vm8, %v441_v22, %v2157_v13  ;;  %v673_v6 = vsel %vm669_vm10, %v2886_v59, %v2269_v8  ;;  %v3948_v13 = vstv %s3831_s23  ;;  %v3950_v8 = vstv %s3861_s17  ;;  %s3956_s23 = sld [smem:[#allocation69_spill]]  ;;  %s3966_s17 = sld [smem:[#allocation79_spill]] }
 0x31d   :  { %v459_v21 = vsel %vm2864_vm5, %v446_v44, 0.0  ;;  %v682_v36 = vsel %vm2572_vm1, %v673_v6, 0.0  ;;  %vm450_vm1 = vmand %vm415_vm0, %vm2870_vm3 }
 0x31e   :  { %v465_v0 = vmul.f32 %v3946_v57, %v459_v21  ;;  %v477_v18 = vmul.f32 %v3947_v7, %v459_v21  ;;  %v489_v14 = vmul.f32 %v3948_v13, %v459_v21  ;;  %v2916_v51 = vmul.f32 %v3949_v17, %v682_v36 }
 0x31f   :  { %v2920_v60 = vmul.f32 %v3950_v8, %v682_v36  ;;  %v2924_v44 = vmul.f32 %v3951_v9, %v682_v36  ;;  %v724_v6 = vmul.f32 %v3952_v16, %v682_v36  ;;  %v736_v50 = vmul.f32 %v3953_v5, %v682_v36  ;;  %v506_v57 = vpop.permute.xlu1 %505  ;;  %v504_v7 = vpop.permute.xlu0 %503 }
 0x320   :  { %v467_v21 = vadd.f32 %v465_v0, %v2020_v38  ;;  %v479_v17 = vadd.f32 %v477_v18, %v2022_v39  ;;  %v491_v13 = vadd.f32 %v489_v14, %v2027_v45  ;;  %v3957_v8 = vstv %s3855_s10  ;;  %s3963_s10 = sld [smem:[#allocation76_spill]] }
 0x321   :  { %v748_v9 = vmul.f32 %v3957_v8, %v682_v36  ;;  %v2936_v16 = vadd.f32 %v724_v6, %v2020_v38  ;;  %v2939_v5 = vadd.f32 %v736_v50, %v2022_v39  ;;  %v511_v0 = vsel %vm507_vm9, %v506_v57, %v2203_v37 }
 0x322   :  { %v508_v18 = vsel %vm507_vm9, %v504_v7, %v506_v57  ;;  %v520_v36 = vsel %vm412_vm6, %v511_v0, 0.0  ;;  %v509_v50 = vsel %vm507_vm9, %v2205_v40, %v504_v7  ;;  %v3965_v6 = vstv %s3841_s29  ;;  %vm449_vm9 = vmand %vm414_vm11, %vm2844_vm4  ;;  %s3979_s29 = sld [smem:[#allocation80_spill]] }
 0x323   :  { %3959 = vst [vmem:[#allocation154_spill] sm:$0xff] %v2936_v16  ;;  %3960 = vst [vmem:[#allocation155_spill] sm:$0xff] %v2939_v5  ;;  %v2947_v14 = vadd.f32 %v748_v9, %v2027_v45  ;;  %v523_v37 = vsel %vm415_vm0, %v508_v18, 0.0  ;;  %v562_v8 = vmul.f32 %v3965_v6, %v520_v36  ;;  %v3967_v57 = vstv %s3954_s5  ;;  %v439_v6 = vpop.permute.xlu1 %438  ;;  %s3982_s5 = sld [smem:[#allocation23_spill]] }
 0x324   :  { %v574_v61 = vmul.f32 %v3967_v57, %v520_v36  ;;  %v3969_v9 = vstv %s3955_s18  ;;  %v522_v0 = vsel %vm414_vm11, %v509_v50, 0.0  ;;  %v3972_v24 = vstv %s3956_s23  ;;  %s3986_s18 = sld [smem:[#allocation24_spill]]  ;;  %s4000_s23 = sld [smem:[#allocation48_spill]] }
 0x325   :  { %3962 = vst [vmem:[#allocation156_spill] sm:$0xff] %v2947_v14  ;;  %v586_v11 = vmul.f32 %v3969_v9, %v520_v36  ;;  %v532_v2 = vmul.f32 %v3972_v24, %v522_v0  ;;  %v3973_v25 = vmov %v3972_v24  ;;  %v3974_v7 = vstv %s3958_s0  ;;  %s4001_s0 = sld [smem:[#allocation92_spill]] }
 0x326   :  { %v533_v40 = vmul.f32 %v3973_v25, %v523_v37  ;;  %v544_v42 = vmul.f32 %v3974_v7, %v522_v0  ;;  %v3975_v18 = vmov %v3974_v7  ;;  %v3976_v57 = vstv %s3961_s11  ;;  %s4002_s11 = sld [smem:[#allocation95_spill]] }
 0x327   :  { %v545_v32 = vmul.f32 %v3975_v18, %v523_v37  ;;  %v556_v9 = vmul.f32 %v3976_v57, %v522_v0  ;;  %v3977_v41 = vmov %v3976_v57  ;;  %v3978_v43 = vstv %s3963_s10 }
 0x328   :  { %v557_v50 = vmul.f32 %v3977_v41, %v523_v37  ;;  %v2982_v24 = vmul.f32 %v3978_v43, %v523_v37  ;;  %v3980_v25 = vstv %s3964_s12  ;;  %v3983_v18 = vstv %s3966_s17 }
 0x329   :  { %v2986_v7 = vmul.f32 %v3980_v25, %v523_v37  ;;  %v2994_v57 = vmul.f32 %v3983_v18, %v523_v37  ;;  %v526_v41 = vmul.f32 %v3985_v26, %v520_v36  ;;  %v538_v43 = vmul.f32 %v3987_v23, %v520_v36 }
 0x32a   :  { %v550_v54 = vmul.f32 %v3988_v3, %v520_v36  ;;  %v443_v25 = vsel %vm442_vm8, %v439_v6, %v441_v22  ;;  %v444_v46 = vsel %vm442_vm8, %v2155_v12, %v439_v6  ;;  %v3989_v27 = vstv %s3963_s10  ;;  %vm609_vm8 = vmand %vm412_vm6, %vm2525_vm15  ;;  %s4006_s10 = sld [smem:[#allocation96_spill]] }
 0x32b   :  { %3981 = vst [vmem:[#allocation157_spill] sm:$0xff] %v2986_v7  ;;  %3984 = vst [vmem:[#allocation158_spill] sm:$0xff] %v2994_v57  ;;  %v564_v7 = vadd.f32 %v562_v8, %v2020_v38  ;;  %v568_v37 = vmul.f32 %v3989_v27, %v522_v0  ;;  %v461_v18 = vsel %vm449_vm9, %v444_v46, 0.0  ;;  %v462_v57 = vsel %vm450_vm1, %v443_v25, 0.0 }
 0x32c   :  { %v576_v26 = vadd.f32 %v574_v61, %v2022_v39  ;;  %v3990_v14 = vstv %s3964_s12  ;;  %v3991_v23 = vstv %s3979_s29  ;;  %v3993_v22 = vstv %s3982_s5  ;;  %s4010_s12 = sld [smem:[#allocation97_spill]]  ;;  %s4053_s29 = sld [smem:[#allocation26_spill]] }
 0x32d   :  { %v580_v63 = vmul.f32 %v3990_v14, %v522_v0  ;;  %v471_v1 = vmul.f32 %v3991_v23, %v461_v18  ;;  %v3992_v3 = vmov %v3991_v23  ;;  %v483_v62 = vmul.f32 %v3993_v22, %v461_v18  ;;  %v3027_v23 = vpop.permute.xlu0 %602  ;;  %s4054_s5 = sld [smem:[#allocation27_spill]] }
 0x32e   :  { %v472_v36 = vmul.f32 %v3992_v3, %v462_v57  ;;  %v3994_v5 = vmov %v3993_v22  ;;  %v3995_v12 = vstv %s3986_s18  ;;  %v570_v27 = vadd.f32 %v568_v37, %v564_v7  ;;  %s4056_s18 = sld [smem:[#allocation28_spill]] }
 0x32f   :  { %v484_v15 = vmul.f32 %v3994_v5, %v462_v57  ;;  %v495_v6 = vmul.f32 %v3995_v12, %v461_v18  ;;  %v3996_v38 = vmov %v3995_v12  ;;  %v582_v46 = vadd.f32 %v580_v63, %v576_v26 }
 0x330   :  { %v496_v8 = vmul.f32 %v3996_v38, %v462_v57  ;;  %v473_v25 = vadd.f32 %v471_v1, %v467_v21  ;;  %v474_v39 = vadd.f32 %v472_v36, %v2631_v35  ;;  %v485_v61 = vadd.f32 %v483_v62, %v479_v17  ;;  %v666_v62 = vpop.permute.xlu1 %665 }
 0x331   :  { %v486_v14 = vadd.f32 %v484_v15, %v2652_v33  ;;  %v497_v16 = vadd.f32 %v495_v6, %v491_v13  ;;  %v588_v22 = vadd.f32 %v586_v11, %v2027_v45  ;;  %v3997_v5 = vstv %s3966_s17  ;;  %s4016_s17 = sld [smem:[#allocation98_spill]] }
 0x332   :  { %v498_v3 = vadd.f32 %v496_v8, %v2655_v47  ;;  %v592_v31 = vmul.f32 %v3997_v5, %v522_v0  ;;  %v528_v18 = vadd.f32 %v526_v41, %v473_v25  ;;  %v529_v57 = vadd.f32 %v2669_v49, %v474_v39 }
 0x333   :  { %v540_v7 = vadd.f32 %v538_v43, %v485_v61  ;;  %v541_v63 = vadd.f32 %v2673_v34, %v486_v14  ;;  %v552_v1 = vadd.f32 %v550_v54, %v497_v16  ;;  %v608_v45 = vsel %vm604_vm14, %v3027_v23, %v2371_v55 }
 0x334   :  { %v553_v15 = vadd.f32 %v2677_v48, %v498_v3  ;;  %v594_v33 = vadd.f32 %v592_v31, %v588_v22  ;;  %v534_v49 = vadd.f32 %v532_v2, %v528_v18  ;;  %v535_v35 = vadd.f32 %v533_v40, %v529_v57 }
 0x335   :  { %v546_v47 = vadd.f32 %v544_v42, %v540_v7  ;;  %v547_v30 = vadd.f32 %v545_v32, %v541_v63  ;;  %v558_v34 = vadd.f32 %v556_v9, %v552_v1  ;;  %v621_v11 = vsel %vm609_vm8, %v608_v45, 0.0  ;;  %v4025_v7 = vld [vmem:[#allocation154_spill] sm:$0xff] }
 0x336   :  { %v559_v19 = vadd.f32 %v557_v50, %v553_v15  ;;  %v670_v54 = vsel %vm669_vm10, %v666_v62, %v2886_v59  ;;  %v690_v48 = vadd.f32 %v2916_v51, %v534_v49  ;;  %v691_v31 = vadd.f32 %v2718_v56, %v535_v35  ;;  %v4137_v50 = vld [vmem:[#allocation91_spill] sm:$0xff] }
 0x337   :  { %v702_v55 = vadd.f32 %v2920_v60, %v546_v47  ;;  %v703_v2 = vadd.f32 %v2722_v53, %v547_v30  ;;  %v714_v42 = vadd.f32 %v2924_v44, %v558_v34  ;;  %v4003_v21 = vstv %s3998_s15  ;;  %v4030_v30 = vld [vmem:[#allocation66_spill] sm:$0xff]  ;;  %s4067_s15 = sld [smem:[#allocation54_spill]] }
 0x338   :  { %v715_v32 = vadd.f32 %v2740_v29, %v559_v19  ;;  %v627_v17 = vmul.f32 %v4003_v21, %v621_v11  ;;  %v4004_v13 = vstv %s3999_s2  ;;  %v4005_v51 = vand.u32 15, %v2314_v52  ;;  %v4031_v19 = vld [vmem:[#allocation155_spill] sm:$0xff]  ;;  %s4071_s2 = sld [smem:[#allocation55_spill]] }
 0x339   :  { %v639_v59 = vmul.f32 %v4004_v13, %v621_v11  ;;  %v4009_v60 = vstv %s4000_s23  ;;  %v671_v29 = vsel %vm669_vm10, %v2267_v4, %v666_v62  ;;  %v685_v44 = vsel %vm2870_vm3, %v670_v54, 0.0  ;;  %v4032_v54 = vld [vmem:[#allocation62_spill] sm:$0xff]  ;;  %s4099_s23 = sld [smem:[#allocation59_spill]] }
 0x33a   :  { %vm3059_vm15 = vcmp.le.s32.totalorder %v4005_v51, 14  ;;  %v651_v53 = vmul.f32 %v4009_v60, %v621_v11  ;;  %v4011_v16 = vand.u32 15, %v2317_v58  ;;  %v571_v0 = vadd.f32 %v2982_v24, %v2685_v28  ;;  %v4038_v60 = vld [vmem:[#allocation65_spill] sm:$0xff] }
 0x33b   :  { %v3078_v40 = vadd.f32 %v627_v17, %v570_v27  ;;  %v3080_v9 = vadd.f32 %v639_v59, %v582_v46  ;;  %v684_v4 = vsel %vm2844_vm4, %v671_v29, 0.0  ;;  %v4015_v41 = vstv %s4001_s0  ;;  %v4036_v17 = vld [vmem:[#allocation101_spill] sm:$0xff]  ;;  %v4037_v59 = vld [vmem:[#allocation70_spill] sm:$0xff]  ;;  %vm3145_vm10 = vmand %vm414_vm11, %vm3059_vm15  ;;  %s4107_s0 = sld [smem:[#allocation29_spill]] }
 0x33c   :  { %vm3072_vm6 = vcmp.le.s32.totalorder %v4011_v16, 14  ;;  %v695_v43 = vmul.f32 %v4015_v41, %v685_v44  ;;  %v3086_v37 = vadd.f32 %v651_v53, %v594_v33  ;;  %v4017_v58 = vmov %v4015_v41  ;;  %v4039_v29 = vld [vmem:[#allocation102_spill] sm:$0xff]  ;;  %v4040_v16 = vld [vmem:[#allocation103_spill] sm:$0xff]  ;;  %v4041_v41 = vld [vmem:[#allocation104_spill] sm:$0xff] }
 0x33d   :  { %v694_v26 = vmul.f32 %v4017_v58, %v684_v4  ;;  %v4018_v36 = vstv %s4002_s11  ;;  %v4021_v38 = vstv %s4006_s10  ;;  %v4023_v25 = vstv %s4010_s12  ;;  %v4042_v58 = vld [vmem:[#allocation125_spill] sm:$0xff]  ;;  %vm612_vm5 = vmand %vm415_vm0, %vm3072_vm6  ;;  %s4108_s11 = sld [smem:[#allocation30_spill]]  ;;  %s4112_s10 = sld [smem:[#allocation31_spill]] }
 0x33e   :  { %v706_v12 = vmul.f32 %v4018_v36, %v684_v4  ;;  %v4020_v28 = vmov %v4018_v36  ;;  %v697_v6 = vadd.f32 %v695_v43, %v691_v31  ;;  %v718_v8 = vmul.f32 %v4021_v38, %v684_v4  ;;  %v4033_v31 = vld [vmem:[#allocation67_spill] sm:$0xff]  ;;  %s4114_s12 = sld [smem:[#allocation32_spill]] }
 0x33f   :  { %v707_v24 = vmul.f32 %v4020_v28, %v685_v44  ;;  %v4022_v27 = vmov %v4021_v38  ;;  %v730_v39 = vmul.f32 %v4023_v25, %v684_v4  ;;  %v696_v61 = vadd.f32 %v694_v26, %v690_v48  ;;  %v4043_v26 = vld [vmem:[#allocation157_spill] sm:$0xff] }
 0x340   :  { %v719_v46 = vmul.f32 %v4022_v27, %v685_v44  ;;  %v708_v14 = vadd.f32 %v706_v12, %v702_v55  ;;  %v4024_v22 = vmov %v4023_v25  ;;  %v720_v18 = vadd.f32 %v718_v8, %v714_v42  ;;  %v4044_v12 = vld [vmem:[#allocation106_spill] sm:$0xff]  ;;  %v4046_v8 = vld [vmem:[#allocation126_spill] sm:$0xff] }
 0x341   :  { %v709_v3 = vadd.f32 %v707_v24, %v703_v2  ;;  %v3102_v5 = vmul.f32 %v4024_v22, %v685_v44  ;;  %v3105_v63 = vadd.f32 %v730_v39, %v4025_v7  ;;  %v4026_v62 = vstv %s4016_s17  ;;  %v4034_v2 = vld [vmem:[#allocation63_spill] sm:$0xff]  ;;  %v4045_v24 = vld [vmem:[#allocation107_spill] sm:$0xff]  ;;  %v4047_v27 = vld [vmem:[#allocation158_spill] sm:$0xff]  ;;  %s4134_s17 = sld [smem:[#allocation34_spill]] }
 0x342   :  { %v721_v57 = vadd.f32 %v719_v46, %v715_v32  ;;  %v742_v1 = vmul.f32 %v4026_v62, %v684_v4  ;;  %v4027_v15 = vmov %v4026_v62  ;;  %v4028_v45 = vstv %s4019_s9  ;;  %v4035_v32 = vld [vmem:[#allocation156_spill] sm:$0xff]  ;;  %v4048_v25 = vld [vmem:[#allocation93_spill] sm:$0xff]  ;;  %v3154_v62 = vpop.permute.xlu1 %906  ;;  %s4138_s9 = sld [smem:[#allocation35_spill]] }
 0x343   :  { %v3111_v33 = vmul.f32 %v4027_v15, %v685_v44  ;;  %v754_v49 = vmul.f32 %v4028_v45, %v684_v4  ;;  %v4029_v35 = vmov %v4028_v45  ;;  %v762_v34 = vadd.f32 %v4030_v30, %v696_v61  ;;  %v601_v61 = vpop.permute.xlu0 %600  ;;  %v4055_v45 = vld [vmem:[#allocation133_spill] sm:$0xff] }
 0x344   :  { %v3117_v47 = vmul.f32 %v4029_v35, %v685_v44  ;;  %v3121_v11 = vadd.f32 %v742_v1, %v4031_v19  ;;  %v763_v48 = vadd.f32 %v4032_v54, %v697_v6  ;;  %v774_v55 = vadd.f32 %v4033_v31, %v708_v14  ;;  %v4057_v35 = vld [vmem:[#allocation134_spill] sm:$0xff]  ;;  %v4059_v31 = vld [vmem:[#allocation100_spill] sm:$0xff] }
 0x345   :  { %v775_v42 = vadd.f32 %v4034_v2, %v709_v3  ;;  %v3127_v21 = vadd.f32 %v754_v49, %v4035_v32  ;;  %v768_v13 = vadd.f32 %v4036_v17, %v762_v34  ;;  %v786_v51 = vadd.f32 %v4037_v59, %v720_v18  ;;  %v4051_v18 = vld [vmem:[#allocation94_spill] sm:$0xff] }
 0x346   :  { %v787_v53 = vadd.f32 %v4038_v60, %v721_v57  ;;  %v769_v44 = vadd.f32 %v4039_v29, %v763_v48  ;;  %v780_v4 = vadd.f32 %v4040_v16, %v774_v55  ;;  %v583_v36 = vadd.f32 %v4043_v26, %v4042_v58  ;;  %v4052_v57 = vld [vmem:[#allocation132_spill] sm:$0xff] }
 0x347   :  { %v781_v43 = vadd.f32 %v4041_v41, %v775_v42  ;;  %v792_v28 = vadd.f32 %v4044_v12, %v786_v51  ;;  %v1226_v38 = vmul.f32 0.5, %v768_v13  ;;  %v595_v46 = vadd.f32 %v4047_v27, %v4046_v8  ;;  %v4072_v27 = vld [vmem:[#allocation83_spill] sm:$0xff] }
 0x348   :  { %v793_v6 = vadd.f32 %v4045_v24, %v787_v53  ;;  %v1227_v14 = vmul.f32 0.5, %v769_v44  ;;  %v1304_v3 = vmul.f32 0.5, %v780_v4  ;;  %v630_v7 = vadd.f32 %v4052_v57, %v571_v0  ;;  %v4058_v0 = vld [vmem:[#allocation85_spill] sm:$0xff]  ;;  %v4069_v24 = vld [vmem:[#allocation82_spill] sm:$0xff] }
 0x349   :  { %v1305_v22 = vmul.f32 0.5, %v781_v43  ;;  %1613 = vtanh.f32 %v1226_v38  ;;  %v1382_v1 = vmul.f32 0.5, %v792_v28  ;;  %v642_v49 = vadd.f32 %v4055_v45, %v583_v36  ;;  %v4066_v43 = vld [vmem:[#allocation57_spill] sm:$0xff]  ;;  %v4070_v38 = vld [vmem:[#allocation71_spill] sm:$0xff]  ;;  %v4079_v45 = vld [vmem:[#allocation109_spill] sm:$0xff] }
 0x34a   :  { %v1383_v15 = vmul.f32 0.5, %v793_v6  ;;  %1615 = vtanh.f32 %v1227_v14  ;;  %v654_v30 = vadd.f32 %v4057_v35, %v595_v46  ;;  %v605_v34 = vsel %vm604_vm14, %v601_v61, %v3027_v23  ;;  %v4075_v14 = vld [vmem:[#allocation84_spill] sm:$0xff]  ;;  %v4080_v35 = vld [vmem:[#allocation110_spill] sm:$0xff] }
 0x34b   :  { %v606_v19 = vsel %vm604_vm14, %v4058_v0, %v601_v61  ;;  %1617 = vtanh.f32 %v1304_v3  ;;  %v624_v48 = vsel %vm612_vm5, %v605_v34, 0.0  ;;  %v912_v55 = vsel %vm910_vm12, %v4059_v31, %v3154_v62  ;;  %v4083_v31 = vld [vmem:[#allocation112_spill] sm:$0xff] }
 0x34c   :  { %v623_v54 = vsel %vm3145_vm10, %v606_v19, 0.0  ;;  %1619 = vtanh.f32 %v1305_v22  ;;  %v4060_v2 = vstv %s4053_s29  ;;  %v4062_v23 = vstv %s4054_s5  ;;  %v4076_v22 = vld [vmem:[#allocation81_spill] sm:$0xff]  ;;  %s4141_s29 = sld [smem:[#allocation36_spill]]  ;;  %s4156_s5 = sld [smem:[#allocation60_spill]] }
 0x34d   :  { %v633_v42 = vmul.f32 %v4060_v2, %v623_v54  ;;  %v4061_v32 = vmov %v4060_v2  ;;  %v645_v13 = vmul.f32 %v4062_v23, %v623_v54  ;;  %1621 = vtanh.f32 %v1382_v1  ;;  %v4078_v1 = vld [vmem:[#allocation108_spill] sm:$0xff]  ;;  %v4084_v2 = vld [vmem:[#allocation113_spill] sm:$0xff] }
 0x34e   :  { %v634_v17 = vmul.f32 %v4061_v32, %v624_v48  ;;  %v4063_v59 = vmov %v4062_v23  ;;  %v4064_v60 = vstv %s4056_s18  ;;  %1623 = vtanh.f32 %v1383_v15 }
 0x34f   :  { %v646_v51 = vmul.f32 %v4063_v59, %v624_v48  ;;  %v657_v53 = vmul.f32 %v4064_v60, %v623_v54  ;;  %v4065_v29 = vmov %v4064_v60  ;;  %v635_v16 = vadd.f32 %v633_v42, %v3078_v40  ;;  %v4082_v54 = vld [vmem:[#allocation111_spill] sm:$0xff]  ;;  %v4087_v59 = vld [vmem:[#allocation135_spill] sm:$0xff] }
 0x350   :  { %v658_v44 = vmul.f32 %v4065_v29, %v624_v48  ;;  %v636_v4 = vadd.f32 %v634_v17, %v630_v7  ;;  %v647_v41 = vadd.f32 %v645_v13, %v3080_v9  ;;  %vm417_vm14 = vcmp.le.s32.totalorder %v4066_v43, 14  ;;  %v4074_v9 = vld [vmem:[#allocation78_spill] sm:$0xff]  ;;  %v4088_v60 = vld [vmem:[#allocation136_spill] sm:$0xff]  ;;  %v4165_v43 = vld [vmem:[#allocation127_spill] sm:$0xff] }
 0x351   :  { %v648_v58 = vadd.f32 %v646_v51, %v642_v49  ;;  %v659_v26 = vadd.f32 %v657_v53, %v3086_v37  ;;  %v924_v28 = vsel %vm2492_vm13, %v912_v55, 0.0  ;;  %v798_v6 = vadd.f32 %v4069_v24, %v635_v16  ;;  %vm1013_vm0 = vmand %vm417_vm14, %vm2306_vm7 }
 0x352   :  { %v660_v36 = vadd.f32 %v658_v44, %v654_v30  ;;  %v799_v8 = vadd.f32 %v4070_v38, %v636_v4  ;;  %v810_v40 = vadd.f32 %v4072_v27, %v647_v41  ;;  %v4073_v46 = vstv %s3884_s22  ;;  %s4086_s22 = sld [smem:[#allocation56_spill]]  ;;  %v4090_v4 = vld [vmem:[#allocation137_spill] sm:$0xff] }
 0x353   :  { %v930_v39 = vmul.f32 %v4073_v46, %v924_v28  ;;  %v811_v61 = vadd.f32 %v4074_v9, %v648_v58  ;;  %v822_v3 = vadd.f32 %v4075_v14, %v659_v26  ;;  %v4077_v37 = vstv %s3885_s7  ;;  %v1614_v19 = vpop.eup %1613  ;;  %s4089_s7 = sld [smem:[#allocation58_spill]]  ;;  %v4091_v38 = vld [vmem:[#allocation19_spill] sm:$0xff] }
 0x354   :  { %v823_v57 = vadd.f32 %v4076_v22, %v660_v36  ;;  %v942_v7 = vmul.f32 %v4077_v37, %v924_v28  ;;  %v804_v15 = vadd.f32 %v4078_v1, %v798_v6  ;;  %v805_v49 = vadd.f32 %v4079_v45, %v799_v8  ;;  %v1616_v23 = vpop.eup %1615  ;;  %v4095_v1 = vld [vmem:[#allocation20_spill] sm:$0xff] }
 0x355   :  { %v816_v30 = vadd.f32 %v4080_v35, %v810_v40  ;;  %v4081_v34 = vstv %s4067_s15  ;;  %v817_v48 = vadd.f32 %v4082_v54, %v811_v61  ;;  %v828_v55 = vadd.f32 %v4083_v31, %v822_v3  ;;  %v1618_v44 = vpop.eup %1617  ;;  %v4096_v45 = vld [vmem:[#allocation130_spill] sm:$0xff]  ;;  %v3227_v35 = vpop.permute.xlu0 %1003  ;;  %v4097_v54 = vld [vmem:[#allocation21_spill] sm:$0xff] }
 0x356   :  { %v954_v0 = vmul.f32 %v4081_v34, %v924_v28  ;;  %v829_v42 = vadd.f32 %v4084_v2, %v823_v57  ;;  %v4085_v32 = vstv %s4071_s2  ;;  %v1230_v13 = vmul.f32 0.5, %v1614_v19  ;;  %v1620_v36 = vpop.eup %1619  ;;  %v4100_v31 = vld [vmem:[#allocation131_spill] sm:$0xff] }
 0x357   :  { %v966_v17 = vmul.f32 %v4085_v32, %v924_v28  ;;  %v931_v51 = vadd.f32 %v4087_v59, %v804_v15  ;;  %v3210_v53 = vadd.f32 %v4088_v60, %v816_v30  ;;  %v932_v29 = vadd.f32 %v930_v39, %v805_v49  ;;  %v1622_v46 = vpop.eup %1621  ;;  %v4094_v39 = vld [vmem:[#allocation129_spill] sm:$0xff]  ;;  %v909_v30 = vpop.permute.xlu1 %908 }
 0x358   :  { %v1231_v16 = vmul.f32 0.5, %v1616_v23  ;;  %v3213_v41 = vadd.f32 %v4090_v4, %v828_v55  ;;  %v944_v58 = vadd.f32 %v942_v7, %v817_v48  ;;  %v956_v26 = vadd.f32 %v954_v0, %v829_v42  ;;  %v1624_v57 = vpop.eup %1623  ;;  %v4101_v55 = vld [vmem:[#allocation86_spill] sm:$0xff]  ;;  %v4102_v42 = vld [vmem:[#allocation87_spill] sm:$0xff] }
 0x359   :  { %v1232_v24 = vadd.f32 0.5, %v1230_v13  ;;  %v1308_v6 = vmul.f32 0.5, %v1618_v44  ;;  %v968_v8 = vadd.f32 %v966_v17, %v4091_v38  ;;  %v4092_v27 = vstv %s4086_s22  ;;  %v4103_v13 = vld [vmem:[#allocation117_spill] sm:$0xff]  ;;  %v4104_v44 = vld [vmem:[#allocation114_spill] sm:$0xff]  ;;  %v4105_v4 = vld [vmem:[#allocation115_spill] sm:$0xff] }
 0x35a   :  { %v978_v40 = vmul.f32 %v4092_v27, %v924_v28  ;;  %v1233_v9 = vadd.f32 0.5, %v1231_v16  ;;  %v1309_v61 = vmul.f32 0.5, %v1620_v36  ;;  %v4093_v14 = vstv %s4089_s7  ;;  %v4106_v36 = vld [vmem:[#allocation88_spill] sm:$0xff] }
 0x35b   :  { %v990_v3 = vmul.f32 %v4093_v14, %v924_v28  ;;  %v733_v22 = vadd.f32 %v3102_v5, %v4094_v39  ;;  %v3222_v37 = vadd.f32 0.5, %v1308_v6  ;;  %v1386_v7 = vmul.f32 0.5, %v1622_v46  ;;  %v4113_v14 = vld [vmem:[#allocation119_spill] sm:$0xff]  ;;  %v4115_v39 = vld [vmem:[#allocation99_spill] sm:$0xff] }
 0x35c   :  { %v980_v15 = vadd.f32 %v978_v40, %v4095_v1  ;;  %v745_v49 = vadd.f32 %v3111_v33, %v4096_v45  ;;  %v1266_v34 = vcombine.low %v1232_v24, %v1233_v9  ;;  %v1311_v0 = vadd.f32 0.5, %v1309_v61 }
 0x35d   :  { %v1387_v19 = vmul.f32 0.5, %v1624_v57  ;;  %v992_v28 = vadd.f32 %v990_v3, %v4097_v54  ;;  %v1388_v5 = vadd.f32 0.5, %v1386_v7  ;;  %v757_v33 = vadd.f32 %v3117_v47, %v4100_v31 }
 0x35e   :  { %v835_v2 = vadd.f32 %v4101_v55, %v733_v22  ;;  %v847_v32 = vadd.f32 %v4102_v42, %v745_v49  ;;  %v1344_v17 = vcombine.low %v3222_v37, %v1311_v0  ;;  %v1009_v59 = vsel %vm1007_vm2, %v4103_v13, %v3227_v35  ;;  %v4116_v37 = vld [vmem:[#allocation44_spill] sm:$0xff] }
 0x35f   :  { %v1389_v23 = vadd.f32 0.5, %v1387_v19  ;;  %v911_v60 = vsel %vm910_vm12, %v3154_v62, %v909_v30  ;;  %v859_v24 = vadd.f32 %v4106_v36, %v757_v33  ;;  %v1025_v6 = vsel %vm1013_vm0, %v1009_v59, 0.0 }
 0x360   :  { %v841_v16 = vadd.f32 %v4104_v44, %v835_v2  ;;  %v853_v47 = vadd.f32 %v4105_v4, %v847_v32  ;;  %vm418_vm7 = vcmp.le.s32.totalorder %v4048_v25, 14  ;;  %v4109_v27 = vstv %s4099_s23 }
 0x361   :  { %v1422_v38 = vcombine.low %v1388_v5, %v1389_v23  ;;  %v1031_v40 = vmul.f32 %v4109_v27, %v1025_v6  ;;  %v4110_v46 = vstv %s2227_s6  ;;  %v4111_v61 = vstv %s2229_s3  ;;  %s4118_s3 = sld [smem:[#allocation33_spill]]  ;;  %s4122_s6 = sld [smem:[#allocation116_spill]]  ;;  %vm1176_vm8 = vmand %vm418_vm7, %vm3059_vm15 }
 0x362   :  { %v1043_v9 = vmul.f32 %v4110_v46, %v1025_v6  ;;  %v1055_v62 = vmul.f32 %v4111_v61, %v1025_v6  ;;  %vm419_vm11 = vcmp.le.s32.totalorder %v4051_v18, 14  ;;  %v865_v3 = vadd.f32 %v4113_v14, %v859_v24  ;;  %v4127_v6 = vld [vmem:[#allocation138_spill] sm:$0xff] }
 0x363   :  { %v914_v22 = vsel %vm910_vm12, %v909_v30, %v4115_v39  ;;  %v925_v57 = vsel %vm3059_vm15, %v911_v60, 0.0  ;;  %v3264_v7 = vrot.slane %v1266_v34, %v4116_v37  ;;  %v3266_v1 = vadd.f32 %v1031_v40, %v841_v16  ;;  %vm1014_vm12 = vmand %vm418_vm7, %vm2844_vm4 }
 0x364   :  { %v3268_v45 = vadd.f32 %v1043_v9, %v853_v47  ;;  %v926_v49 = vsel %vm3072_vm6, %v914_v22, 0.0  ;;  %v4117_v0 = vstv %s4107_s0  ;;  %v3274_v54 = vadd.f32 %v1055_v62, %v865_v3  ;;  %vm1015_vm9 = vmand %vm419_vm11, %vm2870_vm3 }
 0x365   :  { %v935_v19 = vmul.f32 %v4117_v0, %v925_v57  ;;  %v4119_v30 = vmov %v4117_v0  ;;  %v4120_v5 = vstv %s4108_s11  ;;  %v4123_v2 = vstv %s4112_s10  ;;  %v4133_v0 = vld [vmem:[#allocation140_spill] sm:$0xff]  ;;  %vm1175_vm3 = vmand %vm417_vm14, %vm2492_vm13 }
 0x366   :  { %v936_v48 = vmul.f32 %v4119_v30, %v926_v49  ;;  %v947_v31 = vmul.f32 %v4120_v5, %v925_v57  ;;  %v4121_v34 = vmov %v4120_v5  ;;  %v959_v42 = vmul.f32 %v4123_v2, %v925_v57  ;;  %vm1177_vm10 = vmand %vm419_vm11, %vm3072_vm6 }
 0x367   :  { %v948_v33 = vmul.f32 %v4121_v34, %v926_v49  ;;  %v937_v55 = vadd.f32 %v935_v19, %v931_v51  ;;  %v4124_v32 = vmov %v4123_v2  ;;  %v4125_v13 = vstv %s4114_s12 }
 0x368   :  { %v960_v23 = vmul.f32 %v4124_v32, %v926_v49  ;;  %v971_v59 = vmul.f32 %v4125_v13, %v925_v57  ;;  %v938_v60 = vadd.f32 %v936_v48, %v932_v29  ;;  %v949_v44 = vadd.f32 %v947_v31, %v3210_v53  ;;  %v4132_v53 = vld [vmem:[#allocation139_spill] sm:$0xff]  ;;  %v1006_v48 = vpop.permute.xlu0 %1005  ;;  %v4136_v31 = vld [vmem:[#allocation90_spill] sm:$0xff] }
 0x369   :  { %v950_v16 = vadd.f32 %v948_v33, %v944_v58  ;;  %v4126_v4 = vmov %v4125_v13  ;;  %v961_v36 = vadd.f32 %v959_v42, %v3213_v41  ;;  %v4128_v40 = vstv %s4118_s3 }
 0x36a   :  { %v972_v47 = vmul.f32 %v4126_v4, %v926_v49  ;;  %v962_v24 = vadd.f32 %v960_v23, %v956_v26  ;;  %v3293_v27 = vadd.f32 %v971_v59, %v4127_v6  ;;  %v983_v51 = vmul.f32 %v4128_v40, %v925_v57 }
 0x36b   :  { %v4129_v9 = vmov %v4128_v40  ;;  %v4130_v62 = vstv %s4122_s6  ;;  %v1234_v39 = vmul.f32 0.5, %v937_v55  ;;  %v1235_v22 = vmul.f32 0.5, %v938_v60 }
 0x36c   :  { %v3297_v46 = vadd.f32 %v972_v47, %v968_v8  ;;  %v984_v61 = vmul.f32 %v4129_v9, %v926_v49  ;;  %v995_v14 = vmul.f32 %v4130_v62, %v925_v57  ;;  %v4131_v29 = vmov %v4130_v62 }
 0x36d   :  { %v996_v3 = vmul.f32 %v4131_v29, %v926_v49  ;;  %v3306_v58 = vadd.f32 %v983_v51, %v4132_v53  ;;  %v1312_v41 = vmul.f32 0.5, %v949_v44  ;;  %v1313_v8 = vmul.f32 0.5, %v950_v16  ;;  %v4145_v44 = vld [vmem:[#allocation141_spill] sm:$0xff] }
 0x36e   :  { %v3308_v26 = vadd.f32 %v984_v61, %v980_v15  ;;  %v3311_v19 = vadd.f32 %v995_v14, %v4133_v0  ;;  %1625 = vtanh.f32 %v1234_v39  ;;  %v3316_v57 = vrot.slane %v1344_v17, %v4116_v37  ;;  %v4150_v61 = vld [vmem:[#allocation143_spill] sm:$0xff] }
 0x36f   :  { %v3313_v30 = vadd.f32 %v996_v3, %v992_v28  ;;  %v1390_v49 = vmul.f32 0.5, %v961_v36  ;;  %v1391_v5 = vmul.f32 0.5, %v962_v24  ;;  %1627 = vtanh.f32 %v1235_v22  ;;  %v4135_v28 = vld [vmem:[#allocation89_spill] sm:$0xff]  ;;  %v4147_v36 = vld [vmem:[#allocation142_spill] sm:$0xff] }
 0x370   :  { %v3323_v15 = vrot.slane %v1422_v38, %v4116_v37  ;;  %v834_v17 = vadd.f32 %v4135_v28, %v3105_v63  ;;  %v846_v34 = vadd.f32 %v4136_v31, %v3121_v11  ;;  %1629 = vtanh.f32 %v1312_v41  ;;  %v4140_v63 = vld [vmem:[#allocation120_spill] sm:$0xff]  ;;  %v4142_v11 = vld [vmem:[#allocation121_spill] sm:$0xff] }
 0x371   :  { %v858_v33 = vadd.f32 %v4137_v50, %v3127_v21  ;;  %v1008_v38 = vsel %vm1007_vm2, %v3227_v35, %v1006_v48  ;;  %v1011_v55 = vsel %vm1007_vm2, %v1006_v48, %v4139_v20  ;;  %1631 = vtanh.f32 %v1313_v8  ;;  %v4143_v21 = vld [vmem:[#allocation122_spill] sm:$0xff]  ;;  %v1069_v35 = vpop.permute.xlu1 %1068  ;;  %v4153_v41 = vld [vmem:[#allocation124_spill] sm:$0xff] }
 0x372   :  { %v840_v2 = vadd.f32 %v4140_v63, %v834_v17  ;;  %v852_v42 = vadd.f32 %v4142_v11, %v846_v34  ;;  %v1026_v32 = vsel %vm1014_vm12, %v1008_v38, 0.0  ;;  %1633 = vtanh.f32 %v1390_v49  ;;  %v4155_v17 = vld [vmem:[#allocation148_spill] sm:$0xff]  ;;  %v3372_v38 = vpop.permute.xlu0 %1165 }
 0x373   :  { %v864_v23 = vadd.f32 %v4143_v21, %v858_v33  ;;  %v1027_v13 = vsel %vm1015_vm9, %v1011_v55, 0.0  ;;  %v4144_v59 = vstv %s4134_s17  ;;  %1635 = vtanh.f32 %v1391_v5  ;;  %v4159_v55 = vld [vmem:[#allocation149_spill] sm:$0xff] }
 0x374   :  { %v1036_v60 = vmul.f32 %v4144_v59, %v1026_v32  ;;  %v1032_v16 = vadd.f32 %v4145_v44, %v840_v2  ;;  %v4146_v4 = vmov %v4144_v59  ;;  %v1044_v24 = vadd.f32 %v4147_v36, %v852_v42 }
 0x375   :  { %v1037_v47 = vmul.f32 %v4146_v4, %v1027_v13  ;;  %v4148_v6 = vstv %s4138_s9  ;;  %v1056_v62 = vadd.f32 %v4150_v61, %v864_v23  ;;  %v4151_v14 = vstv %s4141_s29 }
 0x376   :  { %v1048_v40 = vmul.f32 %v4148_v6, %v1026_v32  ;;  %v4149_v51 = vmov %v4148_v6  ;;  %v1060_v29 = vmul.f32 %v4151_v14, %v1026_v32  ;;  %v1038_v3 = vadd.f32 %v1036_v60, %v1032_v16 }
 0x377   :  { %v1049_v9 = vmul.f32 %v4149_v51, %v1027_v13  ;;  %v1039_v53 = vadd.f32 %v1037_v47, %v3266_v1  ;;  %v4152_v39 = vmov %v4151_v14  ;;  %vm4154_vm2 = vcmp.lt.s32.totalorder %v2130_v10, 112 }
 0x378   :  { %v1061_v22 = vmul.f32 %v4152_v39, %v1027_v13  ;;  %v1074_v0 = vsel %vm4154_vm2, %v4153_v41, %v1069_v35  ;;  %v1050_v8 = vadd.f32 %v1048_v40, %v1044_v24  ;;  %v1062_v49 = vadd.f32 %v1060_v29, %v1056_v62  ;;  %v1626_v20 = vpop.eup %1625  ;;  %vm4167_vm4 = vmmov %vm4154_vm2 }
 0x379   :  { %v1051_v48 = vadd.f32 %v1049_v9, %v3268_v45  ;;  %v1086_v5 = vsel %vm417_vm14, %v1074_v0, 0.0  ;;  %v1093_v31 = vadd.f32 %v4155_v17, %v1038_v3  ;;  %v4157_v1 = vstv %s2283_s24  ;;  %v4160_v45 = vld [vmem:[#allocation150_spill] sm:$0xff]  ;;  %v1628_v23 = vpop.eup %1627  ;;  %vm4172_vm1 = vmmov %vm4154_vm2  ;;  %s4180_s24 = sld [smem:[#allocation159_spill]] }
 0x37a   :  { %v1063_v28 = vadd.f32 %v1061_v22, %v3274_v54  ;;  %v1092_v34 = vmul.f32 %v4157_v1, %v1086_v5  ;;  %v4158_v50 = vstv %s3904_s16  ;;  %v1105_v63 = vadd.f32 %v4159_v55, %v1050_v8  ;;  %v1071_v54 = vpop.permute.xlu1 %1070  ;;  %v1630_v4 = vpop.eup %1629 }
 0x37b   :  { %v1104_v33 = vmul.f32 %v4158_v50, %v1086_v5  ;;  %v1117_v2 = vadd.f32 %v4160_v45, %v1062_v49  ;;  %v4161_v11 = vstv %s3906_s20  ;;  %v4162_v32 = vstv %s2235_s25  ;;  %v1632_v40 = vpop.eup %1631 }
 0x37c   :  { %v1116_v42 = vmul.f32 %v4161_v11, %v1086_v5  ;;  %v3380_v21 = vmul.f32 %v4162_v32, %v1086_v5  ;;  %v1238_v13 = vmul.f32 0.5, %v1626_v20  ;;  %v1094_v59 = vadd.f32 %v1092_v34, %v1039_v53  ;;  %v1634_v14 = vpop.eup %1633 }
 0x37d   :  { %v1106_v60 = vadd.f32 %v1104_v33, %v1051_v48  ;;  %v4163_v44 = vstv %s4156_s5  ;;  %v1239_v47 = vmul.f32 0.5, %v1628_v23  ;;  %v4164_v24 = vstv %s2241_s30  ;;  %v1636_v0 = vpop.eup %1635 }
 0x37e   :  { %v3388_v16 = vmul.f32 %v4163_v44, %v1086_v5  ;;  %v1118_v36 = vadd.f32 %v1116_v42, %v1063_v28  ;;  %v3392_v6 = vmul.f32 %v4164_v24, %v1086_v5  ;;  %vm4166_vm13 = vcmp.lt.s32.totalorder %v2130_v10, 111 }
 0x37f   :  { %v1171_v12 = vsel %vm4166_vm13, %v4165_v43, %v3372_v38  ;;  %v1240_v51 = vadd.f32 0.5, %v1238_v13  ;;  %v1316_v9 = vmul.f32 0.5, %v1630_v4  ;;  %v1073_v62 = vsel %vm4167_vm4, %v1069_v35, %v1071_v54  ;;  %v4171_v35 = vld [vmem:[#allocation123_spill] sm:$0xff]  ;;  %vm4190_vm15 = vmmov %vm4166_vm13 }
 0x380   :  { %v1187_v61 = vsel %vm1175_vm3, %v1171_v12, 0.0  ;;  %v1241_v29 = vadd.f32 0.5, %v1239_v47  ;;  %v1317_v3 = vmul.f32 0.5, %v1632_v40  ;;  %v4168_v53 = vstv %s3917_s14  ;;  %vm4192_vm5 = vmmov %vm4166_vm13 }
 0x381   :  { %v3402_v39 = vmul.f32 %v4168_v53, %v1187_v61  ;;  %v4169_v22 = vstv %s3920_s21  ;;  %v1318_v8 = vadd.f32 0.5, %v1316_v9  ;;  %v1394_v48 = vmul.f32 0.5, %v1634_v14 }
 0x382   :  { %v3406_v41 = vmul.f32 %v4169_v22, %v1187_v61  ;;  %v4170_v49 = vstv %s3929_s1  ;;  %v1076_v28 = vsel %vm4172_vm1, %v1071_v54, %v4171_v35  ;;  %v1267_v17 = vcombine.low %v1240_v51, %v1241_v29 }
 0x383   :  { %v3410_v5 = vmul.f32 %v4170_v49, %v1187_v61  ;;  %v1319_v1 = vadd.f32 0.5, %v1317_v3  ;;  %v1395_v34 = vmul.f32 0.5, %v1636_v0  ;;  %v1087_v50 = vsel %vm418_vm7, %v1073_v62, 0.0 }
 0x384   :  { %v1396_v33 = vadd.f32 0.5, %v1394_v48  ;;  %v1088_v20 = vsel %vm419_vm11, %v1076_v28, 0.0  ;;  %v4173_v55 = vstv %s2712_s4  ;;  %v4174_v11 = vstv %s2714_s13  ;;  %s4194_s4 = sld [smem:[#allocation43_spill]] }
 0x385   :  { %v1097_v45 = vmul.f32 %v4173_v55, %v1087_v50  ;;  %v1109_v42 = vmul.f32 %v4174_v11, %v1087_v50  ;;  %v1281_v32 = vrot.slane %v1267_v17, %v4116_v37  ;;  %v1345_v54 = vcombine.low %v1318_v8, %v1319_v1 }
 0x386   :  { %v1397_v23 = vadd.f32 0.5, %v1395_v34  ;;  %v4175_v13 = vmov %v4173_v55  ;;  %v4176_v47 = vmov %v4174_v11  ;;  %v4177_v12 = vstv %s2734_s19 }
 0x387   :  { %v1098_v44 = vmul.f32 %v4175_v13, %v1088_v20  ;;  %v1099_v4 = vadd.f32 %v1097_v45, %v1093_v31  ;;  %v1110_v24 = vmul.f32 %v4176_v47, %v1088_v20  ;;  %v1111_v43 = vadd.f32 %v1109_v42, %v1105_v63  ;;  %v4188_v13 = vld [vmem:[#allocation146_spill] sm:$0xff] }
 0x388   :  { %v1121_v40 = vmul.f32 %v4177_v12, %v1087_v50  ;;  %v1282_v51 = vcombine.low %v3264_v7, %v1281_v32  ;;  %v1359_v9 = vrot.slane %v1345_v54, %v4116_v37  ;;  %v1423_v61 = vcombine.low %v1396_v33, %v1397_v23 }
 0x389   :  { %v1100_v62 = vadd.f32 %v1098_v44, %v1094_v59  ;;  %v1112_v14 = vadd.f32 %v1110_v24, %v1106_v60  ;;  %v4178_v29 = vmov %v4177_v12  ;;  %v4179_v31 = vstv %s2736_s8  ;;  %s4189_s8 = sld [smem:[#allocation42_spill]] }
 0x38a   :  { %v1122_v3 = vmul.f32 %v4178_v29, %v1088_v20  ;;  %v1123_v53 = vadd.f32 %v1121_v40, %v1117_v2  ;;  %v1133_v22 = vmul.f32 %v4179_v31, %v1087_v50  ;;  %1302 = vst [vmem:[%s4180_s24] sm:$0xff] %v1282_v51  ;;  %v1360_v63 = vcombine.low %v3316_v57, %v1359_v9  ;;  %v4197_v51 = vld [vmem:[#allocation152_spill] sm:$0xff] }
 0x38b   :  { %v1437_v0 = vrot.slane %v1423_v61, %v4116_v37  ;;  %v4181_v7 = vmov %v4179_v31  ;;  %v4182_v48 = vstv %s2749_s28  ;;  %v4184_v28 = vstv %s2751_s26 }
 0x38c   :  { %v1134_v8 = vmul.f32 %v4181_v7, %v1088_v20  ;;  %v1145_v49 = vmul.f32 %v4182_v48, %v1087_v50  ;;  %v1124_v35 = vadd.f32 %v1122_v3, %v1118_v36  ;;  %v4183_v59 = vmov %v4182_v48  ;;  %1380 = vst [vmem:[%s4180_s24 + $0x10] sm:$0xff] %v1360_v63  ;;  %v4186_v36 = vld [vmem:[#allocation144_spill] sm:$0xff]  ;;  %v4200_v3 = vld [vmem:[#allocation153_spill] sm:$0xff] }
 0x38d   :  { %v1146_v60 = vmul.f32 %v4183_v59, %v1088_v20  ;;  %v1157_v17 = vmul.f32 %v4184_v28, %v1087_v50  ;;  %v4185_v2 = vmov %v4184_v28  ;;  %v1438_v34 = vcombine.low %v3323_v15, %v1437_v0  ;;  %v1168_v50 = vpop.permute.xlu1 %1167  ;;  %v4187_v15 = vld [vmem:[#allocation145_spill] sm:$0xff] }
 0x38e   :  { %v1158_v1 = vmul.f32 %v4185_v2, %v1088_v20  ;;  %v1242_v57 = vmul.f32 0.5, %v1099_v4  ;;  %v1243_v33 = vmul.f32 0.5, %v1100_v62  ;;  %v1320_v55 = vmul.f32 0.5, %v1111_v43 }
 0x38f   :  { %v1321_v45 = vmul.f32 0.5, %v1112_v14  ;;  %v1398_v11 = vmul.f32 0.5, %v1123_v53  ;;  %v1399_v42 = vmul.f32 0.5, %v1124_v35  ;;  %v1129_v32 = vadd.f32 %v4186_v36, %v3293_v27  ;;  %1458 = vst [vmem:[%s4180_s24 + $0x20] sm:$0xff] %v1438_v34 }
 0x390   :  { %1637 = vtanh.f32 %v1242_v57  ;;  %v1130_v20 = vadd.f32 %v3380_v21, %v3297_v46  ;;  %v1141_v54 = vadd.f32 %v4187_v15, %v3306_v58  ;;  %v1142_v23 = vadd.f32 %v3388_v16, %v3308_v26  ;;  %v4193_v21 = vld [vmem:[#allocation151_spill] sm:$0xff] }
 0x391   :  { %1639 = vtanh.f32 %v1243_v33  ;;  %v1135_v27 = vadd.f32 %v1133_v22, %v1129_v32  ;;  %v1153_v44 = vadd.f32 %v4188_v13, %v3311_v19  ;;  %v1154_v4 = vadd.f32 %v3392_v6, %v3313_v30  ;;  %v4191_v30 = vld [vmem:[#allocation128_spill] sm:$0xff] }
 0x392   :  { %1641 = vtanh.f32 %v1320_v55  ;;  %v1136_v46 = vadd.f32 %v1134_v8, %v1130_v20  ;;  %v1147_v56 = vadd.f32 %v1145_v49, %v1141_v54  ;;  %v1148_v58 = vadd.f32 %v1146_v60, %v1142_v23 }
 0x393   :  { %1643 = vtanh.f32 %v1321_v45  ;;  %v1159_v25 = vadd.f32 %v1157_v17, %v1153_v44  ;;  %v1160_v26 = vadd.f32 %v1158_v1, %v1154_v4  ;;  %v1170_v19 = vsel %vm4190_vm15, %v3372_v38, %v1168_v50 }
 0x394   :  { %1645 = vtanh.f32 %v1398_v11  ;;  %v1173_v52 = vsel %vm4192_vm5, %v1168_v50, %v4191_v30  ;;  %v1188_v18 = vsel %vm1176_vm8, %v1170_v19, 0.0  ;;  %v1194_v16 = vadd.f32 %v4193_v21, %v1135_v27 }
 0x395   :  { %1647 = vtanh.f32 %v1399_v42  ;;  %v1189_v6 = vsel %vm1177_vm10, %v1173_v52, 0.0  ;;  %v1195_v47 = vadd.f32 %v3402_v39, %v1136_v46  ;;  %v4195_v24 = vstv %s2765_s27 }
 0x396   :  { %v1198_v43 = vmul.f32 %v4195_v24, %v1188_v18  ;;  %v4196_v12 = vmov %v4195_v24  ;;  %v1206_v38 = vadd.f32 %v4197_v51, %v1147_v56  ;;  %v1207_v9 = vadd.f32 %v3406_v41, %v1148_v58 }
 0x397   :  { %v1199_v40 = vmul.f32 %v4196_v12, %v1189_v6  ;;  %v4198_v61 = vstv %s4189_s8  ;;  %v1218_v53 = vadd.f32 %v4200_v3, %v1159_v25  ;;  %v1219_v31 = vadd.f32 %v3410_v5, %v1160_v26 }
 0x398   :  { %v1210_v10 = vmul.f32 %v4198_v61, %v1188_v18  ;;  %v1200_v62 = vadd.f32 %v1198_v43, %v1194_v16  ;;  %v4199_v14 = vmov %v4198_v61  ;;  %v4201_v39 = vstv %s4194_s4 }
 0x399   :  { %v1211_v29 = vmul.f32 %v4199_v14, %v1189_v6  ;;  %v1201_v22 = vadd.f32 %v1199_v40, %v1195_v47  ;;  %v1222_v0 = vmul.f32 %v4201_v39, %v1188_v18  ;;  %v4202_v7 = vmov %v4201_v39 }
 0x39a   :  { %v1212_v63 = vadd.f32 %v1210_v10, %v1206_v38  ;;  %v1223_v8 = vmul.f32 %v4202_v7, %v1189_v6  ;;  %v1250_v49 = vmul.f32 0.5, %v1200_v62  ;;  %v1638_v35 = vpop.eup %1637 }
 0x39b   :  { %v1213_v48 = vadd.f32 %v1211_v29, %v1207_v9  ;;  %v1224_v59 = vadd.f32 %v1222_v0, %v1218_v53  ;;  %v1251_v60 = vmul.f32 0.5, %v1201_v22  ;;  %v1640_v17 = vpop.eup %1639  ;;  %v1246_v2 = vmul.f32 0.5, %v1638_v35 }
 0x39c   :  { %v1225_v41 = vadd.f32 %v1223_v8, %v1219_v31  ;;  %v1328_v28 = vmul.f32 0.5, %v1212_v63  ;;  %1649 = vtanh.f32 %v1250_v49  ;;  %v1642_v34 = vpop.eup %1641  ;;  %v1247_v57 = vmul.f32 0.5, %v1640_v17 }
 0x39d   :  { %v1329_v1 = vmul.f32 0.5, %v1213_v48  ;;  %1651 = vtanh.f32 %v1251_v60  ;;  %v1406_v5 = vmul.f32 0.5, %v1224_v59  ;;  %v1644_v55 = vpop.eup %1643  ;;  %v1248_v45 = vadd.f32 0.5, %v1246_v2 }
 0x39e   :  { %v1407_v33 = vmul.f32 0.5, %v1225_v41  ;;  %v1324_v11 = vmul.f32 0.5, %v1642_v34  ;;  %1653 = vtanh.f32 %v1328_v28  ;;  %v1646_v42 = vpop.eup %1645  ;;  %v1249_v36 = vadd.f32 0.5, %v1247_v57 }
 0x39f   :  { %v1325_v32 = vmul.f32 0.5, %v1644_v55  ;;  %1655 = vtanh.f32 %v1329_v1  ;;  %v1648_v50 = vpop.eup %1647  ;;  %v1402_v15 = vmul.f32 0.5, %v1646_v42 }
 0x3a0   :  { %v1326_v20 = vadd.f32 0.5, %v1324_v11  ;;  %1657 = vtanh.f32 %v1406_v5  ;;  %v1283_v54 = vcombine.low %v1248_v45, %v1249_v36  ;;  %v1403_v27 = vmul.f32 0.5, %v1648_v50 }
 0x3a1   :  { %v1327_v23 = vadd.f32 0.5, %v1325_v32  ;;  %1659 = vtanh.f32 %v1407_v33  ;;  %v1404_v13 = vadd.f32 0.5, %v1402_v15 }
 0x3a2   :  { %v1405_v4 = vadd.f32 0.5, %v1403_v27  ;;  %v1291_v9 = vrot.slane %v1283_v54, %v4116_v37 }
 0x3a3   :  { %v1361_v44 = vcombine.low %v1326_v20, %v1327_v23 }
 0x3a4   :  { %v1439_v46 = vcombine.low %v1404_v13, %v1405_v4 }
 0x3a5   :  { %v1369_v29 = vrot.slane %v1361_v44, %v4116_v37 }
 0x3a6   :  { %v1650_v56 = vpop.eup %1649  ;;  %v1447_v22 = vrot.slane %v1439_v46, %v4116_v37 }
 0x3a7   :  { %v1652_v58 = vpop.eup %1651  ;;  %v1254_v25 = vmul.f32 0.5, %v1650_v56 }
 0x3a8   :  { %v1654_v26 = vpop.eup %1653  ;;  %v1255_v19 = vmul.f32 0.5, %v1652_v58 }
 0x3a9   :  { %v1656_v30 = vpop.eup %1655  ;;  %v1256_v52 = vadd.f32 0.5, %v1254_v25  ;;  %v1332_v18 = vmul.f32 0.5, %v1654_v26 }
 0x3aa   :  { %v1658_v21 = vpop.eup %1657  ;;  %v1257_v16 = vadd.f32 0.5, %v1255_v19  ;;  %v1333_v6 = vmul.f32 0.5, %v1656_v30 }
 0x3ab   :  { %v1660_v47 = vpop.eup %1659  ;;  %v1334_v24 = vadd.f32 0.5, %v1332_v18  ;;  %v1410_v43 = vmul.f32 0.5, %v1658_v21 }
 0x3ac   :  { %v1284_v12 = vcombine.low %v1256_v52, %v1257_v16  ;;  %v1335_v40 = vadd.f32 0.5, %v1333_v6  ;;  %v1411_v51 = vmul.f32 0.5, %v1660_v47 }
 0x3ad   :  { %v1412_v38 = vadd.f32 0.5, %v1410_v43 }
 0x3ae   :  { %v1298_v61 = vrot.slane %v1284_v12, %v4116_v37  ;;  %v1362_v10 = vcombine.low %v1334_v24, %v1335_v40  ;;  %v1413_v62 = vadd.f32 0.5, %v1411_v51 }
 0x3b0   :  { %v1299_v14 = vcombine.low %v1291_v9, %v1298_v61  ;;  %v1376_v3 = vrot.slane %v1362_v10, %v4116_v37  ;;  %v1440_v53 = vcombine.low %v1412_v38, %v1413_v62 }
 0x3b2   :  { %1303 = vst [vmem:[%s4180_s24 + $0x8] sm:$0xff] %v1299_v14  ;;  %v1377_v31 = vcombine.low %v1369_v29, %v1376_v3  ;;  %v1454_v63 = vrot.slane %v1440_v53, %v4116_v37 }
 0x3b4   :  { %1381 = vst [vmem:[%s4180_s24 + $0x18] sm:$0xff] %v1377_v31  ;;  %v1455_v39 = vcombine.low %v1447_v22, %v1454_v63 }
 0x3b6   :  { %1459 = vst [vmem:[%s4180_s24 + $0x28] sm:$0xff] %v1455_v39 }
 0x3b7   :  { %1464 = vsyncpa [#allocation3], 1 }
 0x3b8   :  { %1465 = vsyncpa [#allocation6], 1 }
 0x3b9   :  { %1466 = vsyncpa [#allocation4], 1 }
 0x3ba   :  { %1467 = vsyncpa [#allocation10], 1 }
 0x3bb   :  { %1468 = vsyncpa [#allocation13], 1 }

</bundles_post_ra>
